<compile_context>
chip_gen: v7x
topology: tpu7x:2x2x1
jax: 0.10.0
libtpu: 0.0.40
codegen_flags: <defaults>
</compile_context>

<pallas_src>
import jax
import jax.numpy as jnp
import numpy as np
from jax.experimental import pallas as pl
from jax.experimental.pallas import tpu as pltpu


def _landmark_sqerr_kernel(x_ref, lm_ref, out_ref):
    # x_ref  : (Cc*h, w)       low-res heatmap rows, ordered (c, i)
    # lm_ref : (Cc*h, fh, W)   row (c, i) holds the fh target rows that map to
    #                          source row i (nearest upsample); lane axis = W
    # out_ref: (Cc*h, 1)       per-(c, i) sum of squared errors
    rows, w = x_ref.shape
    _, fh, W = lm_ref.shape
    fw = W // w  # exact (asserted in the wrapper), so nearest src col = r // fw

    x = x_ref[...].astype(jnp.float32)

    # One-hot nearest-neighbour column-replication matrix built on the fly:
    #   rep[j, r] = 1  iff  floor(r * w / W) == j   (PyTorch 'nearest')
    # Expressed as a range compare (j*fw <= r < (j+1)*fw) to avoid vector
    # integer division.
    cols = jax.lax.broadcasted_iota(jnp.int32, (w, W), 1)
    row_ids = jax.lax.broadcasted_iota(jnp.int32, (w, W), 0)
    lo = row_ids * fw
    rep = ((cols >= lo) & (cols < lo + fw)).astype(jnp.float32)   # (w, W)

    # Column upsample on the otherwise-idle MXU: (rows, w) @ (w, W) -> (rows, W).
    # HIGHEST keeps the one-hot selection of f32 activations bit-exact; after
    # the rhs shrink this is only a few vmatmul pushes per grid step.
    small = jnp.dot(x, rep,
                    precision=jax.lax.Precision.HIGHEST,
                    preferred_element_type=jnp.float32)           # (rows, W)

    # Row replication over fh + squared error + reduction on the VPU/XLU.
    lm = lm_ref[...].astype(jnp.float32)                          # (rows, fh, W)
    d = jnp.expand_dims(small, 1) - lm                            # bcast over fh
    per_fh = jnp.sum(d * d, axis=2)                               # lane reduce -> (rows, fh)
    out_ref[...] = jnp.sum(per_fh, axis=1, keepdims=True)         # (rows, 1)


def _pick_channel_chunk(C, h, per_channel_bytes, budget_bytes=2 << 20):
    """Largest channel chunk Cc dividing C whose landmark block fits the VMEM
    budget and keeps the (Cc*h) sublane dim 8-aligned (unless it is the full dim)."""
    valid = [d for d in range(1, C + 1)
             if C % d == 0 and (d == C or (d * h) % 8 == 0)]
    fitting = [d for d in valid if d * per_channel_bytes <= budget_bytes]
    return max(fitting) if fitting else min(valid)


def landmark_loss(loc_out, visibility_batch, landmark_batch, reduction="mean"):
    if reduction not in ("mean", "sum"):
        # TODO(synk): reduction='none' (per-pixel loss tensor) has no scalar
        # semantics in the original module's accumulation; not supported.
        raise ValueError(f"unsupported reduction: {reduction}")

    B, C, h, w = loc_out.shape
    Bl, Cl, H, W = landmark_batch.shape
    assert (B, C) == (Bl, Cl)
    # TODO(synk): non-integer nearest scale factors (H % h != 0) would need a gather.
    assert H % h == 0 and W % w == 0
    fh = H // h

    # Free view reshapes (contiguous splits / adjacent-dim merges only, no copy):
    #   loc_out  (B, C, h, w)      -> (B, C*h, w)
    #   landmark (B, C, h*fh, W)   -> (B, C*h, fh, W)
    x2 = loc_out.reshape(B, C * h, w)
    lm4 = landmark_batch.reshape(B, C * h, fh, W)

    lm_bytes_per_channel = h * fh * W * landmark_batch.dtype.itemsize
    Cc = _pick_channel_chunk(C, h, lm_bytes_per_channel)
    n_cc = C // Cc

    row_sums = pl.pallas_call(
        _landmark_sqerr_kernel,
        out_shape=jax.ShapeDtypeStruct((B, C * h, 1), jnp.float32),
        grid_spec=pltpu.PrefetchScalarGridSpec(
            num_scalar_prefetch=0,
            grid=(B, n_cc),
            in_specs=[
                pl.BlockSpec((None, Cc * h, w), lambda b, cc: (b, cc, 0)),
                pl.BlockSpec((None, Cc * h, fh, W), lambda b, cc: (b, cc, 0, 0)),
            ],
            out_specs=pl.BlockSpec((None, Cc * h, 1), lambda b, cc: (b, cc, 0)),
        ),
        compiler_params=pltpu.CompilerParams(
            dimension_semantics=("parallel", "parallel")),
    )(x2, lm4)

    # Tiny (B, C) glue: fold rows back to channels, 'mean' scaling, visibility
    # mask and the /B batch average (free in XLA).
    per_ch = row_sums.reshape(B, C, h).sum(axis=-1)                # (B, C)
    if reduction == "mean":
        per_ch = per_ch * (1.0 / (H * W))
    per_ch = jnp.where(visibility_batch != 0, per_ch, 0.0)
    return jnp.sum(per_ch) / B


def _reference(loc_out, visibility_batch, landmark_batch, reduction="mean"):
    """Pure-JAX reference mirroring the PyTorch module (nearest interpolate)."""
    B, C, h, w = loc_out.shape
    H, W = landmark_batch.shape[-2:]
    ridx = (jnp.arange(H) * h) // H
    cidx = (jnp.arange(W) * w) // W
    up = loc_out[:, :, ridx][:, :, :, cidx]                        # (B, C, H, W)
    se = (up - landmark_batch) ** 2
    per = se.mean(axis=(-1, -2)) if reduction == "mean" else se.sum(axis=(-1, -2))
    per = jnp.where(visibility_batch != 0, per, 0.0)
    return jnp.sum(per) / B


if __name__ == "__main__":
    key = jax.random.PRNGKey(0)
    k1, k2, k3 = jax.random.split(key, 3)

    B, C, h, w = 2, 4, 16, 16      # small loc_out; module hardcodes 224x224 targets
    H, W = 224, 224

    loc_out = jax.random.normal(k1, (B, C, h, w), dtype=jnp.float32)
    landmark_batch = jax.random.normal(k2, (B, C, H, W), dtype=jnp.float32)
    visibility_batch = jax.random.bernoulli(k3, 0.7, (B, C)).astype(jnp.int32)

    # reduction='mean'
    loss = jax.block_until_ready(
        landmark_loss(loc_out, visibility_batch, landmark_batch, reduction="mean"))
    ref = jax.block_until_ready(
        _reference(loc_out, visibility_batch, landmark_batch, reduction="mean"))
    np.testing.assert_allclose(np.asarray(loss), np.asarray(ref), rtol=2e-5, atol=1e-5)

    # reduction='sum'
    loss_s = jax.block_until_ready(
        landmark_loss(loc_out, visibility_batch, landmark_batch, reduction="sum"))
    ref_s = jax.block_until_ready(
        _reference(loc_out, visibility_batch, landmark_batch, reduction="sum"))
    np.testing.assert_allclose(np.asarray(loss_s), np.asarray(ref_s), rtol=2e-5, atol=1e-2)

    print("KERNEL_OK")
</pallas_src>

<mosaic_0001>
module attributes {stable_mosaic.version = 11 : i64} {
  func.func @_landmark_sqerr_kernel(%arg0: i32, %arg1: i32, %arg2: memref<1x64x16xf32, #tpu.memory_space<vmem>>, %arg3: memref<1x64x14x224xf32, #tpu.memory_space<vmem>>, %arg4: memref<1x64x1xf32, #tpu.memory_space<vmem>>) attributes {dimension_semantics = [#tpu.dimension_semantics<parallel>, #tpu.dimension_semantics<parallel>], iteration_bounds = array<i64: 2, 1>, scalar_prefetch = 0 : i64, scratch_operands = 0 : i64, tpu.core_type = #tpu.core_type<tc>, window_params = [{transform_indices = @transform_0, window_bounds = array<i64: 1, 64, 16>}, {transform_indices = @transform_1, window_bounds = array<i64: 1, 64, 14, 224>}, {transform_indices = @transform_2, window_bounds = array<i64: 1, 64, 1>}]} {
    %c0 = arith.constant 0 : index
    %c0_0 = arith.constant 0 : index
    %c0_1 = arith.constant 0 : index
    %0 = vector.load %arg2[%c0, %c0_0, %c0_1] : memref<1x64x16xf32, #tpu.memory_space<vmem>>, vector<1x64x16xf32>
    %1 = vector.shape_cast %0 : vector<1x64x16xf32> to vector<64x16xf32>
    %2 = tpu.iota {dimensions = array<i32: 1>} : vector<16x224xi32>
    %3 = tpu.iota {dimensions = array<i32: 0>} : vector<16x224xi32>
    %c14_i32 = arith.constant 14 : i32
    %4 = vector.broadcast %c14_i32 : i32 to vector<16x224xi32>
    %5 = arith.muli %3, %4 : vector<16x224xi32>
    %6 = arith.cmpi sge, %2, %5 : vector<16x224xi32>
    %c14_i32_2 = arith.constant 14 : i32
    %7 = vector.broadcast %c14_i32_2 : i32 to vector<16x224xi32>
    %8 = arith.addi %5, %7 : vector<16x224xi32>
    %9 = arith.cmpi slt, %2, %8 : vector<16x224xi32>
    %10 = arith.andi %6, %9 : vector<16x224xi1>
    %11 = arith.extui %10 : vector<16x224xi1> to vector<16x224xi32>
    %12 = arith.sitofp %11 : vector<16x224xi32> to vector<16x224xf32>
    %cst = arith.constant dense<0.000000e+00> : vector<64x224xf32>
    %13 = tpu.matmul %1, %12, %cst {dimension_numbers = #tpu.dot_dimension_numbers<[1], [0], [0], [1], [0, 0, 1, 1], [], []>, precision = #tpu.contract_precision<fp32>} : vector<64x16xf32>, vector<16x224xf32>, vector<64x224xf32> -> vector<64x224xf32>
    %c0_3 = arith.constant 0 : index
    %c0_4 = arith.constant 0 : index
    %c0_5 = arith.constant 0 : index
    %c0_6 = arith.constant 0 : index
    %14 = vector.load %arg3[%c0_3, %c0_4, %c0_5, %c0_6] : memref<1x64x14x224xf32, #tpu.memory_space<vmem>>, vector<1x64x14x224xf32>
    %15 = vector.shape_cast %14 : vector<1x64x14x224xf32> to vector<64x14x224xf32>
    %16 = vector.shape_cast %13 : vector<64x224xf32> to vector<64x1x224xf32>
    %17 = vector.broadcast %16 : vector<64x1x224xf32> to vector<64x14x224xf32>
    %18 = arith.subf %17, %15 : vector<64x14x224xf32>
    %19 = arith.mulf %18, %18 : vector<64x14x224xf32>
    %cst_7 = arith.constant dense<0.000000e+00> : vector<64x14xf32>
    %20 = vector.multi_reduction <add>, %19, %cst_7 [2] : vector<64x14x224xf32> to vector<64x14xf32>
    %cst_8 = arith.constant dense<0.000000e+00> : vector<64xf32>
    %21 = vector.multi_reduction <add>, %20, %cst_8 [1] : vector<64x14xf32> to vector<64xf32>
    %22 = vector.shape_cast %21 : vector<64xf32> to vector<64x1xf32>
    %c0_9 = arith.constant 0 : index
    %c0_10 = arith.constant 0 : index
    %c0_11 = arith.constant 0 : index
    %23 = vector.load %arg4[%c0_9, %c0_10, %c0_11] : memref<1x64x1xf32, #tpu.memory_space<vmem>>, vector<1x64x1xf32>
    %24 = vector.shape_cast %23 : vector<1x64x1xf32> to vector<64x1xf32>
    %25 = vector.shape_cast %22 : vector<64x1xf32> to vector<1x64x1xf32>
    tpu.vector_store %arg4[%c0_9, %c0_10, %c0_11], %25 {strides = array<i32>} : memref<1x64x1xf32, #tpu.memory_space<vmem>>, vector<1x64x1xf32>,
    return
  }
  func.func @transform_0(%arg0: i32, %arg1: i32) -> (i32, i32, i32) {
    %c0_i32 = arith.constant 0 : i32
    %c0_i32_0 = arith.constant 0 : i32
    return %arg0, %arg1, %c0_i32 : i32, i32, i32
  }
  func.func @transform_1(%arg0: i32, %arg1: i32) -> (i32, i32, i32, i32) {
    %c0_i32 = arith.constant 0 : i32
    %c0_i32_0 = arith.constant 0 : i32
    %c0_i32_1 = arith.constant 0 : i32
    return %arg0, %arg1, %c0_i32, %c0_i32_0 : i32, i32, i32, i32
  }
  func.func @transform_2(%arg0: i32, %arg1: i32) -> (i32, i32, i32) {
    %c0_i32 = arith.constant 0 : i32
    %c0_i32_0 = arith.constant 0 : i32
    return %arg0, %arg1, %c0_i32 : i32, i32, i32
  }
}

</mosaic_0001>

<bundles_post_ra>
// kernel: tpu_custom_call.1
= control target key start
LH: loop header
LB: loop body
LE: loop exit
PB: predicated region body
PF: predicated region fallthrough
CT: control target
= control target key end

     0   :  { %s4646_s9 = smov 0   ;;  %s4648_s10 = smov 0   ;;  %s6285_s0 = inlined_call_operand.vmem [shape: f32[2,64,16], index: 0, kind: input, shape index: {}]   ;;  %s6286_s1 = inlined_call_operand.vmem [shape: f32[2,64,14,224], index: 1, kind: input, shape index: {}]   ;;  %s6287_s2 = inlined_call_operand.vmem [shape: f32[2,64,1], index: 2, kind: output, shape index: {}]  }
   0x1   :  { %s4650_s11 = smov 0  }
   0x2 LB: > { %s24_s12 = sadd.s32 1, %s4622_s10  ;;  %p4445_p0 = scmp.ge.s32.totalorder %s4626_s11, 1  ;;  %s4626_s11 = sphi %s4650_s11, %s12_s11   ;;  %s4622_s10 = sphi %s4648_s10, %s6300_s10   ;;  %s4618_s9 = sphi %s4646_s9, %s6299_s9  }
   0x3   : > { %p26_p1 = scmp.ge.s32.totalorder %s24_s12, 2  ;;  %p151_p2 = scmp.lt.s32.totalorder %s4626_s11, 3 }
   0x5   : > { %s6302_s12 = smov (%p26_p1, %s24_s12), 0  ;;  %p152_p3 = pnand %p4445_p0, %p151_p2 }
   0x6   : > { %v230_v0 = vlaneseq (!%p152_p3)  ;;  %p192_p4 = scmp.lt.s32.totalorder (!%p152_p3), %s4618_s9, 1  ;;  %v4628_v1 = vmov (!%p152_p3), 0.0   ;;  %vm260_vm0 = vcmask (!%p152_p3), 130048   ;;  %v4629_v37 = vmov (!%p152_p3), 1.0|1.0  }
   0x7   : > { %155 = sbr.rel (%p152_p3) target bundleno = 900 (0x384), region = 28  ;;  %788 = vmatprep.mubr.f32.mxu0 (!%p152_p3), %v4628_v1  ;;  %353 = vmatprep.mubr.f32.mxu1 (!%p152_p3), %v4628_v1  ;;  %vm2948_vm15 = vcmask (!%p152_p3), 1045504  }
   0x8   : > { %v231_v2 = vand.u32 (!%p152_p3), 127, %v230_v0  ;;  %v4666_v3 = vshrl.u32 (!%p152_p3), %v230_v0, 7 }
   0xa   : > { %v232_v4 = vadd.s32 (!%p152_p3), 128, %v231_v2  ;;  %v235_v5 = vadd.s32 (!%p152_p3), 8, %v4666_v3  ;;  %v236_v6 = vmul.u32 (!%p152_p3), 14, %v4666_v3  ;;  %v4674_v7 = vsub.s32 (!%p152_p3), %v231_v2, %v4666_v3 }
   0xb   : > { %v3654_v8 = vadd.s32 (!%p152_p3), 4294967288, %v231_v2 }
   0xc   : > { %v237_v9 = vmul.u32 (!%p152_p3), 14, %v235_v5  ;;  %vm239_vm1 = vcmp.ge.s32.totalorder (!%p152_p3), %v232_v4, %v236_v6  ;;  %v242_v10 = vadd.s32 (!%p152_p3), 14, %v236_v6  ;;  %vm238_vm2 = vcmp.ge.s32.totalorder (!%p152_p3), %v231_v2, %v236_v6 }
   0xd   : > { %v4687_v14 = vsub.s32 (!%p152_p3), %v3654_v8, %v4666_v3 }
   0xe   : > { %s6304_s9 = smov (!%p192_p4, %s4618_s9), 1  ;;  %vm241_vm3 = vcmp.ge.s32.totalorder %v232_v4, %v237_v9  ;;  %v243_v19 = vadd.s32 14, %v237_v9  ;;  %vm245_vm4 = vcmp.lt.s32.totalorder %v232_v4, %v242_v10  ;;  %vm240_vm5 = vcmp.ge.s32.totalorder %v231_v2, %v237_v9 }
   0xf   : > { %s4470_s13 = sshll.u32 %s6304_s9, 6  ;;  %vm4694_vm6 = vmand %vm239_vm1, %vm245_vm4  ;;  %vm244_vm7 = vcmp.lt.s32.totalorder %v231_v2, %v242_v10  ;;  %s4471_s17 = sshll.u32 %s6304_s9, 11  ;;  %vm2943_vm1 = vcmask 785408   ;;  %vm4230_vm4 = vcmask 1042434  }
  0x10   : > { %s4681_s16 = scalar_lea.vmem %s6285_s0, %s4470_s13  ;;  %vm247_vm8 = vcmp.lt.s32.totalorder %v232_v4, %v243_v19  ;;  %v4453_v24 = vsel %vm4694_vm6, 1.0, %v4628_v1  ;;  %vm246_vm9 = vcmp.lt.s32.totalorder %v231_v2, %v243_v19  ;;  %vm4708_vm10 = vmand %vm238_vm2, %vm244_vm7  ;;  %s4916_s20 = scalar_lea.vmem %s6286_s1, %s4471_s17  ;;  %vm3659_vm2 = vcmask 130112  }
  0x11   : > { %v222_v11 = vld [vmem:[%s4681_s16] sm:$0xff]  ;;  %v223_v12 = vld [vmem:[%s4681_s16 + $0x8] sm:$0xff]  ;;  %v224_v13 = vld [vmem:[%s4681_s16 + $0x10] sm:$0xff]  ;;  %v4713_v27 = vsub.f32 %v4453_v24, %v4453_v24  ;;  %v4452_v28 = vsel %vm4708_vm10, 1.0, %v4628_v1  ;;  %vm4236_vm7 = vcmask 1045509   ;;  %s220_s23 = scalar_lea.vmem %s6287_s2, %s4470_s13 }
  0x12   : > { %v262_v15 = vsel %vm260_vm0, %v222_v11, 0  ;;  %v265_v16 = vsel %vm260_vm0, %v223_v12, 0  ;;  %v268_v17 = vsel %vm260_vm0, %v224_v13, 0  ;;  %v225_v18 = vld [vmem:[%s4681_s16 + $0x18] sm:$0xff]  ;;  %vm251_vm11 = vmand %vm241_vm3, %vm247_vm8  ;;  %v4731_v33 = vsub.f32 %v4452_v28, %v4452_v28  ;;  %v226_v56 = vld [vmem:[%s4681_s16 + $0x20] sm:$0xff] }
  0x13   : > { %v4698_v21 = vand.u32 4294901760, %v262_v15  ;;  %v4700_v22 = vand.u32 4294901760, %v265_v16  ;;  %v4702_v23 = vand.u32 4294901760, %v268_v17  ;;  %v271_v26 = vsel %vm260_vm0, %v225_v18, 0  ;;  %vm4727_vm12 = vmpackc.low %vm251_vm11, %vm4694_vm6  ;;  %v227_v57 = vld [vmem:[%s4681_s16 + $0x28] sm:$0xff]  ;;  %v228_v58 = vld [vmem:[%s4681_s16 + $0x30] sm:$0xff] }
  0x14   : > { %v4455_v31 = vsel %vm251_vm11, 1.0, %v4628_v1  ;;  %v4736_v35 = vand.u32 4294901760, %v271_v26  ;;  %4486 = vmatprep.subr.msk.bf16.mxu0 %vm4727_vm12, %v4629_v37  ;;  %4474 = vmatprep.subr.msk.bf16.mxu1 %vm4727_vm12, %v4629_v37  ;;  %vm250_vm13 = vmand %vm240_vm5, %vm246_vm9  ;;  %v444_v40 = vand.u32 4294901760, %v4713_v27  ;;  %v450_v43 = vand.u32 4294901760, %v4731_v33  ;;  %v229_v12 = vld [vmem:[%s4681_s16 + $0x38] sm:$0xff] }
  0x15   : > { %v4719_v29 = vsub.f32 %v262_v15, %v4698_v21  ;;  %v4722_v30 = vsub.f32 %v265_v16, %v4700_v22  ;;  %v4734_v34 = vsub.f32 %v268_v17, %v4702_v23  ;;  %v4738_v36 = vsub.f32 %v4455_v31, %v4455_v31  ;;  %vm4754_vm14 = vmpackc.low %vm250_vm13, %vm4708_vm10 }
  0x16   : > { %v4454_v41 = vsel %vm250_vm13, 1.0, %v4628_v1  ;;  %v4761_v45 = vsub.f32 %v271_v26, %v4736_v35  ;;  %4488 = vmatpush1.bf16.msk.msra.mxu0 %vm4754_vm14, %v4629_v37  ;;  %4476 = vmatpush1.bf16.msk.msra.mxu1 %vm4754_vm14, %v4629_v37  ;;  %v451_v50 = vsub.f32 %v4731_v33, %v450_v43  ;;  %v445_v51 = vsub.f32 %v4713_v27, %v444_v40 }
  0x17   : > { %v356_v38 = vand.u32 4294901760, %v4719_v29  ;;  %v367_v39 = vand.u32 4294901760, %v4722_v30  ;;  %v378_v44 = vand.u32 4294901760, %v4734_v34  ;;  %v4763_v46 = vsub.f32 %v4454_v41, %v4454_v41 }
  0x18   : > { %v456_v49 = vand.u32 4294901760, %v4738_v36  ;;  %v446_v60 = vand.u32 4294901760, %v445_v51  ;;  %v389_v62 = vand.u32 4294901760, %v4761_v45  ;;  %v452_v63 = vand.u32 4294901760, %v451_v50 }
  0x19   : > { %v357_v47 = vsub.f32 %v4719_v29, %v356_v38  ;;  %v368_v48 = vsub.f32 %v4722_v30, %v367_v39  ;;  %v462_v52 = vand.u32 4294901760, %v4763_v46  ;;  %v379_v55 = vsub.f32 %v4734_v34, %v378_v44  ;;  %792 = vmatmul.mubr.f32.vlgmr.msra.gmra.mrb[0].mxu0 %v356_v38 }
  0x1a   : > { %v457_v54 = vsub.f32 %v4738_v36, %v456_v49  ;;  %v4489_v61 = vpack.c.bf16 %v456_v49, %v444_v40  ;;  %797 = vmatprep.mubr.f32.mxu0 %v4628_v1  ;;  %v274_v5 = vsel %vm260_vm0, %v226_v56, 0  ;;  %v277_v6 = vsel %vm260_vm0, %v227_v57, 0 }
  0x1b   : > { %v358_v53 = vand.u32 4294901760, %v357_v47  ;;  %v369_v59 = vand.u32 4294901760, %v368_v48  ;;  %v463_v0 = vsub.f32 %v4763_v46, %v462_v52  ;;  %v4491_v4 = vpack.c.bf16 %v462_v52, %v450_v43 }
  0x1c   : > { %v458_v2 = vand.u32 4294901760, %v457_v54  ;;  %4490 = vmatprep.subr.bf16.mxu0 %v4489_v61  ;;  %v280_v8 = vsel %vm260_vm0, %v228_v58, 0  ;;  %v4789_v11 = vand.u32 4294901760, %v274_v5  ;;  %v390_v13 = vsub.f32 %v4761_v45, %v389_v62 }
  0x1d   : > { %359 = vmatmul.mubr.f32.vlgmr.msra.gmra.mrb[0].mxu1 %v358_v53  ;;  %v464_v9 = vand.u32 4294901760, %v463_v0  ;;  %4492 = vmatpush1.bf16.msra.mxu0 %v4491_v4  ;;  %v4793_v15 = vand.u32 4294901760, %v277_v6  ;;  %v4481_v16 = vpack.c.bf16 %v4738_v36, %v4713_v27  ;;  %v380_v18 = vand.u32 4294901760, %v379_v55 }
  0x1e   : > { %364 = vmatprep.mubr.f32.mxu1 %v4628_v1  ;;  %v4477_v10 = vpack.c.bf16 %v458_v2, %v446_v60  ;;  %801 = vmatmul.mubr.f32.gmra.mrb[2].mxu0 %v367_v39  ;;  %v4801_v19 = vsub.f32 %v274_v5, %v4789_v11  ;;  %v4803_v20 = vand.u32 4294901760, %v280_v8  ;;  %v283_v25 = vsel %vm260_vm0, %v229_v12, 0 }
  0x1f   : > { %4494 = vmatprep.subr.msk.bf16.mxu0 %vm4727_vm12, %v4629_v37  ;;  %v4479_v17 = vpack.c.bf16 %v464_v9, %v452_v63  ;;  %806 = vmatprep.mubr.f32.mxu0 %v4628_v1  ;;  %v4808_v24 = vsub.f32 %v277_v6, %v4793_v15  ;;  %v391_v27 = vand.u32 4294901760, %v390_v13  ;;  %v4818_v36 = vand.u32 4294901760, %v283_v25 }
  0x20   : > { %4478 = vmatprep.subr.bf16.mxu1 %v4477_v10  ;;  %v400_v26 = vand.u32 4294901760, %v4801_v19  ;;  %v4816_v32 = vsub.f32 %v280_v8, %v4803_v20  ;;  %v4483_v51 = vpack.c.bf16 %v4763_v46, %v4731_v33  ;;  %v4911_v56 = vsub.s32 0, %v4666_v3 }
  0x21   : > { %370 = vmatmul.mubr.f32.gmra.mrb[2].mxu1 %v369_v59  ;;  %v411_v31 = vand.u32 4294901760, %v4808_v24  ;;  %v4825_v41 = vsub.f32 %v283_v25, %v4818_v36  ;;  %v4921_v60 = vsub.s32 1, %v4666_v3  ;;  %vm2950_vm0 = vcmask 783360  }
  0x22   : > { %375 = vmatprep.mubr.f32.mxu1 %v4628_v1  ;;  %4480 = vmatpush1.bf16.msra.mxu1 %v4479_v17  ;;  %v401_v28 = vsub.f32 %v4801_v19, %v400_v26  ;;  %v422_v40 = vand.u32 4294901760, %v4816_v32  ;;  %vm4228_vm3 = vcmask 1041409   ;;  %vm4232_vm5 = vcmask 1043459  }
  0x23   : > { %810 = vmatmul.mubr.f32.gmra.mrb[4].mxu0 %v378_v44  ;;  %4482 = vmatprep.subr.bf16.mxu1 %v4481_v16  ;;  %v412_v39 = vsub.f32 %v4808_v24, %v411_v31  ;;  %v433_v47 = vand.u32 4294901760, %v4825_v41  ;;  %vm4234_vm6 = vcmask 1044484   ;;  %vm4238_vm8 = vcmask 1046534  }
  0x24   : > { %815 = vmatprep.mubr.f32.mxu0 %v4628_v1  ;;  %v402_v38 = vand.u32 4294901760, %v401_v28  ;;  %v423_v44 = vsub.f32 %v4816_v32, %v422_v40  ;;  %v1138_v28 = vld [vmem:[%s4916_s20 + $0x98] sm:$0x3f]  ;;  %vm4240_vm9 = vcmask 1047559   ;;  %vm4299_vm10 = vcmask 113664  }
  0x25   : > { %381 = vmatmul.mubr.f32.gmra.mrb[4].mxu1 %v380_v18  ;;  %v413_v43 = vand.u32 4294901760, %v412_v39  ;;  %v434_v49 = vsub.f32 %v4825_v41, %v433_v47  ;;  %vm4324_vm11 = vcmask 7168  }
  0x26   : > { %386 = vmatprep.mubr.f32.mxu1 %v4628_v1  ;;  %v424_v48 = vand.u32 4294901760, %v423_v44 }
  0x27   : > { %819 = vmatmul.mubr.f32.gmra.mrb[6].mxu0 %v389_v62  ;;  %v435_v50 = vand.u32 4294901760, %v434_v49 }
  0x28   : > { %824 = vmatprep.mubr.f32.mxu0 %v4628_v1 }
  0x29   : > { %392 = vmatmul.mubr.f32.gmra.mrb[6].mxu1 %v391_v27 }
  0x2a   : > { %397 = vmatprep.mubr.f32.mxu1 %v4628_v1 }
  0x2b   : > { %828 = vmatmul.mubr.f32.gmra.mrb[8].mxu0 %v400_v26 }
  0x2c   : > { %833 = vmatprep.mubr.f32.mxu0 %v4628_v1 }
  0x2d   : > { %403 = vmatmul.mubr.f32.gmra.mrb[8].mxu1 %v402_v38 }
  0x2e   : > { %408 = vmatprep.mubr.f32.mxu1 %v4628_v1 }
  0x2f   : > { %837 = vmatmul.mubr.f32.gmra.mrb[10].mxu0 %v411_v31 }
  0x30   : > { %842 = vmatprep.mubr.f32.mxu0 %v4628_v1 }
  0x31   : > { %414 = vmatmul.mubr.f32.gmra.mrb[10].mxu1 %v413_v43 }
  0x32   : > { %419 = vmatprep.mubr.f32.mxu1 %v4628_v1 }
  0x33   : > { %846 = vmatmul.mubr.f32.gmra.mrb[12].mxu0 %v422_v40 }
  0x34   : > { %851 = vmatprep.mubr.f32.mxu0 %v4628_v1 }
  0x35   : > { %425 = vmatmul.mubr.f32.gmra.mrb[12].mxu1 %v424_v48 }
  0x36   : > { %430 = vmatprep.mubr.f32.mxu1 %v4628_v1 }
  0x37   : > { %855 = vmatmul.mubr.f32.gmra.mrb[14].mxu0 %v433_v47 }
  0x38   : > { %937 = vmatprep.mubr.f32.mxu0 %v4628_v1 }
  0x39   : > { %436 = vmatmul.mubr.f32.gmra.mrb[14].mxu1 %v435_v50 }
  0x3a   : > { %526 = vmatprep.mubr.f32.mxu1 %v4628_v1 }
  0x3b   : > { %939 = vmatmul.mubr.f32.vlgmr.msra.gmra.mrb[0].mxu0 %v4698_v21 }
  0x3c   : > { %944 = vmatprep.mubr.f32.mxu0 %v4628_v1  ;;  %4496 = vmatpush1.bf16.msk.msra.mxu0 %vm4754_vm14, %v4629_v37 }
  0x3d   : > { %528 = vmatmul.mubr.f32.vlgmr.msra.gmra.mrb[0].mxu1 %v4698_v21 }
  0x3e   : > { %533 = vmatprep.mubr.f32.mxu1 %v4628_v1  ;;  %4484 = vmatpush1.bf16.msra.mxu1 %v4483_v51 }
  0x3f   : > { %946 = vmatmul.mubr.f32.gmra.mrb[2].mxu0 %v4700_v22 }
  0x40   : > { %951 = vmatprep.mubr.f32.mxu0 %v4628_v1 }
  0x41   : > { %535 = vmatmul.mubr.f32.gmra.mrb[2].mxu1 %v4700_v22 }
  0x42   : > { %540 = vmatprep.mubr.f32.mxu1 %v4628_v1 }
  0x43   : > { %953 = vmatmul.mubr.f32.gmra.mrb[4].mxu0 %v4702_v23 }
  0x44   : > { %958 = vmatprep.mubr.f32.mxu0 %v4628_v1 }
  0x45   : > { %542 = vmatmul.mubr.f32.gmra.mrb[4].mxu1 %v4702_v23 }
  0x46   : > { %547 = vmatprep.mubr.f32.mxu1 %v4628_v1 }
  0x47   : > { %960 = vmatmul.mubr.f32.gmra.mrb[6].mxu0 %v4736_v35 }
  0x48   : > { %965 = vmatprep.mubr.f32.mxu0 %v4628_v1 }
  0x49   : > { %549 = vmatmul.mubr.f32.gmra.mrb[6].mxu1 %v4736_v35 }
  0x4a   : > { %554 = vmatprep.mubr.f32.mxu1 %v4628_v1 }
  0x4b   : > { %967 = vmatmul.mubr.f32.gmra.mrb[8].mxu0 %v4789_v11 }
  0x4c   : > { %972 = vmatprep.mubr.f32.mxu0 %v4628_v1 }
  0x4d   : > { %556 = vmatmul.mubr.f32.gmra.mrb[8].mxu1 %v4789_v11 }
  0x4e   : > { %561 = vmatprep.mubr.f32.mxu1 %v4628_v1 }
  0x4f   : > { %974 = vmatmul.mubr.f32.gmra.mrb[10].mxu0 %v4793_v15 }
  0x50   : > { %979 = vmatprep.mubr.f32.mxu0 %v4628_v1 }
  0x51   : > { %563 = vmatmul.mubr.f32.gmra.mrb[10].mxu1 %v4793_v15 }
  0x52   : > { %568 = vmatprep.mubr.f32.mxu1 %v4628_v1 }
  0x53   : > { %981 = vmatmul.mubr.f32.gmra.mrb[12].mxu0 %v4803_v20 }
  0x54   : > { %986 = vmatprep.mubr.f32.mxu0 %v4628_v1 }
  0x55   : > { %570 = vmatmul.mubr.f32.gmra.mrb[12].mxu1 %v4803_v20 }
  0x56   : > { %575 = vmatprep.mubr.f32.mxu1 %v4628_v1 }
  0x57   : > { %988 = vmatmul.mubr.f32.gmra.mrb[14].mxu0 %v4818_v36 }
  0x58   : > { %1062 = vmatprep.mubr.f32.mxu0 %v4628_v1 }
  0x59   : > { %577 = vmatmul.mubr.f32.gmra.mrb[14].mxu1 %v4818_v36 }
  0x5a   : > { %655 = vmatprep.mubr.f32.mxu1 %v4628_v1 }
  0x5b   : > { %1064 = vmatmul.mubr.f32.vlgmr.msra.gmra.mrb[0].mxu0 %v4698_v21  ;;  %v4630_v21 = vmov 1966171168  }
  0x5c   : > { %1069 = vmatprep.mubr.f32.mxu0 %v4628_v1 }
  0x5d   : > { %658 = vmatmul.mubr.f32.vlgmr.msra.gmra.mrb[0].mxu1 %v4719_v29 }
  0x5e   : > { %663 = vmatprep.mubr.f32.mxu1 %v4628_v1 }
  0x5f   : > { %1071 = vmatmul.mubr.f32.gmra.mrb[2].mxu0 %v4700_v22  ;;  %v1394_v22 = vunpack.c.l.s4 %v4630_v21 }
  0x60   : > { %1076 = vmatprep.mubr.f32.mxu0 %v4628_v1 }
  0x61   : > { %666 = vmatmul.mubr.f32.gmra.mrb[2].mxu1 %v4722_v30 }
  0x62   : > { %671 = vmatprep.mubr.f32.mxu1 %v4628_v1 }
  0x63   : > { %1078 = vmatmul.mubr.f32.gmra.mrb[4].mxu0 %v4702_v23  ;;  %v1395_v23 = vunpack.c.0.s8 %v1394_v22 }
  0x64   : > { %1083 = vmatprep.mubr.f32.mxu0 %v4628_v1 }
  0x65   : > { %674 = vmatmul.mubr.f32.gmra.mrb[4].mxu1 %v4734_v34  ;;  %v4907_v37 = vsub.s32 %v1395_v23, %v4666_v3 }
  0x66   : > { %679 = vmatprep.mubr.f32.mxu1 %v4628_v1 }
  0x67   : > { %1085 = vmatmul.mubr.f32.gmra.mrb[6].mxu0 %v4736_v35 }
  0x68   : > { %1090 = vmatprep.mubr.f32.mxu0 %v4628_v1 }
  0x69   : > { %682 = vmatmul.mubr.f32.gmra.mrb[6].mxu1 %v4761_v45 }
  0x6a   : > { %687 = vmatprep.mubr.f32.mxu1 %v4628_v1 }
  0x6b   : > { %1092 = vmatmul.mubr.f32.gmra.mrb[8].mxu0 %v4789_v11  ;;  %v1137_v11 = vld [vmem:[%s4916_s20 + $0x90] sm:$0x3f] }
  0x6c   : > { %1097 = vmatprep.mubr.f32.mxu0 %v4628_v1 }
  0x6d   : > { %690 = vmatmul.mubr.f32.gmra.mrb[8].mxu1 %v4801_v19 }
  0x6e   : > { %695 = vmatprep.mubr.f32.mxu1 %v4628_v1 }
  0x6f   : > { %1099 = vmatmul.mubr.f32.gmra.mrb[10].mxu0 %v4793_v15 }
  0x70   : > { %1104 = vmatprep.mubr.f32.mxu0 %v4628_v1 }
  0x71   : > { %698 = vmatmul.mubr.f32.gmra.mrb[10].mxu1 %v4808_v24 }
  0x72   : > { %703 = vmatprep.mubr.f32.mxu1 %v4628_v1 }
  0x73   : > { %1106 = vmatmul.mubr.f32.gmra.mrb[12].mxu0 %v4803_v20 }
  0x74   : > { %1111 = vmatprep.mubr.f32.mxu0 %v4628_v1 }
  0x75   : > { %706 = vmatmul.mubr.f32.gmra.mrb[12].mxu1 %v4816_v32 }
  0x76   : > { %711 = vmatprep.mubr.f32.mxu1 %v4628_v1 }
  0x77   : > { %1113 = vmatmul.mubr.f32.gmra.mrb[14].mxu0 %v4818_v36 }
  0x79   : > { %714 = vmatmul.mubr.f32.gmra.mrb[14].mxu1 %v4825_v41 }
 0x12e   : > { %v1065_v29 = vpop.f32.mrb[0].mxu0 }
 0x12f   : > { %v1067_v33 = vpop.f32.mrb[1].mxu0 }
 0x130   : > { %v659_v30 = vpop.f32.mrb[0].mxu1 }
 0x131   : > { %v4497_v34 = vadd.f32 %v1065_v29, %v659_v30  ;;  %v661_v35 = vpop.f32.mrb[1].mxu1 }
 0x132   : > { %v4498_v42 = vadd.f32 %v1067_v33, %v661_v35  ;;  %v1072_v45 = vpop.f32.mrb[2].mxu0 }
 0x133   : > { %v1074_v53 = vpop.f32.mrb[3].mxu0 }
 0x134   : > { %v1391_v46 = vcombine.low %v4497_v34, %v4498_v42  ;;  %v1392_v1 = vcombine.high %v4497_v34, %v4498_v42  ;;  %v667_v52 = vpop.f32.mrb[2].mxu1  ;;  %v1119_v42 = vld [vmem:[%s4916_s20] sm:$0xff] }
 0x135   : > { %v4499_v54 = vadd.f32 %v1072_v45, %v667_v52  ;;  %v669_v55 = vpop.f32.mrb[3].mxu1 }
 0x136   : > { %v1399_v57 = vrot.slane %v1391_v46, %v4907_v37  ;;  %v1406_v58 = vrot.slane %v1392_v1, %v4907_v37  ;;  %v4500_v59 = vadd.f32 %v1074_v53, %v669_v55  ;;  %v1079_v61 = vpop.f32.mrb[4].mxu0 }
 0x137   : > { %v1081_v5 = vpop.f32.mrb[5].mxu0 }
 0x138   : > { %v1407_v62 = vcombine.high %v1399_v57, %v1399_v57  ;;  %v1408_v63 = vcombine.high %v1406_v58, %v1406_v58  ;;  %v4924_v0 = vrot.slane %v1399_v57, %v4907_v37  ;;  %v4927_v2 = vrot.slane %v1406_v58, %v4907_v37  ;;  %v675_v4 = vpop.f32.mrb[4].mxu1 }
 0x139   : > { %v1441_v6 = vcombine.low %v4499_v54, %v4500_v59  ;;  %v1442_v8 = vcombine.high %v4499_v54, %v4500_v59  ;;  %v4501_v9 = vadd.f32 %v1079_v61, %v675_v4  ;;  %v677_v10 = vpop.f32.mrb[5].mxu1  ;;  %v1120_v54 = vld [vmem:[%s4916_s20 + $0x8] sm:$0xff] }
 0x13a   : > { %v4931_v3 = vrot.slane %v1407_v62, %v4907_v37  ;;  %v4934_v12 = vrot.slane %v1408_v63, %v4907_v37  ;;  %v4502_v13 = vadd.f32 %v1081_v5, %v677_v10  ;;  %v4938_v15 = vrot.slane %v4927_v2, %v4911_v56  ;;  %v1086_v18 = vpop.f32.mrb[6].mxu0 }
 0x13b   : > { %v1449_v16 = vrot.slane %v1441_v6, %v4907_v37  ;;  %v1456_v17 = vrot.slane %v1442_v8, %v4907_v37  ;;  %v4944_v19 = vrot.slane %v4927_v2, %v4921_v60  ;;  %v4948_v20 = vrot.slane %v4924_v0, %v4911_v56  ;;  %v1088_v27 = vpop.f32.mrb[7].mxu0 }
 0x13c   : > { %v1491_v24 = vcombine.low %v4501_v9, %v4502_v13  ;;  %v1492_v25 = vcombine.high %v4501_v9, %v4502_v13  ;;  %v683_v26 = vpop.f32.mrb[6].mxu1  ;;  %v2449_v31 = vsub.f32 %v4938_v15, %v1137_v11  ;;  %v4954_v32 = vrot.slane %v4924_v0, %v4921_v60 }
 0x13d   : > { %v1457_v36 = vcombine.high %v1449_v16, %v1449_v16  ;;  %v1458_v38 = vcombine.high %v1456_v17, %v1456_v17  ;;  %v4957_v39 = vrot.slane %v1449_v16, %v4907_v37  ;;  %v4960_v40 = vrot.slane %v1456_v17, %v4907_v37  ;;  %v685_v41 = vpop.f32.mrb[7].mxu1 }
 0x13e   : > { %v1499_v43 = vrot.slane %v1491_v24, %v4907_v37  ;;  %v1506_v44 = vrot.slane %v1492_v25, %v4907_v37  ;;  %v4503_v47 = vadd.f32 %v1086_v18, %v683_v26  ;;  %v4504_v48 = vadd.f32 %v1088_v27, %v685_v41  ;;  %v1093_v51 = vpop.f32.mrb[8].mxu0 }
 0x13f   : > { %v4965_v49 = vrot.slane %v1457_v36, %v4907_v37  ;;  %v4968_v50 = vrot.slane %v1458_v38, %v4907_v37  ;;  %v2450_v21 = vsub.f32 %v4944_v19, %v1138_v28  ;;  %v2705_v22 = vmul.f32 %v2449_v31, %v2449_v31  ;;  %v1095_v35 = vpop.f32.mrb[9].mxu0  ;;  %v1121_v36 = vld [vmem:[%s4916_s20 + $0x10] sm:$0x3f] }
 0x140   : > { %v1507_v23 = vcombine.high %v1499_v43, %v1499_v43  ;;  %v1508_v29 = vcombine.high %v1506_v44, %v1506_v44  ;;  %v4972_v30 = vrot.slane %v1499_v43, %v4907_v37  ;;  %v4975_v33 = vrot.slane %v1506_v44, %v4907_v37  ;;  %v691_v34 = vpop.f32.mrb[8].mxu1 }
 0x141   : > { %v1541_v45 = vcombine.low %v4503_v47, %v4504_v48  ;;  %v1542_v46 = vcombine.high %v4503_v47, %v4504_v48  ;;  %v4505_v1 = vadd.f32 %v1093_v51, %v691_v34  ;;  %v693_v52 = vpop.f32.mrb[9].mxu1  ;;  %v2706_v53 = vmul.f32 %v2450_v21, %v2450_v21  ;;  %v1122_v48 = vld [vmem:[%s4916_s20 + $0x18] sm:$0x3f] }
 0x142   : > { %v4980_v55 = vrot.slane %v1507_v23, %v4907_v37  ;;  %v4983_v57 = vrot.slane %v1508_v29, %v4907_v37  ;;  %v4506_v58 = vadd.f32 %v1095_v35, %v693_v52  ;;  %v2986_v59 = vsel %vm2948_vm15, %v2705_v22, 0.0  ;;  %v1100_v63 = vpop.f32.mrb[10].mxu0 }
 0x143   : > { %v1549_v61 = vrot.slane %v1541_v45, %v4907_v37  ;;  %v1556_v62 = vrot.slane %v1542_v46, %v4907_v37  ;;  %v2987_v4 = vsel %vm2950_vm0, %v2706_v53, 0.0  ;;  %v2431_v5 = vsub.f32 %v4948_v20, %v1119_v42  ;;  %v1102_v13 = vpop.f32.mrb[11].mxu0 }
 0x144   : > { %v1591_v6 = vcombine.low %v4505_v1, %v4506_v58  ;;  %v1592_v8 = vcombine.high %v4505_v1, %v4506_v58  ;;  %v2988_v9 = vadd.f32 %v2987_v4, %v2986_v59  ;;  %v2432_v10 = vsub.f32 %v4954_v32, %v1120_v54  ;;  %v699_v11 = vpop.f32.mrb[10].mxu1  ;;  %v1124_v4 = vld [vmem:[%s4916_s20 + $0x28] sm:$0xff] }
 0x145   : > { %v1557_v16 = vcombine.high %v1549_v61, %v1549_v61  ;;  %v1558_v17 = vcombine.high %v1556_v62, %v1556_v62  ;;  %v4992_v18 = vrot.slane %v1549_v61, %v4907_v37  ;;  %v4995_v24 = vrot.slane %v1556_v62, %v4907_v37  ;;  %v701_v25 = vpop.f32.mrb[11].mxu1 }
 0x146   : > { %v1599_v26 = vrot.slane %v1591_v6, %v4907_v37  ;;  %v1606_v27 = vrot.slane %v1592_v8, %v4907_v37  ;;  %2989 = vadd.xlane.f32.xlu1 %v2988_v9  ;;  %v2687_v28 = vmul.f32 %v2431_v5, %v2431_v5  ;;  %v2688_v31 = vmul.f32 %v2432_v10, %v2432_v10  ;;  %v1107_v47 = vpop.f32.mrb[12].mxu0 }
 0x147   : > { %v5001_v38 = vrot.slane %v1557_v16, %v4907_v37  ;;  %v5004_v41 = vrot.slane %v1558_v17, %v4907_v37  ;;  %v4507_v43 = vadd.f32 %v1100_v63, %v699_v11  ;;  %v4508_v44 = vadd.f32 %v1102_v13, %v701_v25  ;;  %v1109_v34 = vpop.f32.mrb[13].mxu0  ;;  %v1123_v63 = vld [vmem:[%s4916_s20 + $0x20] sm:$0xff] }
 0x148   : > { %v1607_v51 = vcombine.high %v1599_v26, %v1599_v26  ;;  %v1608_v21 = vcombine.high %v1606_v27, %v1606_v27  ;;  %v5008_v22 = vrot.slane %v1599_v26, %v4907_v37  ;;  %v5011_v23 = vrot.slane %v1606_v27, %v4907_v37  ;;  %v707_v29 = vpop.f32.mrb[12].mxu1  ;;  %v1135_v26 = vld [vmem:[%s4916_s20 + $0x80] sm:$0xff]  ;;  %v1136_v27 = vld [vmem:[%s4916_s20 + $0x88] sm:$0xff] }
 0x149   : > { %v2944_v35 = vsel %vm2943_vm1, %v2688_v31, 0.0  ;;  %v1641_v42 = vcombine.low %v4507_v43, %v4508_v44  ;;  %v1642_v45 = vcombine.high %v4507_v43, %v4508_v44  ;;  %v2433_v46 = vsub.f32 %v4948_v20, %v1121_v36  ;;  %v709_v1 = vpop.f32.mrb[13].mxu1 }
 0x14a   : > { %v5016_v52 = vrot.slane %v1607_v51, %v4907_v37  ;;  %v5019_v53 = vrot.slane %v1608_v21, %v4907_v37  ;;  %v2945_v54 = vadd.f32 %v2944_v35, %v2687_v28  ;;  %v2434_v58 = vsub.f32 %v4954_v32, %v1122_v48  ;;  %v1114_v5 = vpop.f32.mrb[14].mxu0  ;;  %v1126_v48 = vld [vmem:[%s4916_s20 + $0x38] sm:$0x3f] }
 0x14b   : > { %v1649_v59 = vrot.slane %v1641_v42, %v4907_v37  ;;  %v1656_v61 = vrot.slane %v1642_v45, %v4907_v37  ;;  %v2689_v62 = vmul.f32 %v2433_v46, %v2433_v46  ;;  %v1802_v20 = vrot.slane %v4931_v3, %v4911_v56  ;;  %v1116_v11 = vpop.f32.mrb[15].mxu0 }
 0x14c   : > { %2946 = vadd.xlane.f32.xlu0 %v2945_v54  ;;  %v2690_v6 = vmul.f32 %v2434_v58, %v2434_v58  ;;  %v1806_v8 = vrot.slane %v4931_v3, %v4921_v60  ;;  %v4509_v32 = vadd.f32 %v1107_v47, %v707_v29  ;;  %v4510_v9 = vadd.f32 %v1109_v34, %v709_v1  ;;  %v715_v10 = vpop.f32.mrb[14].mxu1  ;;  %v1125_v47 = vld [vmem:[%s4916_s20 + $0x30] sm:$0x3f] }
 0x14d   : > { %v1657_v13 = vcombine.high %v1649_v59, %v1649_v59  ;;  %v1658_v16 = vcombine.high %v1656_v61, %v1656_v61  ;;  %v5031_v17 = vrot.slane %v1649_v59, %v4907_v37  ;;  %v5034_v25 = vrot.slane %v1656_v61, %v4907_v37  ;;  %v717_v28 = vpop.f32.mrb[15].mxu1 }
 0x14e   : > { %v2949_v31 = vsel %vm2948_vm15, %v2689_v62, 0.0  ;;  %v2951_v36 = vsel %vm2950_vm0, %v2690_v6, 0.0  ;;  %v2435_v43 = vsub.f32 %v1802_v20, %v1123_v63  ;;  %v2436_v44 = vsub.f32 %v1806_v8, %v1124_v4 }
 0x14f   : > { %v5043_v51 = vrot.slane %v1657_v13, %v4907_v37  ;;  %v5046_v21 = vrot.slane %v1658_v16, %v4907_v37  ;;  %v2952_v29 = vadd.f32 %v2951_v36, %v2949_v31  ;;  %v1691_v34 = vcombine.low %v4509_v32, %v4510_v9 }
 0x150   : > { %v2691_v35 = vmul.f32 %v2435_v43, %v2435_v43  ;;  %v2692_v42 = vmul.f32 %v2436_v44, %v2436_v44  ;;  %v1692_v45 = vcombine.high %v4509_v32, %v4510_v9  ;;  %v2447_v46 = vsub.f32 %v4938_v15, %v1135_v26  ;;  %v1139_v43 = vld [vmem:[%s4916_s20 + $0xa0] sm:$0xff] }
 0x151   : > { %2953 = vadd.xlane.f32.xlu0 %v2952_v29  ;;  %v1699_v1 = vrot.slane %v1691_v34, %v4907_v37  ;;  %v2448_v54 = vsub.f32 %v4944_v19, %v1136_v27  ;;  %v2437_v58 = vsub.f32 %v1802_v20, %v1125_v47  ;;  %v2438_v59 = vsub.f32 %v1806_v8, %v1126_v48  ;;  %v1140_v34 = vld [vmem:[%s4916_s20 + $0xa8] sm:$0xff] }
 0x152   : > { %v2955_v61 = vsel %vm2943_vm1, %v2692_v42, 0.0  ;;  %v1706_v62 = vrot.slane %v1692_v45, %v4907_v37  ;;  %v2703_v63 = vmul.f32 %v2447_v46, %v2447_v46  ;;  %v4511_v4 = vadd.f32 %v1114_v5, %v715_v10 }
 0x153   : > { %v2956_v6 = vadd.f32 %v2955_v61, %v2691_v35  ;;  %v1707_v13 = vcombine.high %v1699_v1, %v1699_v1  ;;  %v5054_v32 = vrot.slane %v1699_v1, %v4907_v37  ;;  %v2704_v15 = vmul.f32 %v2448_v54, %v2448_v54  ;;  %v1127_v35 = vld [vmem:[%s4916_s20 + $0x40] sm:$0xff]  ;;  %v1128_v54 = vld [vmem:[%s4916_s20 + $0x48] sm:$0xff]  ;;  %v1129_v61 = vld [vmem:[%s4916_s20 + $0x50] sm:$0x3f] }
 0x154   : > { %v1708_v9 = vcombine.high %v1706_v62, %v1706_v62  ;;  %v5057_v16 = vrot.slane %v1706_v62, %v4907_v37  ;;  %v2693_v19 = vmul.f32 %v2437_v58, %v2437_v58  ;;  %v2694_v20 = vmul.f32 %v2438_v59, %v2438_v59  ;;  %v1130_v62 = vld [vmem:[%s4916_s20 + $0x58] sm:$0x3f] }
 0x155   : > { %2957 = vadd.xlane.f32.xlu1 %v2956_v6  ;;  %v5060_v8 = vrot.slane %v1707_v13, %v4907_v37  ;;  %v2982_v5 = vsel %vm2943_vm1, %v2704_v15, 0.0  ;;  %v4512_v10 = vadd.f32 %v1116_v11, %v717_v28  ;;  %v1437_v29 = vcombine.high %v4924_v0, %v4924_v0  ;;  %v1141_v11 = vld [vmem:[%s4916_s20 + $0xb0] sm:$0x3f]  ;;  %v1142_v28 = vld [vmem:[%s4916_s20 + $0xb8] sm:$0x3f] }
 0x156   : > { %v5064_v26 = vrot.slane %v1708_v9, %v4907_v37  ;;  %v2983_v27 = vadd.f32 %v2982_v5, %v2703_v63  ;;  %v2959_v31 = vsel %vm2948_vm15, %v2693_v19, 0.0  ;;  %v2960_v36 = vsel %vm2950_vm0, %v2694_v20, 0.0 }
 0x157   : > { %v2961_v44 = vadd.f32 %v2960_v36, %v2959_v31  ;;  %v1741_v47 = vcombine.low %v4511_v4, %v4512_v10  ;;  %v1742_v48 = vcombine.high %v4511_v4, %v4512_v10  ;;  %v1834_v42 = vrot.slane %v4934_v12, %v4911_v56 }
 0x158   : > { %2984 = vadd.xlane.f32.xlu0 %v2983_v27  ;;  %v1838_v45 = vrot.slane %v4934_v12, %v4921_v60  ;;  %v1438_v46 = vcombine.high %v4927_v2, %v4927_v2  ;;  %v1810_v58 = vrot.slane %v1437_v29, %v4911_v56  ;;  %v1814_v59 = vrot.slane %v1437_v29, %v4921_v60 }
 0x159   : > { %2962 = vadd.xlane.f32.xlu1 %v2961_v44  ;;  %v1749_v1 = vrot.slane %v1741_v47, %v4907_v37  ;;  %v1756_v0 = vrot.slane %v1742_v48, %v4907_v37  ;;  %v2451_v63 = vsub.f32 %v1834_v42, %v1139_v43  ;;  %v2453_v6 = vsub.f32 %v1834_v42, %v1141_v11  ;;  %v1143_v42 = vld [vmem:[%s4916_s20 + $0xc0] sm:$0xff] }
 0x15a   : > { %v2452_v4 = vsub.f32 %v1838_v45, %v1140_v34  ;;  %v2454_v13 = vsub.f32 %v1838_v45, %v1142_v28  ;;  %v2439_v20 = vsub.f32 %v1810_v58, %v1127_v35  ;;  %v2440_v5 = vsub.f32 %v1814_v59, %v1128_v54  ;;  %v1144_v45 = vld [vmem:[%s4916_s20 + $0xc8] sm:$0xff] }
 0x15b   : > { %v1757_v15 = vcombine.high %v1749_v1, %v1749_v1  ;;  %v1758_v9 = vcombine.high %v1756_v0, %v1756_v0  ;;  %v5089_v2 = vrot.slane %v1749_v1, %v4907_v37  ;;  %v5092_v19 = vrot.slane %v1756_v0, %v4907_v37  ;;  %v1145_v0 = vld [vmem:[%s4916_s20 + $0xd0] sm:$0x3f] }
 0x15c   : > { %v2441_v10 = vsub.f32 %v1810_v58, %v1129_v61  ;;  %v2442_v27 = vsub.f32 %v1814_v59, %v1130_v62  ;;  %v2707_v43 = vmul.f32 %v2451_v63, %v2451_v63  ;;  %v1439_v44 = vcombine.high %v4931_v3, %v4931_v3  ;;  %v1146_v59 = vld [vmem:[%s4916_s20 + $0xd8] sm:$0x3f] }
 0x15d   : > { %v5095_v31 = vrot.slane %v1757_v15, %v4907_v37  ;;  %v5098_v36 = vrot.slane %v1758_v9, %v4907_v37  ;;  %v2695_v47 = vmul.f32 %v2439_v20, %v2439_v20  ;;  %v2696_v48 = vmul.f32 %v2440_v5, %v2440_v5 }
 0x15e   : > { %v2697_v29 = vmul.f32 %v2441_v10, %v2441_v10  ;;  %v2698_v34 = vmul.f32 %v2442_v27, %v2442_v27  ;;  %v2708_v11 = vmul.f32 %v2452_v4, %v2452_v4  ;;  %v2709_v28 = vmul.f32 %v2453_v6, %v2453_v6  ;;  %v1133_v10 = vld [vmem:[%s4916_s20 + $0x70] sm:$0x3f]  ;;  %v1134_v27 = vld [vmem:[%s4916_s20 + $0x78] sm:$0x3f] }
 0x15f   : > { %v2710_v35 = vmul.f32 %v2454_v13, %v2454_v13  ;;  %v1842_v1 = vrot.slane %v1438_v46, %v4911_v56  ;;  %v2964_v37 = vsel %vm2943_vm1, %v2696_v48, 0.0  ;;  %v1846_v3 = vrot.slane %v1438_v46, %v4921_v60  ;;  %v1131_v48 = vld [vmem:[%s4916_s20 + $0x60] sm:$0xff] }
 0x160   : > { %v2968_v54 = vsel %vm2948_vm15, %v2697_v29, 0.0  ;;  %v2969_v58 = vsel %vm2950_vm0, %v2698_v34, 0.0  ;;  %v2965_v61 = vadd.f32 %v2964_v37, %v2695_v47  ;;  %v2991_v63 = vsel %vm2943_vm1, %v2708_v11, 0.0 }
 0x161   : > { %v2970_v62 = vadd.f32 %v2969_v58, %v2968_v54  ;;  %v2995_v4 = vsel %vm2948_vm15, %v2709_v28, 0.0  ;;  %v2992_v6 = vadd.f32 %v2991_v63, %v2707_v43  ;;  %v2996_v13 = vsel %vm2950_vm0, %v2710_v35, 0.0  ;;  %v1132_v43 = vld [vmem:[%s4916_s20 + $0x68] sm:$0xff] }
 0x162   : > { %v2455_v15 = vsub.f32 %v1842_v1, %v1143_v42  ;;  %v2456_v9 = vsub.f32 %v1846_v3, %v1144_v45  ;;  %2966 = vadd.xlane.f32.xlu0 %v2965_v61  ;;  %v2997_v20 = vadd.f32 %v2996_v13, %v2995_v4  ;;  %v2457_v5 = vsub.f32 %v1842_v1, %v1145_v0  ;;  %v1151_v61 = vld [vmem:[%s4916_s20 + $0x100] sm:$0xff] }
 0x163   : > { %2971 = vadd.xlane.f32.xlu1 %v2970_v62  ;;  %v2458_v46 = vsub.f32 %v1846_v3, %v1146_v59  ;;  %v1818_v34 = vrot.slane %v1439_v44, %v4911_v56  ;;  %v1822_v11 = vrot.slane %v1439_v44, %v4921_v60  ;;  %v1440_v42 = vcombine.high %v4934_v12, %v4934_v12  ;;  %v1153_v59 = vld [vmem:[%s4916_s20 + $0x110] sm:$0x3f] }
 0x164   : > { %v2711_v47 = vmul.f32 %v2455_v15, %v2455_v15  ;;  %v2712_v29 = vmul.f32 %v2456_v9, %v2456_v9  ;;  %v2713_v28 = vmul.f32 %v2457_v5, %v2457_v5  ;;  %v1858_v45 = vrot.slane %v4957_v39, %v4911_v56  ;;  %v1149_v15 = vld [vmem:[%s4916_s20 + $0xf0] sm:$0x3f]  ;;  %v1150_v9 = vld [vmem:[%s4916_s20 + $0xf8] sm:$0x3f] }
 0x165   : > { %v2714_v35 = vmul.f32 %v2458_v46, %v2458_v46  ;;  %v2445_v0 = vsub.f32 %v1818_v34, %v1133_v10  ;;  %v2446_v37 = vsub.f32 %v1822_v11, %v1134_v27  ;;  %v2443_v54 = vsub.f32 %v1818_v34, %v1131_v48  ;;  %v1147_v46 = vld [vmem:[%s4916_s20 + $0xe0] sm:$0xff]  ;;  %v1148_v10 = vld [vmem:[%s4916_s20 + $0xe8] sm:$0xff]  ;;  %v1154_v27 = vld [vmem:[%s4916_s20 + $0x118] sm:$0x3f] }
 0x166   : > { %v3000_v1 = vsel %vm2943_vm1, %v2712_v29, 0.0  ;;  %2993 = vadd.xlane.f32.xlu0 %v2992_v6  ;;  %v3004_v58 = vsel %vm2948_vm15, %v2713_v28, 0.0  ;;  %v2444_v3 = vsub.f32 %v1822_v11, %v1132_v43  ;;  %v1854_v5 = vrot.slane %v1440_v42, %v4921_v60  ;;  %v1152_v11 = vld [vmem:[%s4916_s20 + $0x108] sm:$0xff] }
 0x167   : > { %2998 = vadd.xlane.f32.xlu1 %v2997_v20  ;;  %v3001_v44 = vadd.f32 %v3000_v1, %v2711_v47  ;;  %v3005_v12 = vsel %vm2950_vm0, %v2714_v35, 0.0  ;;  %v2701_v63 = vmul.f32 %v2445_v0, %v2445_v0  ;;  %v2702_v4 = vmul.f32 %v2446_v37, %v2446_v37 }
 0x168   : > { %v3006_v62 = vadd.f32 %v3005_v12, %v3004_v58  ;;  %v2699_v13 = vmul.f32 %v2443_v54, %v2443_v54  ;;  %v2700_v6 = vmul.f32 %v2444_v3, %v2444_v3  ;;  %v1850_v20 = vrot.slane %v1440_v42, %v4911_v56 }
 0x169   : > { %v1862_v48 = vrot.slane %v4957_v39, %v4921_v60  ;;  %v2977_v47 = vsel %vm2948_vm15, %v2701_v63, 0.0  ;;  %v2978_v29 = vsel %vm2950_vm0, %v2702_v4, 0.0  ;;  %v2465_v34 = vsub.f32 %v1858_v45, %v1153_v59 }
 0x16a   : > { %v2463_v43 = vsub.f32 %v1858_v45, %v1151_v61  ;;  %3002 = vadd.xlane.f32.xlu0 %v3001_v44  ;;  %v2979_v28 = vadd.f32 %v2978_v29, %v2977_v47  ;;  %v2973_v35 = vsel %vm2943_vm1, %v2700_v6, 0.0  ;;  %v2461_v1 = vsub.f32 %v1850_v20, %v1149_v15  ;;  %v1169_v6 = vld [vmem:[%s4916_s20 + $0x190] sm:$0x3f]  ;;  %v1168_v47 = vld [vmem:[%s4916_s20 + $0x188] sm:$0xff] }
 0x16b   : > { %3007 = vadd.xlane.f32.xlu1 %v3006_v62  ;;  %v2462_v42 = vsub.f32 %v1854_v5, %v1150_v9  ;;  %v2974_v0 = vadd.f32 %v2973_v35, %v2699_v13  ;;  %v2459_v37 = vsub.f32 %v1850_v20, %v1147_v46  ;;  %v2460_v54 = vsub.f32 %v1854_v5, %v1148_v10  ;;  %v1167_v20 = vld [vmem:[%s4916_s20 + $0x180] sm:$0xff] }
 0x16c   : > { %v2466_v58 = vsub.f32 %v1862_v48, %v1154_v27  ;;  %v2717_v12 = vmul.f32 %v2461_v1, %v2461_v1  ;;  %v2721_v63 = vmul.f32 %v2465_v34, %v2465_v34  ;;  %v2464_v4 = vsub.f32 %v1862_v48, %v1152_v11  ;;  %v1170_v27 = vld [vmem:[%s4916_s20 + $0x198] sm:$0x3f]  ;;  %v1155_v35 = vld [vmem:[%s4916_s20 + $0x120] sm:$0xff] }
 0x16d   : > { %v2718_v3 = vmul.f32 %v2462_v42, %v2462_v42  ;;  %v2715_v59 = vmul.f32 %v2459_v37, %v2459_v37  ;;  %v2716_v45 = vmul.f32 %v2460_v54, %v2460_v54  ;;  %v2719_v61 = vmul.f32 %v2463_v43, %v2463_v43  ;;  %v1158_v37 = vld [vmem:[%s4916_s20 + $0x138] sm:$0x3f] }
 0x16e   : > { %v2722_v44 = vmul.f32 %v2466_v58, %v2466_v58  ;;  %2975 = vadd.xlane.f32.xlu0 %v2974_v0  ;;  %v3013_v62 = vsel %vm2948_vm15, %v2717_v12, 0.0  ;;  %v3022_v15 = vsel %vm2948_vm15, %v2721_v63, 0.0  ;;  %v2720_v9 = vmul.f32 %v2464_v4, %v2464_v4  ;;  %v1156_v58 = vld [vmem:[%s4916_s20 + $0x128] sm:$0xff] }
 0x16f   : > { %2980 = vadd.xlane.f32.xlu1 %v2979_v28  ;;  %v3014_v13 = vsel %vm2950_vm0, %v2718_v3, 0.0  ;;  %v3009_v46 = vsel %vm2943_vm1, %v2716_v45, 0.0  ;;  %v1890_v48 = vrot.slane %v4960_v40, %v4911_v56  ;;  %v1894_v43 = vrot.slane %v4960_v40, %v4921_v60  ;;  %v1157_v28 = vld [vmem:[%s4916_s20 + $0x130] sm:$0x3f] }
 0x170   : > { %v3015_v5 = vadd.f32 %v3014_v13, %v3013_v62  ;;  %v3023_v10 = vsel %vm2950_vm0, %v2722_v44, 0.0  ;;  %v3010_v29 = vadd.f32 %v3009_v46, %v2715_v59  ;;  %v3018_v11 = vsel %vm2943_vm1, %v2720_v9, 0.0 }
 0x171   : > { %v3024_v34 = vadd.f32 %v3023_v10, %v3022_v15  ;;  %v3019_v1 = vadd.f32 %v3018_v11, %v2719_v61  ;;  %v2481_v42 = vsub.f32 %v1890_v48, %v1169_v6  ;;  %v2479_v0 = vsub.f32 %v1890_v48, %v1167_v20 }
 0x172   : > { %v1866_v54 = vrot.slane %v4965_v49, %v4911_v56  ;;  %3011 = vadd.xlane.f32.xlu0 %v3010_v29  ;;  %v2482_v12 = vsub.f32 %v1894_v43, %v1170_v27  ;;  %v2480_v3 = vsub.f32 %v1894_v43, %v1168_v47  ;;  %v1870_v63 = vrot.slane %v4965_v49, %v4921_v60  ;;  %v1161_v47 = vld [vmem:[%s4916_s20 + $0x150] sm:$0x3f]  ;;  %v1159_v29 = vld [vmem:[%s4916_s20 + $0x140] sm:$0xff] }
 0x173   : > { %3016 = vadd.xlane.f32.xlu1 %v3015_v5  ;;  %v2737_v4 = vmul.f32 %v2481_v42, %v2481_v42  ;;  %v2735_v59 = vmul.f32 %v2479_v0, %v2479_v0  ;;  %v1487_v5 = vcombine.high %v4957_v39, %v4957_v39 }
 0x174   : > { %v2469_v45 = vsub.f32 %v1866_v54, %v1157_v28  ;;  %v2467_v44 = vsub.f32 %v1866_v54, %v1155_v35  ;;  %v2738_v61 = vmul.f32 %v2482_v12, %v2482_v12  ;;  %v2736_v62 = vmul.f32 %v2480_v3, %v2480_v3  ;;  %v1162_v35 = vld [vmem:[%s4916_s20 + $0x158] sm:$0x3f] }
 0x175   : > { %v2470_v13 = vsub.f32 %v1870_v63, %v1158_v37  ;;  %v2468_v15 = vsub.f32 %v1870_v63, %v1156_v58  ;;  %v3058_v9 = vsel %vm2948_vm15, %v2737_v4, 0.0  ;;  %v1874_v39 = vrot.slane %v1487_v5, %v4911_v56  ;;  %v1173_v37 = vld [vmem:[%s4916_s20 + $0x1b0] sm:$0x3f]  ;;  %v1171_v58 = vld [vmem:[%s4916_s20 + $0x1a0] sm:$0xff] }
 0x176   : > { %v2725_v6 = vmul.f32 %v2469_v45, %v2469_v45  ;;  %v2723_v20 = vmul.f32 %v2467_v44, %v2467_v44  ;;  %3020 = vadd.xlane.f32.xlu0 %v3019_v1  ;;  %v3059_v46 = vsel %vm2950_vm0, %v2738_v61, 0.0  ;;  %v3054_v10 = vsel %vm2943_vm1, %v2736_v62, 0.0  ;;  %v1172_v45 = vld [vmem:[%s4916_s20 + $0x1a8] sm:$0xff] }
 0x177   : > { %3025 = vadd.xlane.f32.xlu1 %v3024_v34  ;;  %v2726_v27 = vmul.f32 %v2470_v13, %v2470_v13  ;;  %v2724_v48 = vmul.f32 %v2468_v15, %v2468_v15  ;;  %v3060_v11 = vadd.f32 %v3059_v46, %v3058_v9  ;;  %v3055_v43 = vadd.f32 %v3054_v10, %v2735_v59  ;;  %v1160_v34 = vld [vmem:[%s4916_s20 + $0x148] sm:$0xff]  ;;  %v1174_v59 = vld [vmem:[%s4916_s20 + $0x1b8] sm:$0x3f] }
 0x178   : > { %v3031_v28 = vsel %vm2948_vm15, %v2725_v6, 0.0  ;;  %v1878_v0 = vrot.slane %v1487_v5, %v4921_v60  ;;  %v1898_v54 = vrot.slane %v4968_v50, %v4911_v56  ;;  %v2473_v63 = vsub.f32 %v1874_v39, %v1161_v47 }
 0x179   : > { %v3032_v1 = vsel %vm2950_vm0, %v2726_v27, 0.0  ;;  %v3027_v42 = vsel %vm2943_vm1, %v2724_v48, 0.0  ;;  %v2471_v4 = vsub.f32 %v1874_v39, %v1159_v29  ;;  %v1902_v62 = vrot.slane %v4968_v50, %v4921_v60  ;;  %v1177_v39 = vld [vmem:[%s4916_s20 + $0x1d0] sm:$0x3f] }
 0x17a   : > { %v3033_v12 = vadd.f32 %v3032_v1, %v3031_v28  ;;  %v3028_v3 = vadd.f32 %v3027_v42, %v2723_v20  ;;  %3056 = vadd.xlane.f32.xlu0 %v3055_v43  ;;  %v2474_v44 = vsub.f32 %v1878_v0, %v1162_v35  ;;  %v2472_v61 = vsub.f32 %v1878_v0, %v1160_v34  ;;  %v1175_v34 = vld [vmem:[%s4916_s20 + $0x1c0] sm:$0xff] }
 0x17b   : > { %3061 = vadd.xlane.f32.xlu1 %v3060_v11  ;;  %v2729_v13 = vmul.f32 %v2473_v63, %v2473_v63  ;;  %v2727_v15 = vmul.f32 %v2471_v4, %v2471_v4  ;;  %v2485_v9 = vsub.f32 %v1898_v54, %v1173_v37  ;;  %v2483_v6 = vsub.f32 %v1898_v54, %v1171_v58  ;;  %v1178_v37 = vld [vmem:[%s4916_s20 + $0x1d8] sm:$0x3f] }
 0x17c   : > { %v2730_v5 = vmul.f32 %v2474_v44, %v2474_v44  ;;  %v2728_v46 = vmul.f32 %v2472_v61, %v2472_v61  ;;  %v2486_v20 = vsub.f32 %v1902_v62, %v1174_v59  ;;  %v2484_v10 = vsub.f32 %v1902_v62, %v1172_v45  ;;  %v1165_v61 = vld [vmem:[%s4916_s20 + $0x170] sm:$0x3f]  ;;  %v1163_v62 = vld [vmem:[%s4916_s20 + $0x160] sm:$0xff] }
 0x17d   : > { %v3040_v27 = vsel %vm2948_vm15, %v2729_v13, 0.0  ;;  %v2741_v48 = vmul.f32 %v2485_v9, %v2485_v9  ;;  %v2739_v47 = vmul.f32 %v2483_v6, %v2483_v6  ;;  %v1488_v29 = vcombine.high %v4960_v40, %v4960_v40  ;;  %v1176_v40 = vld [vmem:[%s4916_s20 + $0x1c8] sm:$0xff]  ;;  %v1166_v9 = vld [vmem:[%s4916_s20 + $0x178] sm:$0x3f] }
 0x17e   : > { %3029 = vadd.xlane.f32.xlu0 %v3028_v3  ;;  %v3041_v11 = vsel %vm2950_vm0, %v2730_v5, 0.0  ;;  %v3036_v43 = vsel %vm2943_vm1, %v2728_v46, 0.0  ;;  %v2742_v28 = vmul.f32 %v2486_v20, %v2486_v20  ;;  %v2740_v35 = vmul.f32 %v2484_v10, %v2484_v10  ;;  %v1164_v5 = vld [vmem:[%s4916_s20 + $0x168] sm:$0xff] }
 0x17f   : > { %3034 = vadd.xlane.f32.xlu1 %v3033_v12  ;;  %v3042_v1 = vadd.f32 %v3041_v11, %v3040_v27  ;;  %v3037_v42 = vadd.f32 %v3036_v43, %v2727_v15  ;;  %v3067_v0 = vsel %vm2948_vm15, %v2741_v48, 0.0  ;;  %v1906_v54 = vrot.slane %v1488_v29, %v4911_v56 }
 0x180   : > { %v3068_v58 = vsel %vm2950_vm0, %v2742_v28, 0.0  ;;  %v3063_v12 = vsel %vm2943_vm1, %v2740_v35, 0.0  ;;  %v1910_v3 = vrot.slane %v1488_v29, %v4921_v60  ;;  %v1489_v63 = vcombine.high %v4965_v49, %v4965_v49  ;;  %v1181_v35 = vld [vmem:[%s4916_s20 + $0x1f0] sm:$0x3f] }
 0x181   : > { %v3069_v4 = vadd.f32 %v3068_v58, %v3067_v0  ;;  %v3064_v59 = vadd.f32 %v3063_v12, %v2739_v47  ;;  %v2489_v45 = vsub.f32 %v1906_v54, %v1177_v39  ;;  %v2487_v44 = vsub.f32 %v1906_v54, %v1175_v34  ;;  %v1179_v34 = vld [vmem:[%s4916_s20 + $0x1e0] sm:$0xff]  ;;  %v1182_v12 = vld [vmem:[%s4916_s20 + $0x1f8] sm:$0x3f] }
 0x182   : > { %3038 = vadd.xlane.f32.xlu0 %v3037_v42  ;;  %v2490_v13 = vsub.f32 %v1910_v3, %v1178_v37  ;;  %v2488_v15 = vsub.f32 %v1910_v3, %v1176_v40  ;;  %v1882_v6 = vrot.slane %v1489_v63, %v4911_v56  ;;  %v1886_v49 = vrot.slane %v1489_v63, %v4921_v60 }
 0x183   : > { %3043 = vadd.xlane.f32.xlu1 %v3042_v1  ;;  %v2745_v46 = vmul.f32 %v2489_v45, %v2489_v45  ;;  %v2743_v20 = vmul.f32 %v2487_v44, %v2487_v44  ;;  %v1490_v10 = vcombine.high %v4968_v50, %v4968_v50  ;;  %v1185_v44 = vld [vmem:[%s4916_s20 + $0x210] sm:$0x3f] }
 0x184   : > { %v2746_v27 = vmul.f32 %v2490_v13, %v2490_v13  ;;  %v2744_v48 = vmul.f32 %v2488_v15, %v2488_v15  ;;  %v2477_v47 = vsub.f32 %v1882_v6, %v1165_v61  ;;  %v2475_v29 = vsub.f32 %v1882_v6, %v1163_v62  ;;  %v1186_v13 = vld [vmem:[%s4916_s20 + $0x218] sm:$0x3f]  ;;  %v1183_v6 = vld [vmem:[%s4916_s20 + $0x200] sm:$0xff] }
 0x185   : > { %v3076_v11 = vsel %vm2948_vm15, %v2745_v46, 0.0  ;;  %v2478_v43 = vsub.f32 %v1886_v49, %v1166_v9  ;;  %v2476_v28 = vsub.f32 %v1886_v49, %v1164_v5  ;;  %v1914_v39 = vrot.slane %v1490_v10, %v4911_v56  ;;  %v1184_v5 = vld [vmem:[%s4916_s20 + $0x208] sm:$0xff] }
 0x186   : > { %3065 = vadd.xlane.f32.xlu0 %v3064_v59  ;;  %v3077_v1 = vsel %vm2950_vm0, %v2746_v27, 0.0  ;;  %v3072_v50 = vsel %vm2943_vm1, %v2744_v48, 0.0  ;;  %v2733_v42 = vmul.f32 %v2477_v47, %v2477_v47  ;;  %v2731_v0 = vmul.f32 %v2475_v29, %v2475_v29  ;;  %v1180_v59 = vld [vmem:[%s4916_s20 + $0x1e8] sm:$0xff] }
 0x187   : > { %3070 = vadd.xlane.f32.xlu1 %v3069_v4  ;;  %v3078_v37 = vadd.f32 %v3077_v1, %v3076_v11  ;;  %v3073_v54 = vadd.f32 %v3072_v50, %v2743_v20  ;;  %v2734_v40 = vmul.f32 %v2478_v43, %v2478_v43  ;;  %v2732_v58 = vmul.f32 %v2476_v28, %v2476_v28  ;;  %v1201_v1 = vld [vmem:[%s4916_s20 + $0x290] sm:$0x3f] }
 0x188   : > { %v3049_v3 = vsel %vm2948_vm15, %v2733_v42, 0.0  ;;  %v1918_v63 = vrot.slane %v1490_v10, %v4921_v60  ;;  %v2493_v4 = vsub.f32 %v1914_v39, %v1181_v35  ;;  %v2491_v45 = vsub.f32 %v1914_v39, %v1179_v34 }
 0x189   : > { %v3050_v61 = vsel %vm2950_vm0, %v2734_v40, 0.0  ;;  %v3045_v62 = vsel %vm2943_vm1, %v2732_v58, 0.0  ;;  %v1922_v15 = vrot.slane %v4972_v30, %v4911_v56  ;;  %v1926_v9 = vrot.slane %v4972_v30, %v4921_v60  ;;  %v1202_v40 = vld [vmem:[%s4916_s20 + $0x298] sm:$0x3f]  ;;  %v1199_v58 = vld [vmem:[%s4916_s20 + $0x280] sm:$0xff] }
 0x18a   : > { %3074 = vadd.xlane.f32.xlu0 %v3073_v54  ;;  %v3051_v46 = vadd.f32 %v3050_v61, %v3049_v3  ;;  %v3046_v20 = vadd.f32 %v3045_v62, %v2731_v0  ;;  %v2494_v49 = vsub.f32 %v1918_v63, %v1182_v12  ;;  %v2749_v10 = vmul.f32 %v2493_v4, %v2493_v4 }
 0x18b   : > { %3079 = vadd.xlane.f32.xlu1 %v3078_v37  ;;  %v2492_v27 = vsub.f32 %v1918_v63, %v1180_v59  ;;  %v2747_v48 = vmul.f32 %v2491_v45, %v2491_v45  ;;  %v2497_v47 = vsub.f32 %v1922_v15, %v1185_v44  ;;  %v2498_v11 = vsub.f32 %v1926_v9, %v1186_v13  ;;  %v1200_v59 = vld [vmem:[%s4916_s20 + $0x288] sm:$0xff] }
 0x18c   : > { %v2750_v29 = vmul.f32 %v2494_v49, %v2494_v49  ;;  %v2495_v43 = vsub.f32 %v1922_v15, %v1183_v6  ;;  %v2496_v28 = vsub.f32 %v1926_v9, %v1184_v5  ;;  %v3085_v35 = vsel %vm2948_vm15, %v2749_v10, 0.0  ;;  %v1189_v5 = vld [vmem:[%s4916_s20 + $0x230] sm:$0x3f]  ;;  %v1190_v10 = vld [vmem:[%s4916_s20 + $0x238] sm:$0x3f] }
 0x18d   : > { %v2748_v39 = vmul.f32 %v2492_v27, %v2492_v27  ;;  %v2753_v34 = vmul.f32 %v2497_v47, %v2497_v47  ;;  %v1954_v50 = vrot.slane %v4975_v33, %v4911_v56  ;;  %v2754_v0 = vmul.f32 %v2498_v11, %v2498_v11 }
 0x18e   : > { %3047 = vadd.xlane.f32.xlu0 %v3046_v20  ;;  %v3086_v42 = vsel %vm2950_vm0, %v2750_v29, 0.0  ;;  %v2751_v37 = vmul.f32 %v2495_v43, %v2495_v43  ;;  %v2752_v54 = vmul.f32 %v2496_v28, %v2496_v28  ;;  %v1958_v4 = vrot.slane %v4975_v33, %v4921_v60 }
 0x18f   : > { %3052 = vadd.xlane.f32.xlu1 %v3051_v46  ;;  %v3087_v12 = vadd.f32 %v3086_v42, %v3085_v35  ;;  %v3081_v3 = vsel %vm2943_vm1, %v2748_v39, 0.0  ;;  %v3094_v63 = vsel %vm2948_vm15, %v2753_v34, 0.0  ;;  %v3095_v44 = vsel %vm2950_vm0, %v2754_v0, 0.0  ;;  %v1187_v46 = vld [vmem:[%s4916_s20 + $0x220] sm:$0xff]  ;;  %v1193_v0 = vld [vmem:[%s4916_s20 + $0x250] sm:$0x3f] }
 0x190   : > { %v3082_v45 = vadd.f32 %v3081_v3, %v2747_v48  ;;  %v3090_v61 = vsel %vm2943_vm1, %v2752_v54, 0.0  ;;  %v2513_v62 = vsub.f32 %v1954_v50, %v1201_v1  ;;  %v3096_v13 = vadd.f32 %v3095_v44, %v3094_v63  ;;  %v1188_v48 = vld [vmem:[%s4916_s20 + $0x228] sm:$0xff]  ;;  %v1191_v54 = vld [vmem:[%s4916_s20 + $0x240] sm:$0xff]  ;;  %v1194_v3 = vld [vmem:[%s4916_s20 + $0x258] sm:$0x3f] }
 0x191   : > { %v3091_v15 = vadd.f32 %v3090_v61, %v2751_v37  ;;  %v2514_v9 = vsub.f32 %v1958_v4, %v1202_v40  ;;  %v2511_v6 = vsub.f32 %v1954_v50, %v1199_v58  ;;  %v2512_v49 = vsub.f32 %v1958_v4, %v1200_v59  ;;  %v1192_v63 = vld [vmem:[%s4916_s20 + $0x248] sm:$0xff] }
 0x192   : > { %3083 = vadd.xlane.f32.xlu0 %v3082_v45  ;;  %v2769_v20 = vmul.f32 %v2513_v62, %v2513_v62  ;;  %v1930_v27 = vrot.slane %v4980_v55, %v4911_v56  ;;  %v1934_v11 = vrot.slane %v4980_v55, %v4921_v60  ;;  %v1537_v43 = vcombine.high %v4972_v30, %v4972_v30 }
 0x193   : > { %3088 = vadd.xlane.f32.xlu1 %v3087_v12  ;;  %v2770_v47 = vmul.f32 %v2514_v9, %v2514_v9  ;;  %v2767_v29 = vmul.f32 %v2511_v6, %v2511_v6  ;;  %v2768_v35 = vmul.f32 %v2512_v49, %v2512_v49  ;;  %v1203_v49 = vld [vmem:[%s4916_s20 + $0x2a0] sm:$0xff] }
 0x194   : > { %v3130_v28 = vsel %vm2948_vm15, %v2769_v20, 0.0  ;;  %v2501_v39 = vsub.f32 %v1930_v27, %v1189_v5  ;;  %v2499_v34 = vsub.f32 %v1930_v27, %v1187_v46  ;;  %v2502_v50 = vsub.f32 %v1934_v11, %v1190_v10  ;;  %v1205_v20 = vld [vmem:[%s4916_s20 + $0x2b0] sm:$0x3f] }
 0x195   : > { %v3131_v1 = vsel %vm2950_vm0, %v2770_v47, 0.0  ;;  %v2500_v42 = vsub.f32 %v1934_v11, %v1188_v48  ;;  %v1938_v37 = vrot.slane %v1537_v43, %v4911_v56  ;;  %v3126_v30 = vsel %vm2943_vm1, %v2768_v35, 0.0  ;;  %v1206_v47 = vld [vmem:[%s4916_s20 + $0x2b8] sm:$0x3f] }
 0x196   : > { %3092 = vadd.xlane.f32.xlu0 %v3091_v15  ;;  %v3132_v40 = vadd.f32 %v3131_v1, %v3130_v28  ;;  %v2757_v58 = vmul.f32 %v2501_v39, %v2501_v39  ;;  %v2755_v12 = vmul.f32 %v2499_v34, %v2499_v34  ;;  %v3127_v4 = vadd.f32 %v3126_v30, %v2767_v29  ;;  %v1204_v29 = vld [vmem:[%s4916_s20 + $0x2a8] sm:$0xff] }
 0x197   : > { %3097 = vadd.xlane.f32.xlu1 %v3096_v13  ;;  %v2758_v59 = vmul.f32 %v2502_v50, %v2502_v50  ;;  %v2756_v45 = vmul.f32 %v2500_v42, %v2500_v42  ;;  %v1942_v44 = vrot.slane %v1537_v43, %v4921_v60  ;;  %v2505_v62 = vsub.f32 %v1938_v37, %v1193_v0 }
 0x198   : > { %v3103_v61 = vsel %vm2948_vm15, %v2757_v58, 0.0  ;;  %v2503_v13 = vsub.f32 %v1938_v37, %v1191_v54  ;;  %v1962_v15 = vrot.slane %v4983_v57, %v4911_v56  ;;  %v1966_v35 = vrot.slane %v4983_v57, %v4921_v60 }
 0x199   : > { %v3104_v9 = vsel %vm2950_vm0, %v2758_v59, 0.0  ;;  %v3099_v6 = vsel %vm2943_vm1, %v2756_v45, 0.0  ;;  %v2506_v5 = vsub.f32 %v1942_v44, %v1194_v3  ;;  %v2504_v46 = vsub.f32 %v1942_v44, %v1192_v63  ;;  %v1207_v3 = vld [vmem:[%s4916_s20 + $0x2c0] sm:$0xff]  ;;  %v1210_v45 = vld [vmem:[%s4916_s20 + $0x2d8] sm:$0x3f] }
 0x19a   : > { %3128 = vadd.xlane.f32.xlu0 %v3127_v4  ;;  %v3105_v10 = vadd.f32 %v3104_v9, %v3103_v61  ;;  %v3100_v27 = vadd.f32 %v3099_v6, %v2755_v12  ;;  %v2761_v48 = vmul.f32 %v2505_v62, %v2505_v62  ;;  %v2759_v43 = vmul.f32 %v2503_v13, %v2503_v13  ;;  %v1209_v12 = vld [vmem:[%s4916_s20 + $0x2d0] sm:$0x3f]  ;;  %v1208_v62 = vld [vmem:[%s4916_s20 + $0x2c8] sm:$0xff] }
 0x19b   : > { %3133 = vadd.xlane.f32.xlu1 %v3132_v40  ;;  %v2762_v11 = vmul.f32 %v2506_v5, %v2506_v5  ;;  %v2760_v28 = vmul.f32 %v2504_v46, %v2504_v46  ;;  %v2517_v34 = vsub.f32 %v1962_v15, %v1205_v20  ;;  %v2515_v1 = vsub.f32 %v1962_v15, %v1203_v49 }
 0x19c   : > { %v3112_v39 = vsel %vm2948_vm15, %v2761_v48, 0.0  ;;  %v1538_v50 = vcombine.high %v4975_v33, %v4975_v33  ;;  %v2518_v37 = vsub.f32 %v1966_v35, %v1206_v47  ;;  %v2516_v54 = vsub.f32 %v1966_v35, %v1204_v29  ;;  %v1195_v48 = vld [vmem:[%s4916_s20 + $0x260] sm:$0xff] }
 0x19d   : > { %v3113_v42 = vsel %vm2950_vm0, %v2762_v11, 0.0  ;;  %v3108_v0 = vsel %vm2943_vm1, %v2760_v28, 0.0  ;;  %v2773_v58 = vmul.f32 %v2517_v34, %v2517_v34  ;;  %v2771_v4 = vmul.f32 %v2515_v1, %v2515_v1  ;;  %v1213_v28 = vld [vmem:[%s4916_s20 + $0x2f0] sm:$0x3f] }
 0x19e   : > { %3101 = vadd.xlane.f32.xlu0 %v3100_v27  ;;  %v3114_v40 = vadd.f32 %v3113_v42, %v3112_v39  ;;  %v3109_v30 = vadd.f32 %v3108_v0, %v2759_v43  ;;  %v2774_v63 = vmul.f32 %v2518_v37, %v2518_v37  ;;  %v2772_v59 = vmul.f32 %v2516_v54, %v2516_v54  ;;  %v1197_v27 = vld [vmem:[%s4916_s20 + $0x270] sm:$0x3f]  ;;  %v1196_v43 = vld [vmem:[%s4916_s20 + $0x268] sm:$0xff]  ;;  %v1214_v54 = vld [vmem:[%s4916_s20 + $0x2f8] sm:$0x3f] }
 0x19f   : > { %3106 = vadd.xlane.f32.xlu1 %v3105_v10  ;;  %v1970_v33 = vrot.slane %v1538_v50, %v4911_v56  ;;  %v3139_v44 = vsel %vm2948_vm15, %v2773_v58, 0.0  ;;  %v1974_v61 = vrot.slane %v1538_v50, %v4921_v60  ;;  %v1539_v13 = vcombine.high %v4980_v55, %v4980_v55 }
 0x1a0   : > { %v1540_v15 = vcombine.high %v4983_v57, %v4983_v57  ;;  %v3140_v9 = vsel %vm2950_vm0, %v2774_v63, 0.0  ;;  %v3135_v6 = vsel %vm2943_vm1, %v2772_v59, 0.0  ;;  %v1198_v57 = vld [vmem:[%s4916_s20 + $0x278] sm:$0x3f]  ;;  %v1212_v63 = vld [vmem:[%s4916_s20 + $0x2e8] sm:$0xff] }
 0x1a1   : > { %v2521_v5 = vsub.f32 %v1970_v33, %v1209_v12  ;;  %v2519_v46 = vsub.f32 %v1970_v33, %v1207_v3  ;;  %v3141_v20 = vadd.f32 %v3140_v9, %v3139_v44  ;;  %v3136_v49 = vadd.f32 %v3135_v6, %v2771_v4  ;;  %v1211_v3 = vld [vmem:[%s4916_s20 + $0x2e0] sm:$0xff] }
 0x1a2   : > { %3110 = vadd.xlane.f32.xlu0 %v3109_v30  ;;  %v2522_v10 = vsub.f32 %v1974_v61, %v1210_v45  ;;  %v2520_v47 = vsub.f32 %v1974_v61, %v1208_v62  ;;  %v1946_v11 = vrot.slane %v1539_v13, %v4911_v56  ;;  %v1950_v39 = vrot.slane %v1539_v13, %v4921_v60 }
 0x1a3   : > { %3115 = vadd.xlane.f32.xlu1 %v3114_v40  ;;  %v2777_v55 = vmul.f32 %v2521_v5, %v2521_v5  ;;  %v2775_v29 = vmul.f32 %v2519_v46, %v2519_v46  ;;  %v1978_v34 = vrot.slane %v1540_v15, %v4911_v56  ;;  %v1982_v1 = vrot.slane %v1540_v15, %v4921_v60  ;;  %v1217_v46 = vld [vmem:[%s4916_s20 + $0x310] sm:$0x3f] }
 0x1a4   : > { %v2778_v35 = vmul.f32 %v2522_v10, %v2522_v10  ;;  %v2776_v42 = vmul.f32 %v2520_v47, %v2520_v47  ;;  %v2509_v0 = vsub.f32 %v1946_v11, %v1197_v27  ;;  %v2507_v37 = vsub.f32 %v1946_v11, %v1195_v48  ;;  %v1215_v48 = vld [vmem:[%s4916_s20 + $0x300] sm:$0xff]  ;;  %v1218_v11 = vld [vmem:[%s4916_s20 + $0x318] sm:$0x3f] }
 0x1a5   : > { %v3148_v50 = vsel %vm2948_vm15, %v2777_v55, 0.0  ;;  %v2510_v30 = vsub.f32 %v1950_v39, %v1198_v57  ;;  %v2508_v58 = vsub.f32 %v1950_v39, %v1196_v43  ;;  %v2525_v12 = vsub.f32 %v1978_v34, %v1213_v28  ;;  %v1216_v43 = vld [vmem:[%s4916_s20 + $0x308] sm:$0xff] }
 0x1a6   : > { %3137 = vadd.xlane.f32.xlu0 %v3136_v49  ;;  %v3149_v40 = vsel %vm2950_vm0, %v2778_v35, 0.0  ;;  %v3144_v59 = vsel %vm2943_vm1, %v2776_v42, 0.0  ;;  %v2765_v45 = vmul.f32 %v2509_v0, %v2509_v0  ;;  %v2763_v33 = vmul.f32 %v2507_v37, %v2507_v37 }
 0x1a7   : > { %3142 = vadd.xlane.f32.xlu1 %v3141_v20  ;;  %v3150_v4 = vadd.f32 %v3149_v40, %v3148_v50  ;;  %v3145_v44 = vadd.f32 %v3144_v59, %v2775_v29  ;;  %v2766_v61 = vmul.f32 %v2510_v30, %v2510_v30  ;;  %v2764_v62 = vmul.f32 %v2508_v58, %v2508_v58  ;;  %v1234_v50 = vld [vmem:[%s4916_s20 + $0x398] sm:$0x3f]  ;;  %v1231_v40 = vld [vmem:[%s4916_s20 + $0x380] sm:$0xff] }
 0x1a8   : > { %v2526_v13 = vsub.f32 %v1982_v1, %v1214_v54  ;;  %v3121_v15 = vsel %vm2948_vm15, %v2765_v45, 0.0  ;;  %v2781_v9 = vmul.f32 %v2525_v12, %v2525_v12  ;;  %v2523_v6 = vsub.f32 %v1978_v34, %v1211_v3 }
 0x1a9   : > { %v2524_v5 = vsub.f32 %v1982_v1, %v1212_v63  ;;  %v3122_v20 = vsel %vm2950_vm0, %v2766_v61, 0.0  ;;  %v3117_v49 = vsel %vm2943_vm1, %v2764_v62, 0.0  ;;  %v1986_v27 = vrot.slane %v4992_v18, %v4911_v56  ;;  %v1233_v1 = vld [vmem:[%s4916_s20 + $0x390] sm:$0x3f]  ;;  %v1232_v63 = vld [vmem:[%s4916_s20 + $0x388] sm:$0xff] }
 0x1aa   : > { %3146 = vadd.xlane.f32.xlu0 %v3145_v44  ;;  %v2782_v10 = vmul.f32 %v2526_v13, %v2526_v13  ;;  %v3123_v55 = vadd.f32 %v3122_v20, %v3121_v15  ;;  %v3118_v47 = vadd.f32 %v3117_v49, %v2763_v33  ;;  %v3157_v29 = vsel %vm2948_vm15, %v2781_v9, 0.0 }
 0x1ab   : > { %3151 = vadd.xlane.f32.xlu1 %v3150_v4  ;;  %v2779_v57 = vmul.f32 %v2523_v6, %v2523_v6  ;;  %v2780_v35 = vmul.f32 %v2524_v5, %v2524_v5  ;;  %v1990_v39 = vrot.slane %v4992_v18, %v4921_v60  ;;  %v2529_v34 = vsub.f32 %v1986_v27, %v1217_v46  ;;  %v1221_v5 = vld [vmem:[%s4916_s20 + $0x330] sm:$0x3f]  ;;  %v1222_v46 = vld [vmem:[%s4916_s20 + $0x338] sm:$0x3f] }
 0x1ac   : > { %v3158_v28 = vsel %vm2950_vm0, %v2782_v10, 0.0  ;;  %v2527_v0 = vsub.f32 %v1986_v27, %v1215_v48  ;;  %v2018_v37 = vrot.slane %v4995_v24, %v4911_v56  ;;  %v2022_v54 = vrot.slane %v4995_v24, %v4921_v60 }
 0x1ad   : > { %v3159_v42 = vadd.f32 %v3158_v28, %v3157_v29  ;;  %v3153_v30 = vsel %vm2943_vm1, %v2780_v35, 0.0  ;;  %v2530_v58 = vsub.f32 %v1990_v39, %v1218_v11  ;;  %v2785_v12 = vmul.f32 %v2529_v34, %v2529_v34 }
 0x1ae   : > { %3119 = vadd.xlane.f32.xlu0 %v3118_v47  ;;  %v2528_v3 = vsub.f32 %v1990_v39, %v1216_v43  ;;  %v3154_v4 = vadd.f32 %v3153_v30, %v2779_v57  ;;  %v2783_v59 = vmul.f32 %v2527_v0, %v2527_v0  ;;  %v2545_v45 = vsub.f32 %v2018_v37, %v1233_v1  ;;  %v1220_v47 = vld [vmem:[%s4916_s20 + $0x328] sm:$0xff]  ;;  %v1237_v0 = vld [vmem:[%s4916_s20 + $0x3b0] sm:$0x3f] }
 0x1af   : > { %3124 = vadd.xlane.f32.xlu1 %v3123_v55  ;;  %v2546_v33 = vsub.f32 %v2022_v54, %v1234_v50  ;;  %v2786_v44 = vmul.f32 %v2530_v58, %v2530_v58  ;;  %v3166_v61 = vsel %vm2948_vm15, %v2785_v12, 0.0  ;;  %v2543_v13 = vsub.f32 %v2018_v37, %v1231_v40  ;;  %v1219_v55 = vld [vmem:[%s4916_s20 + $0x320] sm:$0xff]  ;;  %v1225_v58 = vld [vmem:[%s4916_s20 + $0x350] sm:$0x3f] }
 0x1b0   : > { %v2784_v62 = vmul.f32 %v2528_v3, %v2528_v3  ;;  %v2801_v15 = vmul.f32 %v2545_v45, %v2545_v45  ;;  %v2544_v6 = vsub.f32 %v2022_v54, %v1232_v63  ;;  %v1994_v20 = vrot.slane %v5001_v38, %v4911_v56  ;;  %v1223_v12 = vld [vmem:[%s4916_s20 + $0x340] sm:$0xff] }
 0x1b1   : > { %v2802_v9 = vmul.f32 %v2546_v33, %v2546_v33  ;;  %v3167_v49 = vsel %vm2950_vm0, %v2786_v44, 0.0  ;;  %v2799_v27 = vmul.f32 %v2543_v13, %v2543_v13  ;;  %v1998_v48 = vrot.slane %v5001_v38, %v4921_v60  ;;  %v1224_v33 = vld [vmem:[%s4916_s20 + $0x348] sm:$0xff]  ;;  %v1238_v13 = vld [vmem:[%s4916_s20 + $0x3b8] sm:$0x3f] }
 0x1b2   : > { %3155 = vadd.xlane.f32.xlu0 %v3154_v4  ;;  %v3162_v10 = vsel %vm2943_vm1, %v2784_v62, 0.0  ;;  %v3168_v29 = vadd.f32 %v3167_v49, %v3166_v61  ;;  %v3202_v11 = vsel %vm2948_vm15, %v2801_v15, 0.0  ;;  %v2800_v35 = vmul.f32 %v2544_v6, %v2544_v6  ;;  %v1236_v49 = vld [vmem:[%s4916_s20 + $0x3a8] sm:$0xff] }
 0x1b3   : > { %3160 = vadd.xlane.f32.xlu1 %v3159_v42  ;;  %v3163_v57 = vadd.f32 %v3162_v10, %v2783_v59  ;;  %v3203_v43 = vsel %vm2950_vm0, %v2802_v9, 0.0  ;;  %v2533_v39 = vsub.f32 %v1994_v20, %v1221_v5  ;;  %v2534_v34 = vsub.f32 %v1998_v48, %v1222_v46  ;;  %v1226_v59 = vld [vmem:[%s4916_s20 + $0x358] sm:$0x3f] }
 0x1b4   : > { %v3204_v28 = vadd.f32 %v3203_v43, %v3202_v11  ;;  %v2531_v1 = vsub.f32 %v1994_v20, %v1219_v55  ;;  %v2532_v50 = vsub.f32 %v1998_v48, %v1220_v47  ;;  %v1587_v42 = vcombine.high %v4992_v18, %v4992_v18  ;;  %v1235_v20 = vld [vmem:[%s4916_s20 + $0x3a0] sm:$0xff] }
 0x1b5   : > { %v2026_v37 = vrot.slane %v5004_v41, %v4911_v56  ;;  %v3198_v54 = vsel %vm2943_vm1, %v2800_v35, 0.0  ;;  %v2789_v40 = vmul.f32 %v2533_v39, %v2533_v39  ;;  %v2790_v30 = vmul.f32 %v2534_v34, %v2534_v34 }
 0x1b6   : > { %3164 = vadd.xlane.f32.xlu0 %v3163_v57  ;;  %v2030_v3 = vrot.slane %v5004_v41, %v4921_v60  ;;  %v3199_v63 = vadd.f32 %v3198_v54, %v2799_v27  ;;  %v2787_v18 = vmul.f32 %v2531_v1, %v2531_v1  ;;  %v2788_v4 = vmul.f32 %v2532_v50, %v2532_v50 }
 0x1b7   : > { %3169 = vadd.xlane.f32.xlu1 %v3168_v29  ;;  %v2002_v45 = vrot.slane %v1587_v42, %v4911_v56  ;;  %v3175_v44 = vsel %vm2948_vm15, %v2789_v40, 0.0  ;;  %v3176_v61 = vsel %vm2950_vm0, %v2790_v30, 0.0  ;;  %v2006_v62 = vrot.slane %v1587_v42, %v4921_v60  ;;  %v1239_v30 = vld [vmem:[%s4916_s20 + $0x3c0] sm:$0xff] }
 0x1b8   : > { %v2549_v15 = vsub.f32 %v2026_v37, %v1237_v0  ;;  %v3177_v9 = vadd.f32 %v3176_v61, %v3175_v44  ;;  %v3171_v6 = vsel %vm2943_vm1, %v2788_v4, 0.0  ;;  %v2550_v29 = vsub.f32 %v2030_v3, %v1238_v13  ;;  %v1229_v13 = vld [vmem:[%s4916_s20 + $0x370] sm:$0x3f] }
 0x1b9   : > { %v2537_v5 = vsub.f32 %v2002_v45, %v1225_v58  ;;  %v2535_v46 = vsub.f32 %v2002_v45, %v1223_v12  ;;  %v3172_v10 = vadd.f32 %v3171_v6, %v2787_v18  ;;  %v2538_v27 = vsub.f32 %v2006_v62, %v1226_v59 }
 0x1ba   : > { %3200 = vadd.xlane.f32.xlu0 %v3199_v63  ;;  %v2536_v48 = vsub.f32 %v2006_v62, %v1224_v33  ;;  %v2805_v57 = vmul.f32 %v2549_v15, %v2549_v15  ;;  %v2547_v35 = vsub.f32 %v2026_v37, %v1235_v20  ;;  %v2548_v39 = vsub.f32 %v2030_v3, %v1236_v49  ;;  %v1241_v37 = vld [vmem:[%s4916_s20 + $0x3d0] sm:$0x3f]  ;;  %v1242_v63 = vld [vmem:[%s4916_s20 + $0x3d8] sm:$0x3f]  ;;  %v1227_v15 = vld [vmem:[%s4916_s20 + $0x360] sm:$0xff] }
 0x1bb   : > { %3205 = vadd.xlane.f32.xlu1 %v3204_v28  ;;  %v2793_v55 = vmul.f32 %v2537_v5, %v2537_v5  ;;  %v2791_v47 = vmul.f32 %v2535_v46, %v2535_v46  ;;  %v2794_v11 = vmul.f32 %v2538_v27, %v2538_v27  ;;  %v2806_v1 = vmul.f32 %v2550_v29, %v2550_v29  ;;  %v1230_v46 = vld [vmem:[%s4916_s20 + $0x378] sm:$0x3f]  ;;  %v1228_v49 = vld [vmem:[%s4916_s20 + $0x368] sm:$0xff] }
 0x1bc   : > { %v2792_v43 = vmul.f32 %v2536_v48, %v2536_v48  ;;  %v3211_v28 = vsel %vm2948_vm15, %v2805_v57, 0.0  ;;  %v1588_v50 = vcombine.high %v4995_v24, %v4995_v24  ;;  %v2803_v54 = vmul.f32 %v2547_v35, %v2547_v35  ;;  %v1240_v24 = vld [vmem:[%s4916_s20 + $0x3c8] sm:$0xff] }
 0x1bd   : > { %v3184_v34 = vsel %vm2948_vm15, %v2793_v55, 0.0  ;;  %v3185_v42 = vsel %vm2950_vm0, %v2794_v11, 0.0  ;;  %v2804_v40 = vmul.f32 %v2548_v39, %v2548_v39  ;;  %v3212_v3 = vsel %vm2950_vm0, %v2806_v1, 0.0 }
 0x1be   : > { %3173 = vadd.xlane.f32.xlu0 %v3172_v10  ;;  %v3180_v0 = vsel %vm2943_vm1, %v2792_v43, 0.0  ;;  %v3186_v58 = vadd.f32 %v3185_v42, %v3184_v34  ;;  %v2034_v18 = vrot.slane %v1588_v50, %v4911_v56  ;;  %v3213_v4 = vadd.f32 %v3212_v3, %v3211_v28  ;;  %v1249_v10 = vld [vmem:[%s4916_s20 + $0x410] sm:$0x3f]  ;;  %v1250_v34 = vld [vmem:[%s4916_s20 + $0x418] sm:$0x3f]  ;;  %v1247_v28 = vld [vmem:[%s4916_s20 + $0x400] sm:$0xff] }
 0x1bf   : > { %3178 = vadd.xlane.f32.xlu1 %v3177_v9  ;;  %v3181_v12 = vadd.f32 %v3180_v0, %v2791_v47  ;;  %v3207_v59 = vsel %vm2943_vm1, %v2804_v40, 0.0  ;;  %v2038_v45 = vrot.slane %v1588_v50, %v4921_v60  ;;  %v1589_v33 = vcombine.high %v5001_v38, %v5001_v38  ;;  %v1248_v40 = vld [vmem:[%s4916_s20 + $0x408] sm:$0xff] }
 0x1c0   : > { %v3208_v44 = vadd.f32 %v3207_v59, %v2803_v54  ;;  %v2553_v61 = vsub.f32 %v2034_v18, %v1241_v37  ;;  %v2551_v62 = vsub.f32 %v2034_v18, %v1239_v30  ;;  %v2050_v9 = vrot.slane %v5008_v22, %v4911_v56 }
 0x1c1   : > { %v2554_v6 = vsub.f32 %v2038_v45, %v1242_v63  ;;  %v2552_v5 = vsub.f32 %v2038_v45, %v1240_v24  ;;  %v2010_v20 = vrot.slane %v1589_v33, %v4911_v56  ;;  %v2014_v48 = vrot.slane %v1589_v33, %v4921_v60 }
 0x1c2   : > { %3182 = vadd.xlane.f32.xlu0 %v3181_v12  ;;  %v2809_v38 = vmul.f32 %v2553_v61, %v2553_v61  ;;  %v2807_v27 = vmul.f32 %v2551_v62, %v2551_v62  ;;  %v2054_v55 = vrot.slane %v5008_v22, %v4921_v60  ;;  %v2561_v1 = vsub.f32 %v2050_v9, %v1249_v10  ;;  %v1263_v61 = vld [vmem:[%s4916_s20 + $0x480] sm:$0xff]  ;;  %v1264_v10 = vld [vmem:[%s4916_s20 + $0x488] sm:$0xff] }
 0x1c3   : > { %3187 = vadd.xlane.f32.xlu1 %v3186_v58  ;;  %v2810_v47 = vmul.f32 %v2554_v6, %v2554_v6  ;;  %v2808_v29 = vmul.f32 %v2552_v5, %v2552_v5  ;;  %v2541_v57 = vsub.f32 %v2010_v20, %v1229_v13  ;;  %v2539_v11 = vsub.f32 %v2010_v20, %v1227_v15 }
 0x1c4   : > { %v3220_v43 = vsel %vm2948_vm15, %v2809_v38, 0.0  ;;  %v2542_v35 = vsub.f32 %v2014_v48, %v1230_v46  ;;  %v2540_v39 = vsub.f32 %v2014_v48, %v1228_v49  ;;  %v2562_v63 = vsub.f32 %v2054_v55, %v1250_v34 }
 0x1c5   : > { %v3221_v50 = vsel %vm2950_vm0, %v2810_v47, 0.0  ;;  %v3216_v42 = vsel %vm2943_vm1, %v2808_v29, 0.0  ;;  %v2797_v0 = vmul.f32 %v2541_v57, %v2541_v57  ;;  %v2795_v54 = vmul.f32 %v2539_v11, %v2539_v11 }
 0x1c6   : > { %3209 = vadd.xlane.f32.xlu0 %v3208_v44  ;;  %v3222_v37 = vadd.f32 %v3221_v50, %v3220_v43  ;;  %v3217_v30 = vadd.f32 %v3216_v42, %v2807_v27  ;;  %v2798_v58 = vmul.f32 %v2542_v35, %v2542_v35  ;;  %v2796_v12 = vmul.f32 %v2540_v39, %v2540_v39  ;;  %v1253_v43 = vld [vmem:[%s4916_s20 + $0x430] sm:$0x3f]  ;;  %v1251_v35 = vld [vmem:[%s4916_s20 + $0x420] sm:$0xff]  ;;  %v1244_v50 = vld [vmem:[%s4916_s20 + $0x3e8] sm:$0xff] }
 0x1c7   : > { %3214 = vadd.xlane.f32.xlu1 %v3213_v4  ;;  %v3193_v3 = vsel %vm2948_vm15, %v2797_v0, 0.0  ;;  %v2817_v18 = vmul.f32 %v2561_v1, %v2561_v1  ;;  %v2559_v24 = vsub.f32 %v2050_v9, %v1247_v28  ;;  %v1265_v4 = vld [vmem:[%s4916_s20 + $0x490] sm:$0x3f]  ;;  %v2560_v33 = vsub.f32 %v2054_v55, %v1248_v40  ;;  %v1266_v9 = vld [vmem:[%s4916_s20 + $0x498] sm:$0x3f]  ;;  %v1243_v28 = vld [vmem:[%s4916_s20 + $0x3e0] sm:$0xff] }
 0x1c8   : > { %v3194_v59 = vsel %vm2950_vm0, %v2798_v58, 0.0  ;;  %v3189_v45 = vsel %vm2943_vm1, %v2796_v12, 0.0  ;;  %v2082_v44 = vrot.slane %v5011_v23, %v4911_v56  ;;  %v2818_v15 = vmul.f32 %v2562_v63, %v2562_v63 }
 0x1c9   : > { %v3195_v62 = vadd.f32 %v3194_v59, %v3193_v3  ;;  %v3190_v13 = vadd.f32 %v3189_v45, %v2795_v54  ;;  %v3238_v6 = vsel %vm2948_vm15, %v2817_v18, 0.0  ;;  %v2815_v5 = vmul.f32 %v2559_v24, %v2559_v24  ;;  %v1252_v45 = vld [vmem:[%s4916_s20 + $0x428] sm:$0xff] }
 0x1ca   : > { %3218 = vadd.xlane.f32.xlu0 %v3217_v30  ;;  %v2816_v46 = vmul.f32 %v2560_v33, %v2560_v33  ;;  %v2086_v20 = vrot.slane %v5011_v23, %v4921_v60  ;;  %v2577_v49 = vsub.f32 %v2082_v44, %v1265_v4  ;;  %v3239_v38 = vsel %vm2950_vm0, %v2818_v15, 0.0  ;;  %v1254_v30 = vld [vmem:[%s4916_s20 + $0x438] sm:$0x3f] }
 0x1cb   : > { %3223 = vadd.xlane.f32.xlu1 %v3222_v37  ;;  %v2575_v27 = vsub.f32 %v2082_v44, %v1263_v61  ;;  %v1590_v48 = vcombine.high %v5004_v41, %v5004_v41  ;;  %v2058_v55 = vrot.slane %v5016_v52, %v4911_v56  ;;  %v3240_v47 = vadd.f32 %v3239_v38, %v3238_v6  ;;  %v1245_v41 = vld [vmem:[%s4916_s20 + $0x3f0] sm:$0x3f]  ;;  %v1246_v37 = vld [vmem:[%s4916_s20 + $0x3f8] sm:$0x3f] }
 0x1cc   : > { %v3234_v29 = vsel %vm2943_vm1, %v2816_v46, 0.0  ;;  %v2578_v57 = vsub.f32 %v2086_v20, %v1266_v9  ;;  %v2833_v11 = vmul.f32 %v2577_v49, %v2577_v49  ;;  %v2576_v34 = vsub.f32 %v2086_v20, %v1264_v10 }
 0x1cd   : > { %v3235_v39 = vadd.f32 %v3234_v29, %v2815_v5  ;;  %v2831_v1 = vmul.f32 %v2575_v27, %v2575_v27  ;;  %v2042_v54 = vrot.slane %v1590_v48, %v4911_v56  ;;  %v2046_v40 = vrot.slane %v1590_v48, %v4921_v60 }
 0x1ce   : > { %3191 = vadd.xlane.f32.xlu0 %v3190_v13  ;;  %v2834_v42 = vmul.f32 %v2578_v57, %v2578_v57  ;;  %v3274_v0 = vsel %vm2948_vm15, %v2833_v11, 0.0  ;;  %v2832_v58 = vmul.f32 %v2576_v34, %v2576_v34  ;;  %v2062_v12 = vrot.slane %v5016_v52, %v4921_v60  ;;  %v1257_v57 = vld [vmem:[%s4916_s20 + $0x450] sm:$0x3f]  ;;  %v1255_v11 = vld [vmem:[%s4916_s20 + $0x440] sm:$0xff]  ;;  %v1256_v34 = vld [vmem:[%s4916_s20 + $0x448] sm:$0xff] }
 0x1cf   : > { %3196 = vadd.xlane.f32.xlu1 %v3195_v62  ;;  %v2565_v3 = vsub.f32 %v2058_v55, %v1253_v43  ;;  %v2563_v63 = vsub.f32 %v2058_v55, %v1251_v35  ;;  %v2555_v24 = vsub.f32 %v2042_v54, %v1243_v28  ;;  %v2556_v4 = vsub.f32 %v2046_v40, %v1244_v50  ;;  %v1267_v50 = vld [vmem:[%s4916_s20 + $0x4a0] sm:$0xff] }
 0x1d0   : > { %v3275_v18 = vsel %vm2950_vm0, %v2834_v42, 0.0  ;;  %v2557_v59 = vsub.f32 %v2042_v54, %v1245_v41  ;;  %v3270_v44 = vsel %vm2943_vm1, %v2832_v58, 0.0  ;;  %v2558_v61 = vsub.f32 %v2046_v40, %v1246_v37  ;;  %v1268_v41 = vld [vmem:[%s4916_s20 + $0x4a8] sm:$0xff] }
 0x1d1   : > { %v3276_v33 = vadd.f32 %v3275_v18, %v3274_v0  ;;  %v2566_v62 = vsub.f32 %v2062_v12, %v1254_v30  ;;  %v3271_v13 = vadd.f32 %v3270_v44, %v2831_v1  ;;  %v2811_v15 = vmul.f32 %v2555_v24, %v2555_v24 }
 0x1d2   : > { %3241 = vadd.xlane.f32.xlu0 %v3240_v47  ;;  %v2812_v6 = vmul.f32 %v2556_v4, %v2556_v4  ;;  %v2813_v9 = vmul.f32 %v2557_v59, %v2557_v59  ;;  %v2814_v5 = vmul.f32 %v2558_v61, %v2558_v61  ;;  %v2821_v46 = vmul.f32 %v2565_v3, %v2565_v3  ;;  %v1270_v3 = vld [vmem:[%s4916_s20 + $0x4b8] sm:$0x3f] }
 0x1d3   : > { %3236 = vadd.xlane.f32.xlu1 %v3235_v39  ;;  %v2822_v20 = vmul.f32 %v2566_v62, %v2566_v62  ;;  %v2564_v49 = vsub.f32 %v2062_v12, %v1252_v45  ;;  %v1637_v27 = vcombine.high %v5008_v22, %v5008_v22  ;;  %v2819_v29 = vmul.f32 %v2563_v63, %v2563_v63  ;;  %v1258_v39 = vld [vmem:[%s4916_s20 + $0x458] sm:$0x3f]  ;;  %v1269_v12 = vld [vmem:[%s4916_s20 + $0x4b0] sm:$0x3f] }
 0x1d4   : > { %v3225_v10 = vsel %vm2943_vm1, %v2812_v6, 0.0  ;;  %v3229_v38 = vsel %vm2948_vm15, %v2813_v9, 0.0  ;;  %v3230_v48 = vsel %vm2950_vm0, %v2814_v5, 0.0  ;;  %v3247_v55 = vsel %vm2948_vm15, %v2821_v46, 0.0  ;;  %v5453_v6 = vpop.xlane.xlu1 %2989 }
 0x1d5   : > { %v3248_v47 = vsel %vm2950_vm0, %v2822_v20, 0.0  ;;  %v3226_v43 = vadd.f32 %v3225_v10, %v2811_v15  ;;  %v2820_v35 = vmul.f32 %v2564_v49, %v2564_v49  ;;  %v2066_v22 = vrot.slane %v1637_v27, %v4911_v56 }
 0x1d6   : > { %3277 = vadd.xlane.f32.xlu0 %v3276_v33  ;;  %v3231_v1 = vadd.f32 %v3230_v48, %v3229_v38  ;;  %v2070_v28 = vrot.slane %v1637_v27, %v4921_v60  ;;  %v2090_v42 = vrot.slane %v5019_v53, %v4911_v56  ;;  %v2094_v0 = vrot.slane %v5019_v53, %v4921_v60 }
 0x1d7   : > { %3272 = vadd.xlane.f32.xlu1 %v3271_v13  ;;  %v3249_v54 = vadd.f32 %v3248_v47, %v3247_v55  ;;  %v3243_v40 = vsel %vm2943_vm1, %v2820_v35, 0.0  ;;  %v2569_v37 = vsub.f32 %v2066_v22, %v1257_v57  ;;  %v2567_v30 = vsub.f32 %v2066_v22, %v1255_v11  ;;  %v1271_v55 = vld [vmem:[%s4916_s20 + $0x4c0] sm:$0xff]  ;;  %v1273_v47 = vld [vmem:[%s4916_s20 + $0x4d0] sm:$0x3f]  ;;  %v1272_v11 = vld [vmem:[%s4916_s20 + $0x4c8] sm:$0xff] }
 0x1d8   : > { %v3244_v63 = vadd.f32 %v3243_v40, %v2819_v29  ;;  %v2570_v18 = vsub.f32 %v2070_v28, %v1258_v39  ;;  %v2568_v24 = vsub.f32 %v2070_v28, %v1256_v34  ;;  %v2579_v45 = vsub.f32 %v2090_v42, %v1267_v50  ;;  %v1274_v35 = vld [vmem:[%s4916_s20 + $0x4d8] sm:$0x3f]  ;;  %v1281_v39 = vld [vmem:[%s4916_s20 + $0x510] sm:$0x3f] }
 0x1d9   : > { %v5448_v58 = vpop.xlane.xlu0 %2946  ;;  %v2825_v4 = vmul.f32 %v2569_v37, %v2569_v37  ;;  %v2823_v59 = vmul.f32 %v2567_v30, %v2567_v30  ;;  %v2580_v33 = vsub.f32 %v2094_v0, %v1268_v41  ;;  %v2581_v62 = vsub.f32 %v2090_v42, %v1269_v12 }
 0x1da   : > { %3227 = vadd.xlane.f32.xlu0 %v3226_v43  ;;  %v2826_v44 = vmul.f32 %v2570_v18, %v2570_v18  ;;  %v2824_v61 = vmul.f32 %v2568_v24, %v2568_v24  ;;  %v2582_v13 = vsub.f32 %v2094_v0, %v1270_v3  ;;  %v1638_v5 = vcombine.high %v5011_v23, %v5011_v23  ;;  %v1282_v0 = vld [vmem:[%s4916_s20 + $0x518] sm:$0x3f] }
 0x1db   : > { %3232 = vadd.xlane.f32.xlu1 %v3231_v1  ;;  %v3256_v15 = vsel %vm2948_vm15, %v2825_v4, 0.0  ;;  %v2836_v9 = vmul.f32 %v2580_v33, %v2580_v33  ;;  %v2837_v49 = vmul.f32 %v2581_v62, %v2581_v62  ;;  %v5461_v38 = vcombine.high %v5054_v32, %v5054_v32 }
 0x1dc   : > { %v3257_v46 = vsel %vm2950_vm0, %v2826_v44, 0.0  ;;  %v3252_v20 = vsel %vm2943_vm1, %v2824_v61, 0.0  ;;  %v2838_v10 = vmul.f32 %v2582_v13, %v2582_v13  ;;  %v2835_v27 = vmul.f32 %v2579_v45, %v2579_v45 }
 0x1dd   : > { %v3258_v29 = vadd.f32 %v3257_v46, %v3256_v15  ;;  %v3253_v23 = vadd.f32 %v3252_v20, %v2823_v59  ;;  %v3279_v57 = vsel %vm2943_vm1, %v2836_v9, 0.0  ;;  %v2098_v43 = vrot.slane %v1638_v5, %v4911_v56 }
 0x1de   : > { %3250 = vadd.xlane.f32.xlu0 %v3249_v54  ;;  %v2954_v48 = vpop.xlane.xlu0 %2953  ;;  %v3283_v22 = vsel %vm2948_vm15, %v2837_v49, 0.0  ;;  %v3284_v34 = vsel %vm2950_vm0, %v2838_v10, 0.0  ;;  %v2102_v1 = vrot.slane %v1638_v5, %v4921_v60  ;;  %v2114_v28 = vrot.slane %v5031_v17, %v4911_v56  ;;  %v1279_v54 = vld [vmem:[%s4916_s20 + $0x500] sm:$0xff] }
 0x1df   : > { %3245 = vadd.xlane.f32.xlu1 %v3244_v63  ;;  %v3658_v50 = vrot.slane %v2954_v48, %v4687_v14  ;;  %v2583_v41 = vsub.f32 %v2098_v43, %v1271_v55  ;;  %v2585_v42 = vsub.f32 %v2098_v43, %v1273_v47  ;;  %v2118_v12 = vrot.slane %v5031_v17, %v4921_v60  ;;  %v1280_v63 = vld [vmem:[%s4916_s20 + $0x508] sm:$0xff]  ;;  %v1262_v43 = vld [vmem:[%s4916_s20 + $0x478] sm:$0x3f] }
 0x1e0   : > { %v2584_v37 = vsub.f32 %v2102_v1, %v1272_v11  ;;  %v2586_v30 = vsub.f32 %v2102_v1, %v1274_v35  ;;  %v2593_v3 = vsub.f32 %v2114_v28, %v1281_v39  ;;  %v3280_v18 = vadd.f32 %v3279_v57, %v2835_v27  ;;  %v1259_v35 = vld [vmem:[%s4916_s20 + $0x460] sm:$0xff]  ;;  %v1260_v39 = vld [vmem:[%s4916_s20 + $0x468] sm:$0xff] }
 0x1e1   : > { %v3285_v24 = vadd.f32 %v3284_v34, %v3283_v22  ;;  %v2839_v4 = vmul.f32 %v2583_v41, %v2583_v41  ;;  %v2841_v59 = vmul.f32 %v2585_v42, %v2585_v42  ;;  %v2594_v44 = vsub.f32 %v2118_v12, %v1282_v0  ;;  %v1295_v41 = vld [vmem:[%s4916_s20 + $0x580] sm:$0xff] }
 0x1e2   : > { %3259 = vadd.xlane.f32.xlu0 %v3258_v29  ;;  %v5478_v40 = vpop.xlane.xlu1 %2957  ;;  %v2840_v45 = vmul.f32 %v2584_v37, %v2584_v37  ;;  %v2842_v33 = vmul.f32 %v2586_v30, %v2586_v30  ;;  %v2591_v61 = vsub.f32 %v2114_v28, %v1279_v54  ;;  %v2849_v13 = vmul.f32 %v2593_v3, %v2593_v3  ;;  %v1297_v28 = vld [vmem:[%s4916_s20 + $0x590] sm:$0x3f] }
 0x1e3   : > { %3254 = vadd.xlane.f32.xlu1 %v3253_v23  ;;  %v3292_v62 = vsel %vm2948_vm15, %v2841_v59, 0.0  ;;  %v2592_v15 = vsub.f32 %v2118_v12, %v1280_v63  ;;  %v1639_v9 = vcombine.high %v5016_v52, %v5016_v52  ;;  %v3653_v5 = vrot.slane %v5448_v58, %v4674_v7  ;;  %v1261_v52 = vld [vmem:[%s4916_s20 + $0x470] sm:$0x3f] }
 0x1e4   : > { %v3288_v46 = vsel %vm2943_vm1, %v2840_v45, 0.0  ;;  %v3293_v20 = vsel %vm2950_vm0, %v2842_v33, 0.0  ;;  %v2850_v49 = vmul.f32 %v2594_v44, %v2594_v44  ;;  %v5492_v10 = vcombine.high %v5089_v2, %v5089_v2 }
 0x1e5   : > { %v3289_v27 = vadd.f32 %v3288_v46, %v2839_v4  ;;  %v3294_v48 = vadd.f32 %v3293_v20, %v3292_v62  ;;  %v3310_v55 = vsel %vm2948_vm15, %v2849_v13, 0.0  ;;  %v5497_v58 = vsel %vm3659_vm2, %v3658_v50, %v3653_v5  ;;  %v5499_v47 = vpop.xlane.xlu0 %2984  ;;  %v1298_v50 = vld [vmem:[%s4916_s20 + $0x598] sm:$0x3f] }
 0x1e6   : > { %3281 = vadd.xlane.f32.xlu0 %v3280_v18  ;;  %v5501_v29 = vpop.xlane.xlu1 %2962  ;;  %v3311_v23 = vsel %vm2950_vm0, %v2850_v49, 0.0  ;;  %v2847_v57 = vmul.f32 %v2591_v61, %v2591_v61  ;;  %v2848_v11 = vmul.f32 %v2592_v15, %v2592_v15  ;;  %v2074_v34 = vrot.slane %v1639_v9, %v4911_v56  ;;  %v1296_v18 = vld [vmem:[%s4916_s20 + $0x588] sm:$0xff] }
 0x1e7   : > { %3286 = vadd.xlane.f32.xlu1 %v3285_v24  ;;  %v3312_v22 = vadd.f32 %v3311_v23, %v3310_v55  ;;  %v2078_v1 = vrot.slane %v1639_v9, %v4921_v60  ;;  %v2146_v0 = vrot.slane %v5034_v25, %v4911_v56  ;;  %v2150_v54 = vrot.slane %v5034_v25, %v4921_v60 }
 0x1e8   : > { %v3306_v42 = vsel %vm2943_vm1, %v2848_v11, 0.0  ;;  %v1640_v37 = vcombine.high %v5019_v53, %v5019_v53  ;;  %v2573_v12 = vsub.f32 %v2074_v34, %v1261_v52  ;;  %v2571_v63 = vsub.f32 %v2074_v34, %v1259_v35  ;;  %v1276_v35 = vld [vmem:[%s4916_s20 + $0x4e8] sm:$0xff] }
 0x1e9   : > { %v3307_v30 = vadd.f32 %v3306_v42, %v2847_v57  ;;  %v2574_v3 = vsub.f32 %v2078_v1, %v1262_v43  ;;  %v2572_v24 = vsub.f32 %v2078_v1, %v1260_v39  ;;  %v2609_v4 = vsub.f32 %v2146_v0, %v1297_v28  ;;  %v1275_v43 = vld [vmem:[%s4916_s20 + $0x4e0] sm:$0xff]  ;;  %v1277_v39 = vld [vmem:[%s4916_s20 + $0x4f0] sm:$0x3f]  ;;  %v1278_v42 = vld [vmem:[%s4916_s20 + $0x4f8] sm:$0x3f] }
 0x1ea   : > { %3290 = vadd.xlane.f32.xlu0 %v3289_v27  ;;  %v2610_v59 = vsub.f32 %v2150_v54, %v1298_v50  ;;  %v2607_v45 = vsub.f32 %v2146_v0, %v1295_v41  ;;  %v2829_v33 = vmul.f32 %v2573_v12, %v2573_v12  ;;  %v2827_v61 = vmul.f32 %v2571_v63, %v2571_v63  ;;  %v1285_v0 = vld [vmem:[%s4916_s20 + $0x530] sm:$0x3f]  ;;  %v1286_v12 = vld [vmem:[%s4916_s20 + $0x538] sm:$0x3f] }
 0x1eb   : > { %3295 = vadd.xlane.f32.xlu1 %v3294_v48  ;;  %v2830_v44 = vmul.f32 %v2574_v3, %v2574_v3  ;;  %v2828_v15 = vmul.f32 %v2572_v24, %v2572_v24  ;;  %v2865_v9 = vmul.f32 %v2609_v4, %v2609_v4  ;;  %v2608_v5 = vsub.f32 %v2150_v54, %v1296_v18 }
 0x1ec   : > { %v2866_v53 = vmul.f32 %v2610_v59, %v2610_v59  ;;  %v3664_v46 = vrot.slane %v5478_v40, %v4674_v7  ;;  %v3668_v20 = vrot.slane %v5501_v29, %v4687_v14  ;;  %v3265_v49 = vsel %vm2948_vm15, %v2829_v33, 0.0 }
 0x1ed   : > { %v3266_v27 = vsel %vm2950_vm0, %v2830_v44, 0.0  ;;  %v3261_v55 = vsel %vm2943_vm1, %v2828_v15, 0.0  ;;  %v3346_v52 = vsel %vm2948_vm15, %v2865_v9, 0.0  ;;  %v2863_v29 = vmul.f32 %v2607_v45, %v2607_v45  ;;  %v1283_v44 = vld [vmem:[%s4916_s20 + $0x520] sm:$0xff] }
 0x1ee   : > { %3313 = vadd.xlane.f32.xlu0 %v3312_v22  ;;  %v3267_v48 = vadd.f32 %v3266_v27, %v3265_v49  ;;  %v3347_v23 = vsel %vm2950_vm0, %v2866_v53, 0.0  ;;  %v3262_v11 = vadd.f32 %v3261_v55, %v2827_v61  ;;  %v3691_v22 = vrot.slane %v5499_v47, %v4674_v7  ;;  %v1284_v27 = vld [vmem:[%s4916_s20 + $0x528] sm:$0xff] }
 0x1ef   : > { %3308 = vadd.xlane.f32.xlu1 %v3307_v30  ;;  %v2967_v62 = vpop.xlane.xlu0 %2966  ;;  %v2864_v28 = vmul.f32 %v2608_v5, %v2608_v5  ;;  %v2106_v50 = vrot.slane %v1640_v37, %v4911_v56  ;;  %v2110_v41 = vrot.slane %v1640_v37, %v4921_v60  ;;  %v3669_v54 = vsel %vm3659_vm2, %v3668_v20, %v3664_v46 }
 0x1f0   : > { %v2972_v13 = vpop.xlane.xlu1 %2971  ;;  %v3673_v57 = vrot.slane %v2967_v62, %v4674_v7  ;;  %v3348_v30 = vadd.f32 %v3347_v23, %v3346_v52  ;;  %v2122_v3 = vrot.slane %v5043_v51, %v4911_v56  ;;  %v2126_v47 = vrot.slane %v5043_v51, %v4921_v60 }
 0x1f1   : > { %v3677_v40 = vrot.slane %v2972_v13, %v4687_v14  ;;  %v3342_v63 = vsel %vm2943_vm1, %v2864_v28, 0.0  ;;  %v2587_v18 = vsub.f32 %v2106_v50, %v1275_v43  ;;  %v2588_v24 = vsub.f32 %v2110_v41, %v1276_v35 }
 0x1f2   : > { %3268 = vadd.xlane.f32.xlu0 %v3267_v48  ;;  %v2589_v4 = vsub.f32 %v2106_v50, %v1277_v39  ;;  %v3343_v59 = vadd.f32 %v3342_v63, %v2863_v29  ;;  %v2590_v45 = vsub.f32 %v2110_v41, %v1278_v42  ;;  %v2597_v33 = vsub.f32 %v2122_v3, %v1285_v0  ;;  %v1300_v42 = vld [vmem:[%s4916_s20 + $0x5a8] sm:$0xff] }
 0x1f3   : > { %v2994_v34 = vpop.xlane.xlu0 %2993  ;;  %3263 = vadd.xlane.f32.xlu1 %v3262_v11  ;;  %v3678_v37 = vsel %vm3659_vm2, %v3677_v40, %v3673_v57  ;;  %v2843_v13 = vmul.f32 %v2587_v18, %v2587_v18  ;;  %v2844_v15 = vmul.f32 %v2588_v24, %v2588_v24  ;;  %v2598_v53 = vsub.f32 %v2126_v47, %v1286_v12  ;;  %v1287_v24 = vld [vmem:[%s4916_s20 + $0x540] sm:$0xff] }
 0x1f4   : > { %v2999_v1 = vpop.xlane.xlu1 %2998  ;;  %v2845_v9 = vmul.f32 %v2589_v4, %v2589_v4  ;;  %v3700_v5 = vrot.slane %v2994_v34, %v4674_v7  ;;  %v2846_v20 = vmul.f32 %v2590_v45, %v2590_v45  ;;  %v2853_v49 = vmul.f32 %v2597_v33, %v2597_v33  ;;  %v1288_v4 = vld [vmem:[%s4916_s20 + $0x548] sm:$0xff] }
 0x1f5   : > { %v3704_v46 = vrot.slane %v2999_v1, %v4687_v14  ;;  %v3297_v48 = vsel %vm2943_vm1, %v2844_v15, 0.0  ;;  %v2854_v52 = vmul.f32 %v2598_v53, %v2598_v53  ;;  %v2595_v23 = vsub.f32 %v2122_v3, %v1283_v44  ;;  %v1301_v15 = vld [vmem:[%s4916_s20 + $0x5b0] sm:$0x3f] }
 0x1f6   : > { %3349 = vadd.xlane.f32.xlu0 %v3348_v30  ;;  %v3301_v55 = vsel %vm2948_vm15, %v2845_v9, 0.0  ;;  %v3695_v57 = vrot.slane %v5453_v6, %v4687_v14  ;;  %v4229_v40 = vsel %vm4228_vm3, %v3669_v54, %v5497_v58  ;;  %v3298_v11 = vadd.f32 %v3297_v48, %v2843_v13  ;;  %v1290_v30 = vld [vmem:[%s4916_s20 + $0x558] sm:$0x3f] }
 0x1f7   : > { %v5549_v61 = vpop.xlane.xlu0 %3002  ;;  %3344 = vadd.xlane.f32.xlu1 %v3343_v59  ;;  %v3302_v29 = vsel %vm2950_vm0, %v2846_v20, 0.0  ;;  %v3319_v34 = vsel %vm2948_vm15, %v2853_v49, 0.0  ;;  %v3320_v1 = vsel %vm2950_vm0, %v2854_v52, 0.0  ;;  %v2596_v28 = vsub.f32 %v2126_v47, %v1284_v27 }
 0x1f8   : > { %v5551_v62 = vpop.xlane.xlu1 %3007  ;;  %v3303_v43 = vadd.f32 %v3302_v29, %v3301_v55  ;;  %v5566_v50 = vsel %vm3659_vm2, %v3695_v57, %v3691_v22  ;;  %v5569_v6 = vsel %vm4230_vm4, %v3678_v37, %v4229_v40  ;;  %v2851_v58 = vmul.f32 %v2595_v23, %v2595_v23  ;;  %v1289_v22 = vld [vmem:[%s4916_s20 + $0x550] sm:$0x3f]  ;;  %v1299_v37 = vld [vmem:[%s4916_s20 + $0x5a0] sm:$0xff] }
 0x1f9   : > { %v1687_v41 = vcombine.high %v5031_v17, %v5031_v17  ;;  %v5575_v0 = vsel %vm3659_vm2, %v3704_v46, %v3700_v5  ;;  %v2852_v54 = vmul.f32 %v2596_v28, %v2596_v28  ;;  %v2154_v12 = vrot.slane %v5046_v21, %v4911_v56  ;;  %v1303_v28 = vld [vmem:[%s4916_s20 + $0x5c0] sm:$0xff] }
 0x1fa   : > { %3299 = vadd.xlane.f32.xlu0 %v3298_v11  ;;  %v2158_v3 = vrot.slane %v5046_v21, %v4921_v60  ;;  %v3709_v17 = vrot.slane %v5549_v61, %v4674_v7  ;;  %v3321_v47 = vadd.f32 %v3320_v1, %v3319_v34  ;;  %v3713_v59 = vrot.slane %v5551_v62, %v4687_v14  ;;  %v1302_v61 = vld [vmem:[%s4916_s20 + $0x5b8] sm:$0x3f] }
 0x1fb   : > { %v2976_v39 = vpop.xlane.xlu0 %2975  ;;  %3304 = vadd.xlane.f32.xlu1 %v3303_v43  ;;  %v2130_v63 = vrot.slane %v1687_v41, %v4911_v56  ;;  %v2134_v18 = vrot.slane %v1687_v41, %v4921_v60  ;;  %v3315_v45 = vsel %vm2943_vm1, %v2852_v54, 0.0  ;;  %v1688_v9 = vcombine.high %v5034_v25, %v5034_v25 }
 0x1fc   : > { %v2981_v35 = vpop.xlane.xlu1 %2980  ;;  %v2612_v13 = vsub.f32 %v2158_v3, %v1300_v42  ;;  %v3682_v5 = vrot.slane %v2976_v39, %v4674_v7  ;;  %v3316_v46 = vadd.f32 %v3315_v45, %v2851_v58  ;;  %v2611_v48 = vsub.f32 %v2154_v12, %v1299_v37  ;;  %v1305_v58 = vld [vmem:[%s4916_s20 + $0x5d0] sm:$0x3f] }
 0x1fd   : > { %v3686_v53 = vrot.slane %v2981_v35, %v4687_v14  ;;  %v2601_v20 = vsub.f32 %v2130_v63, %v1289_v22  ;;  %v2602_v62 = vsub.f32 %v2134_v18, %v1290_v30  ;;  %v2599_v49 = vsub.f32 %v2130_v63, %v1287_v24  ;;  %v1304_v63 = vld [vmem:[%s4916_s20 + $0x5c8] sm:$0xff] }
 0x1fe   : > { %3322 = vadd.xlane.f32.xlu0 %v3321_v47  ;;  %v2600_v27 = vsub.f32 %v2134_v18, %v1288_v4  ;;  %v2868_v52 = vmul.f32 %v2612_v13, %v2612_v13  ;;  %v2613_v23 = vsub.f32 %v2154_v12, %v1301_v15  ;;  %v2614_v57 = vsub.f32 %v2158_v3, %v1302_v61  ;;  %v1306_v18 = vld [vmem:[%s4916_s20 + $0x5d8] sm:$0x3f]  ;;  %v1313_v15 = vld [vmem:[%s4916_s20 + $0x610] sm:$0x3f] }
 0x1ff   : > { %v5595_v44 = vpop.xlane.xlu0 %3011  ;;  %3317 = vadd.xlane.f32.xlu1 %v3316_v46  ;;  %v2857_v55 = vmul.f32 %v2601_v20, %v2601_v20  ;;  %v2858_v40 = vmul.f32 %v2602_v62, %v2602_v62  ;;  %v2855_v25 = vmul.f32 %v2599_v49, %v2599_v49  ;;  %v2162_v35 = vrot.slane %v1688_v9, %v4911_v56  ;;  %v1314_v61 = vld [vmem:[%s4916_s20 + $0x618] sm:$0x3f]  ;;  %v1311_v62 = vld [vmem:[%s4916_s20 + $0x600] sm:$0xff] }
 0x200   : > { %v5593_v33 = vpop.xlane.xlu1 %3016  ;;  %v2856_v11 = vmul.f32 %v2600_v27, %v2600_v27  ;;  %v5609_v39 = vsel %vm3659_vm2, %v3713_v59, %v3709_v17  ;;  %v3687_v34 = vsel %vm3659_vm2, %v3686_v53, %v3682_v5  ;;  %v2178_v41 = vrot.slane %v5054_v32, %v4911_v56 }
 0x201   : > { %v3328_v1 = vsel %vm2948_vm15, %v2857_v55, 0.0  ;;  %v3329_v42 = vsel %vm2950_vm0, %v2858_v40, 0.0  ;;  %v2867_v22 = vmul.f32 %v2611_v48, %v2611_v48  ;;  %v2869_v30 = vmul.f32 %v2613_v23, %v2613_v23 }
 0x202   : > { %v3324_v54 = vsel %vm2943_vm1, %v2856_v11, 0.0  ;;  %v3330_v12 = vadd.f32 %v3329_v42, %v3328_v1  ;;  %v3351_v17 = vsel %vm2943_vm1, %v2868_v52, 0.0  ;;  %v2870_v47 = vmul.f32 %v2614_v57, %v2614_v57 }
 0x203   : > { %v5605_v43 = vpop.xlane.xlu0 %3020  ;;  %v3325_v3 = vadd.f32 %v3324_v54, %v2855_v25  ;;  %v3355_v24 = vsel %vm2948_vm15, %v2869_v30, 0.0  ;;  %v2166_v59 = vrot.slane %v1688_v9, %v4921_v60  ;;  %v2615_v45 = vsub.f32 %v2162_v35, %v1303_v28  ;;  %v1312_v9 = vld [vmem:[%s4916_s20 + $0x608] sm:$0xff] }
 0x204   : > { %v5603_v29 = vpop.xlane.xlu1 %3025  ;;  %v2617_v13 = vsub.f32 %v2162_v35, %v1305_v58  ;;  %v5632_v53 = vsel %vm4232_vm5, %v3687_v34, %v5569_v6  ;;  %3331 = vadd.xlane.f32.xlu0 %v3330_v12  ;;  %v3356_v46 = vsel %vm2950_vm0, %v2870_v47, 0.0  ;;  %v2182_v20 = vrot.slane %v5054_v32, %v4921_v60 }
 0x205   : > { %3326 = vadd.xlane.f32.xlu1 %v3325_v3  ;;  %v3352_v49 = vadd.f32 %v3351_v17, %v2867_v22  ;;  %v3357_v27 = vadd.f32 %v3356_v46, %v3355_v24  ;;  %v2616_v48 = vsub.f32 %v2166_v59, %v1304_v63  ;;  %v2618_v55 = vsub.f32 %v2166_v59, %v1306_v18  ;;  %v1294_v46 = vld [vmem:[%s4916_s20 + $0x578] sm:$0x3f] }
 0x206   : > { %v2871_v52 = vmul.f32 %v2615_v45, %v2615_v45  ;;  %v2873_v23 = vmul.f32 %v2617_v13, %v2617_v13  ;;  %v2625_v6 = vsub.f32 %v2178_v41, %v1313_v15  ;;  %v2626_v57 = vsub.f32 %v2182_v20, %v1314_v61  ;;  %v1293_v61 = vld [vmem:[%s4916_s20 + $0x570] sm:$0x3f] }
 0x207   : > { %v5625_v37 = vpop.xlane.xlu0 %3056  ;;  %v2872_v40 = vmul.f32 %v2616_v48, %v2616_v48  ;;  %v2874_v25 = vmul.f32 %v2618_v55, %v2618_v55  ;;  %v2623_v34 = vsub.f32 %v2178_v41, %v1311_v62  ;;  %v2624_v1 = vsub.f32 %v2182_v20, %v1312_v9  ;;  %v1291_v20 = vld [vmem:[%s4916_s20 + $0x560] sm:$0xff] }
 0x208   : > { %v5623_v4 = vpop.xlane.xlu1 %3061  ;;  %v3731_v28 = vrot.slane %v5603_v29, %v4687_v14  ;;  %v3727_v32 = vrot.slane %v5605_v43, %v4674_v7  ;;  %3353 = vadd.xlane.f32.xlu0 %v3352_v49  ;;  %v3364_v58 = vsel %vm2948_vm15, %v2873_v23, 0.0  ;;  %v2881_v42 = vmul.f32 %v2625_v6, %v2625_v6  ;;  %v1292_v49 = vld [vmem:[%s4916_s20 + $0x568] sm:$0xff] }
 0x209   : > { %3358 = vadd.xlane.f32.xlu1 %v3357_v27  ;;  %v3360_v54 = vsel %vm2943_vm1, %v2872_v40, 0.0  ;;  %v3365_v22 = vsel %vm2950_vm0, %v2874_v25, 0.0  ;;  %v2882_v12 = vmul.f32 %v2626_v57, %v2626_v57  ;;  %v2879_v43 = vmul.f32 %v2623_v34, %v2623_v34  ;;  %v1330_v34 = vld [vmem:[%s4916_s20 + $0x698] sm:$0x3f] }
 0x20a   : > { %v3361_v41 = vadd.f32 %v3360_v54, %v2871_v52  ;;  %v3366_v3 = vadd.f32 %v3365_v22, %v3364_v58  ;;  %v3382_v17 = vsel %vm2948_vm15, %v2881_v42, 0.0  ;;  %v2880_v63 = vmul.f32 %v2624_v1, %v2624_v1  ;;  %v1329_v52 = vld [vmem:[%s4916_s20 + $0x690] sm:$0x3f]  ;;  %v1327_v1 = vld [vmem:[%s4916_s20 + $0x680] sm:$0xff]  ;;  %v1328_v58 = vld [vmem:[%s4916_s20 + $0x688] sm:$0xff] }
 0x20b   : > { %v3030_v35 = vpop.xlane.xlu0 %3029  ;;  %v3383_v47 = vsel %vm2950_vm0, %v2882_v12, 0.0  ;;  %v1689_v59 = vcombine.high %v5043_v51, %v5043_v51  ;;  %v3718_v45 = vrot.slane %v5595_v44, %v4674_v7  ;;  %v3732_v13 = vsel %vm3659_vm2, %v3731_v28, %v3727_v32 }
 0x20c   : > { %v3035_v11 = vpop.xlane.xlu1 %3034  ;;  %v3736_v29 = vrot.slane %v3030_v35, %v4674_v7  ;;  %v3767_v15 = vrot.slane %v5623_v4, %v4687_v14  ;;  %3362 = vadd.xlane.f32.xlu0 %v3361_v41  ;;  %v3378_v62 = vsel %vm2943_vm1, %v2880_v63, 0.0  ;;  %v2210_v27 = vrot.slane %v5057_v16, %v4911_v56 }
 0x20d   : > { %v3740_v30 = vrot.slane %v3035_v11, %v4687_v14  ;;  %3367 = vadd.xlane.f32.xlu1 %v3366_v3  ;;  %v2138_v9 = vrot.slane %v1689_v59, %v4911_v56  ;;  %v2142_v51 = vrot.slane %v1689_v59, %v4921_v60  ;;  %v3763_v4 = vrot.slane %v5625_v37, %v4674_v7 }
 0x20e   : > { %v3384_v48 = vadd.f32 %v3383_v47, %v3382_v17  ;;  %v3379_v55 = vadd.f32 %v3378_v62, %v2879_v43  ;;  %v2214_v23 = vrot.slane %v5057_v16, %v4921_v60  ;;  %v2639_v3 = vsub.f32 %v2210_v27, %v1327_v1 }
 0x20f   : > { %v5654_v24 = vpop.xlane.xlu0 %3038  ;;  %v3741_v6 = vsel %vm3659_vm2, %v3740_v30, %v3736_v29  ;;  %v2605_v57 = vsub.f32 %v2138_v9, %v1293_v61  ;;  %v2606_v40 = vsub.f32 %v2142_v51, %v1294_v46  ;;  %v2603_v25 = vsub.f32 %v2138_v9, %v1291_v20 }
 0x210   : > { %v5652_v18 = vpop.xlane.xlu1 %3043  ;;  %3385 = vadd.xlane.f32.xlu0 %v3384_v48  ;;  %v3745_v28 = vrot.slane %v5654_v24, %v4674_v7  ;;  %v2604_v32 = vsub.f32 %v2142_v51, %v1292_v49  ;;  %v2641_v30 = vsub.f32 %v2210_v27, %v1329_v52  ;;  %v2642_v41 = vsub.f32 %v2214_v23, %v1330_v34  ;;  %v1307_v49 = vld [vmem:[%s4916_s20 + $0x5e0] sm:$0xff]  ;;  %v1308_v27 = vld [vmem:[%s4916_s20 + $0x5e8] sm:$0xff]  ;;  %v1309_v52 = vld [vmem:[%s4916_s20 + $0x5f0] sm:$0x3f] }
 0x211   : > { %3380 = vadd.xlane.f32.xlu1 %v3379_v55  ;;  %v3749_v37 = vrot.slane %v5652_v18, %v4687_v14  ;;  %v2861_v42 = vmul.f32 %v2605_v57, %v2605_v57  ;;  %v2862_v54 = vmul.f32 %v2606_v40, %v2606_v40  ;;  %v2859_v22 = vmul.f32 %v2603_v25, %v2603_v25 }
 0x212   : > { %v2860_v12 = vmul.f32 %v2604_v32, %v2604_v32  ;;  %v1690_v29 = vcombine.high %v5046_v21, %v5046_v21  ;;  %v2897_v47 = vmul.f32 %v2641_v30, %v2641_v30  ;;  %v2640_v63 = vsub.f32 %v2214_v23, %v1328_v58  ;;  %v1310_v23 = vld [vmem:[%s4916_s20 + $0x5f8] sm:$0x3f] }
 0x213   : > { %v5680_v35 = vpop.xlane.xlu0 %3065  ;;  %v3337_v43 = vsel %vm2948_vm15, %v2861_v42, 0.0  ;;  %v3338_v17 = vsel %vm2950_vm0, %v2862_v54, 0.0  ;;  %v5698_v59 = vsel %vm3659_vm2, %v3767_v15, %v3763_v4  ;;  %v2898_v21 = vmul.f32 %v2642_v41, %v2642_v41  ;;  %v1315_v54 = vld [vmem:[%s4916_s20 + $0x620] sm:$0xff] }
 0x214   : > { %v5678_v11 = vpop.xlane.xlu1 %3070  ;;  %v3339_v61 = vadd.f32 %v3338_v17, %v3337_v43  ;;  %v3333_v46 = vsel %vm2943_vm1, %v2860_v12, 0.0  ;;  %v3418_v62 = vsel %vm2948_vm15, %v2897_v47, 0.0  ;;  %v2895_v9 = vmul.f32 %v2639_v3, %v2639_v3  ;;  %v1316_v47 = vld [vmem:[%s4916_s20 + $0x628] sm:$0xff] }
 0x215   : > { %v3334_v20 = vadd.f32 %v3333_v46, %v2859_v22  ;;  %v2896_v51 = vmul.f32 %v2640_v63, %v2640_v63  ;;  %v4242_v48 = vsel %vm4228_vm3, %v3741_v6, %v3732_v13  ;;  %v3419_v15 = vsel %vm2950_vm0, %v2898_v21, 0.0  ;;  %v1317_v13 = vld [vmem:[%s4916_s20 + $0x630] sm:$0x3f]  ;;  %v1318_v6 = vld [vmem:[%s4916_s20 + $0x638] sm:$0x3f] }
 0x216   : > { %3340 = vadd.xlane.f32.xlu0 %v3339_v61  ;;  %v2170_v4 = vrot.slane %v1690_v29, %v4911_v56  ;;  %v2174_v55 = vrot.slane %v1690_v29, %v4921_v60  ;;  %v3750_v57 = vsel %vm3659_vm2, %v3749_v37, %v3745_v28  ;;  %v2186_v1 = vrot.slane %v5060_v8, %v4911_v56 }
 0x217   : > { %v5695_v24 = vpop.xlane.xlu0 %3074  ;;  %3335 = vadd.xlane.f32.xlu1 %v3334_v20  ;;  %v3414_v40 = vsel %vm2943_vm1, %v2896_v51, 0.0  ;;  %v2190_v32 = vrot.slane %v5060_v8, %v4921_v60  ;;  %v3776_v58 = vrot.slane %v5678_v11, %v4687_v14  ;;  %v3420_v37 = vadd.f32 %v3419_v15, %v3418_v62 }
 0x218   : > { %v5693_v18 = vpop.xlane.xlu1 %3079  ;;  %v2619_v28 = vsub.f32 %v2170_v4, %v1307_v49  ;;  %v2620_v42 = vsub.f32 %v2174_v55, %v1308_v27  ;;  %v3772_v22 = vrot.slane %v5680_v35, %v4674_v7  ;;  %v3415_v30 = vadd.f32 %v3414_v40, %v2895_v9 }
 0x219   : > { %v2621_v12 = vsub.f32 %v2170_v4, %v1309_v52  ;;  %v2622_v41 = vsub.f32 %v2174_v55, %v1310_v23  ;;  %v2629_v43 = vsub.f32 %v2186_v1, %v1317_v13  ;;  %v2630_v17 = vsub.f32 %v2190_v32, %v1318_v6 }
 0x21a   : > { %3421 = vadd.xlane.f32.xlu0 %v3420_v37  ;;  %v2875_v3 = vmul.f32 %v2619_v28, %v2619_v28  ;;  %v2876_v29 = vmul.f32 %v2620_v42, %v2620_v42  ;;  %v3785_v11 = vrot.slane %v5693_v18, %v4687_v14  ;;  %v2627_v46 = vsub.f32 %v2186_v1, %v1315_v54  ;;  %v1321_v1 = vld [vmem:[%s4916_s20 + $0x650] sm:$0x3f]  ;;  %v1319_v37 = vld [vmem:[%s4916_s20 + $0x640] sm:$0xff]  ;;  %v1320_v54 = vld [vmem:[%s4916_s20 + $0x648] sm:$0xff] }
 0x21b   : > { %v5714_v34 = vpop.xlane.xlu0 %3047  ;;  %3416 = vadd.xlane.f32.xlu1 %v3415_v30  ;;  %v2877_v63 = vmul.f32 %v2621_v12, %v2621_v12  ;;  %v2878_v61 = vmul.f32 %v2622_v41, %v2622_v41  ;;  %v3781_v35 = vrot.slane %v5695_v24, %v4674_v7  ;;  %v2885_v9 = vmul.f32 %v2629_v43, %v2629_v43  ;;  %v1331_v30 = vld [vmem:[%s4916_s20 + $0x6a0] sm:$0xff]  ;;  %v1332_v12 = vld [vmem:[%s4916_s20 + $0x6a8] sm:$0xff] }
 0x21c   : > { %v5712_v25 = vpop.xlane.xlu1 %3052  ;;  %v3369_v62 = vsel %vm2943_vm1, %v2876_v29, 0.0  ;;  %v2886_v51 = vmul.f32 %v2630_v17, %v2630_v17  ;;  %v2628_v15 = vsub.f32 %v2190_v32, %v1316_v47  ;;  %v2883_v23 = vmul.f32 %v2627_v46, %v2627_v46  ;;  %v1322_v32 = vld [vmem:[%s4916_s20 + $0x658] sm:$0x3f]  ;;  %v1333_v29 = vld [vmem:[%s4916_s20 + $0x6b0] sm:$0x3f] }
 0x21d   : > { %v3370_v49 = vadd.f32 %v3369_v62, %v2875_v3  ;;  %v3373_v18 = vsel %vm2948_vm15, %v2877_v63, 0.0  ;;  %v3374_v27 = vsel %vm2950_vm0, %v2878_v61, 0.0  ;;  %v3391_v55 = vsel %vm2948_vm15, %v2885_v9, 0.0  ;;  %v1334_v63 = vld [vmem:[%s4916_s20 + $0x6b8] sm:$0x3f] }
 0x21e   : > { %v3375_v4 = vadd.f32 %v3374_v27, %v3373_v18  ;;  %v3392_v52 = vsel %vm2950_vm0, %v2886_v51, 0.0  ;;  %v4243_v24 = vsel %vm4230_vm4, %v3750_v57, %v4242_v48  ;;  %v3758_v40 = vrot.slane %v5712_v25, %v4687_v14 }
 0x21f   : > { %v5732_v20 = vpop.xlane.xlu0 %3083  ;;  %3371 = vadd.xlane.f32.xlu0 %v3370_v49  ;;  %v3754_v13 = vrot.slane %v5714_v34, %v4674_v7  ;;  %v2884_v6 = vmul.f32 %v2628_v15, %v2628_v15  ;;  %v5754_v48 = vsel %vm3659_vm2, %v3776_v58, %v3772_v22  ;;  %v5757_v57 = vsel %vm3659_vm2, %v3785_v11, %v3781_v35 }
 0x220   : > { %v5730_v21 = vpop.xlane.xlu1 %3088  ;;  %3376 = vadd.xlane.f32.xlu1 %v3375_v4  ;;  %v2194_v25 = vrot.slane %v5461_v38, %v4911_v56  ;;  %v2198_v34 = vrot.slane %v5461_v38, %v4921_v60  ;;  %v3393_v41 = vadd.f32 %v3392_v52, %v3391_v55  ;;  %v2218_v58 = vrot.slane %v5064_v26, %v4911_v56 }
 0x221   : > { %v3387_v3 = vsel %vm2943_vm1, %v2884_v6, 0.0  ;;  %v2222_v22 = vrot.slane %v5064_v26, %v4921_v60  ;;  %v3759_v38 = vsel %vm3659_vm2, %v3758_v40, %v3754_v13  ;;  %v1738_v52 = vcombine.high %v5057_v16, %v5057_v16 }
 0x222   : > { %v3388_v43 = vadd.f32 %v3387_v3, %v2883_v23  ;;  %v2633_v17 = vsub.f32 %v2194_v25, %v1321_v1  ;;  %v2634_v47 = vsub.f32 %v2198_v34, %v1322_v32  ;;  %v2631_v11 = vsub.f32 %v2194_v25, %v1319_v37 }
 0x223   : > { %v5751_v42 = vpop.xlane.xlu0 %3092  ;;  %3394 = vadd.xlane.f32.xlu0 %v3393_v41  ;;  %v2632_v61 = vsub.f32 %v2198_v34, %v1320_v54  ;;  %v2643_v46 = vsub.f32 %v2218_v58, %v1331_v30  ;;  %v2644_v35 = vsub.f32 %v2222_v22, %v1332_v12  ;;  %v2645_v27 = vsub.f32 %v2218_v58, %v1333_v29  ;;  %v1335_v34 = vld [vmem:[%s4916_s20 + $0x6c0] sm:$0xff]  ;;  %v1336_v58 = vld [vmem:[%s4916_s20 + $0x6c8] sm:$0xff]  ;;  %v1338_v29 = vld [vmem:[%s4916_s20 + $0x6d8] sm:$0x3f] }
 0x224   : > { %v5749_v28 = vpop.xlane.xlu1 %3097  ;;  %3389 = vadd.xlane.f32.xlu1 %v3388_v43  ;;  %v2889_v51 = vmul.f32 %v2633_v17, %v2633_v17  ;;  %v2890_v49 = vmul.f32 %v2634_v47, %v2634_v47  ;;  %v2887_v18 = vmul.f32 %v2631_v11, %v2631_v11  ;;  %v2646_v55 = vsub.f32 %v2222_v22, %v1334_v63  ;;  %v1337_v22 = vld [vmem:[%s4916_s20 + $0x6d0] sm:$0x3f]  ;;  %v1343_v63 = vld [vmem:[%s4916_s20 + $0x700] sm:$0xff] }
 0x225   : > { %v2888_v15 = vmul.f32 %v2632_v61, %v2632_v61  ;;  %v2900_v4 = vmul.f32 %v2644_v35, %v2644_v35  ;;  %v2899_v13 = vmul.f32 %v2643_v46, %v2643_v46  ;;  %v2901_v6 = vmul.f32 %v2645_v27, %v2645_v27  ;;  %v1345_v11 = vld [vmem:[%s4916_s20 + $0x710] sm:$0x3f]  ;;  %v1344_v27 = vld [vmem:[%s4916_s20 + $0x708] sm:$0xff] }
 0x226   : > { %v3400_v23 = vsel %vm2948_vm15, %v2889_v51, 0.0  ;;  %v3401_v40 = vsel %vm2950_vm0, %v2890_v49, 0.0  ;;  %v2902_v25 = vmul.f32 %v2646_v55, %v2646_v55  ;;  %v5790_v30 = vsel %vm4232_vm5, %v3759_v38, %v4243_v24 }
 0x227   : > { %v5776_v9 = vpop.xlane.xlu0 %3128  ;;  %v3402_v1 = vadd.f32 %v3401_v40, %v3400_v23  ;;  %v3396_v32 = vsel %vm2943_vm1, %v2888_v15, 0.0  ;;  %v3423_v37 = vsel %vm2943_vm1, %v2900_v4, 0.0  ;;  %v3803_v41 = vrot.slane %v5749_v28, %v4687_v14 }
 0x228   : > { %v5774_v62 = vpop.xlane.xlu1 %3133  ;;  %v3397_v12 = vadd.f32 %v3396_v32, %v2887_v18  ;;  %v3799_v3 = vrot.slane %v5751_v42, %v4674_v7  ;;  %v3427_v43 = vsel %vm2948_vm15, %v2901_v6, 0.0  ;;  %v3428_v17 = vsel %vm2950_vm0, %v2902_v25, 0.0  ;;  %v1346_v18 = vld [vmem:[%s4916_s20 + $0x718] sm:$0x3f] }
 0x229   : > { %3403 = vadd.xlane.f32.xlu0 %v3402_v1  ;;  %v2226_v24 = vrot.slane %v1738_v52, %v4911_v56  ;;  %v2230_v47 = vrot.slane %v1738_v52, %v4921_v60  ;;  %v3424_v28 = vadd.f32 %v3423_v37, %v2899_v13  ;;  %v3839_v42 = vrot.slane %v5774_v62, %v4687_v14 }
 0x22a   : > { %3398 = vadd.xlane.f32.xlu1 %v3397_v12  ;;  %v3835_v38 = vrot.slane %v5776_v9, %v4674_v7  ;;  %v2242_v61 = vrot.slane %v5089_v2, %v4911_v56  ;;  %v3429_v55 = vadd.f32 %v3428_v17, %v3427_v43  ;;  %v2246_v62 = vrot.slane %v5089_v2, %v4921_v60 }
 0x22b   : > { %v5787_v16 = vpop.xlane.xlu0 %3101  ;;  %v2647_v46 = vsub.f32 %v2226_v24, %v1335_v34  ;;  %v2648_v35 = vsub.f32 %v2230_v47, %v1336_v58  ;;  %v2649_v51 = vsub.f32 %v2226_v24, %v1337_v22  ;;  %v2650_v49 = vsub.f32 %v2230_v47, %v1338_v29 }
 0x22c   : > { %v5785_v54 = vpop.xlane.xlu1 %3106  ;;  %v2657_v52 = vsub.f32 %v2242_v61, %v1345_v11  ;;  %v2655_v23 = vsub.f32 %v2242_v61, %v1343_v63  ;;  %v2658_v32 = vsub.f32 %v2246_v62, %v1346_v18  ;;  %v2656_v25 = vsub.f32 %v2246_v62, %v1344_v27  ;;  %v1324_v62 = vld [vmem:[%s4916_s20 + $0x668] sm:$0xff] }
 0x22d   : > { %3425 = vadd.xlane.f32.xlu0 %v3424_v28  ;;  %v2903_v9 = vmul.f32 %v2647_v46, %v2647_v46  ;;  %v2904_v40 = vmul.f32 %v2648_v35, %v2648_v35  ;;  %v2905_v13 = vmul.f32 %v2649_v51, %v2649_v51  ;;  %v2906_v6 = vmul.f32 %v2650_v49, %v2650_v49  ;;  %v1325_v35 = vld [vmem:[%s4916_s20 + $0x670] sm:$0x3f]  ;;  %v1323_v51 = vld [vmem:[%s4916_s20 + $0x660] sm:$0xff] }
 0x22e   : > { %3430 = vadd.xlane.f32.xlu1 %v3429_v55  ;;  %v3812_v1 = vrot.slane %v5785_v54, %v4687_v14  ;;  %v2913_v37 = vmul.f32 %v2657_v52, %v2657_v52  ;;  %v3808_v58 = vrot.slane %v5787_v16, %v4674_v7  ;;  %v2914_v17 = vmul.f32 %v2658_v32, %v2658_v32  ;;  %v1361_v49 = vld [vmem:[%s4916_s20 + $0x790] sm:$0x3f]  ;;  %v1359_v52 = vld [vmem:[%s4916_s20 + $0x780] sm:$0xff] }
 0x22f   : > { %v5815_v4 = vpop.xlane.xlu0 %3110  ;;  %v3432_v34 = vsel %vm2943_vm1, %v2904_v40, 0.0  ;;  %v3436_v12 = vsel %vm2948_vm15, %v2905_v13, 0.0  ;;  %v3437_v2 = vsel %vm2950_vm0, %v2906_v6, 0.0  ;;  %v2911_v24 = vmul.f32 %v2655_v23, %v2655_v23  ;;  %v1362_v6 = vld [vmem:[%s4916_s20 + $0x798] sm:$0x3f] }
 0x230   : > { %v5813_v15 = vpop.xlane.xlu1 %3115  ;;  %v3433_v54 = vadd.f32 %v3432_v34, %v2903_v9  ;;  %v3438_v43 = vadd.f32 %v3437_v2, %v3436_v12  ;;  %v3454_v11 = vsel %vm2948_vm15, %v2913_v37, 0.0  ;;  %v2912_v63 = vmul.f32 %v2656_v25, %v2656_v25  ;;  %v1360_v34 = vld [vmem:[%s4916_s20 + $0x788] sm:$0xff] }
 0x231   : > { %v1739_v16 = vcombine.high %v5060_v8, %v5060_v8  ;;  %v3804_v61 = vsel %vm3659_vm2, %v3803_v41, %v3799_v3  ;;  %v3455_v46 = vsel %vm2950_vm0, %v2914_v17, 0.0  ;;  %v2274_v18 = vrot.slane %v5092_v19, %v4911_v56  ;;  %v1326_v41 = vld [vmem:[%s4916_s20 + $0x678] sm:$0x3f] }
 0x232   : > { %3434 = vadd.xlane.f32.xlu0 %v3433_v54  ;;  %3439 = vadd.xlane.f32.xlu1 %v3438_v43  ;;  %v5845_v27 = vsel %vm3659_vm2, %v3839_v42, %v3835_v38  ;;  %v3813_v8 = vsel %vm3659_vm2, %v3812_v1, %v3808_v58  ;;  %v3450_v55 = vsel %vm2943_vm1, %v2912_v63, 0.0  ;;  %v3456_v40 = vadd.f32 %v3455_v46, %v3454_v11 }
 0x233   : > { %v5828_v29 = vpop.xlane.xlu0 %3137  ;;  %v2202_v3 = vrot.slane %v1739_v16, %v4911_v56  ;;  %v3451_v13 = vadd.f32 %v3450_v55, %v2911_v24  ;;  %v3821_v42 = vrot.slane %v5813_v15, %v4687_v14  ;;  %v2206_v38 = vrot.slane %v1739_v16, %v4921_v60 }
 0x234   : > { %v5826_v22 = vpop.xlane.xlu1 %3142  ;;  %v2278_v37 = vrot.slane %v5092_v19, %v4921_v60  ;;  %v2673_v25 = vsub.f32 %v2274_v18, %v1361_v49  ;;  %v2671_v58 = vsub.f32 %v2274_v18, %v1359_v52  ;;  %v3817_v63 = vrot.slane %v5815_v4, %v4674_v7 }
 0x235   : > { %v2637_v1 = vsub.f32 %v2202_v3, %v1325_v35  ;;  %v2635_v32 = vsub.f32 %v2202_v3, %v1323_v51  ;;  %v2638_v12 = vsub.f32 %v2206_v38, %v1326_v41  ;;  %v2636_v2 = vsub.f32 %v2206_v38, %v1324_v62  ;;  %v1339_v38 = vld [vmem:[%s4916_s20 + $0x6e0] sm:$0xff] }
 0x236   : > { %3457 = vadd.xlane.f32.xlu0 %v3456_v40  ;;  %3452 = vadd.xlane.f32.xlu1 %v3451_v13  ;;  %v2674_v17 = vsub.f32 %v2278_v37, %v1362_v6  ;;  %v2929_v24 = vmul.f32 %v2673_v25, %v2673_v25  ;;  %v2672_v35 = vsub.f32 %v2278_v37, %v1360_v34  ;;  %v1340_v34 = vld [vmem:[%s4916_s20 + $0x6e8] sm:$0xff] }
 0x237   : > { %v5855_v9 = vpop.xlane.xlu0 %3146  ;;  %v2893_v54 = vmul.f32 %v2637_v1, %v2637_v1  ;;  %v2891_v43 = vmul.f32 %v2635_v32, %v2635_v32  ;;  %v2894_v16 = vmul.f32 %v2638_v12, %v2638_v12  ;;  %v2892_v46 = vmul.f32 %v2636_v2, %v2636_v2  ;;  %v1341_v12 = vld [vmem:[%s4916_s20 + $0x6f0] sm:$0x3f]  ;;  %v1342_v2 = vld [vmem:[%s4916_s20 + $0x6f8] sm:$0x3f] }
 0x238   : > { %v5853_v23 = vpop.xlane.xlu1 %3151  ;;  %v4249_v51 = vsel %vm4228_vm3, %v3813_v8, %v3804_v61  ;;  %v2930_v18 = vmul.f32 %v2674_v17, %v2674_v17  ;;  %v2927_v55 = vmul.f32 %v2671_v58, %v2671_v58  ;;  %v3490_v62 = vsel %vm2948_vm15, %v2929_v24, 0.0 }
 0x239   : > { %v3409_v49 = vsel %vm2948_vm15, %v2893_v54, 0.0  ;;  %v3410_v41 = vsel %vm2950_vm0, %v2894_v16, 0.0  ;;  %v3405_v3 = vsel %vm2943_vm1, %v2892_v46, 0.0  ;;  %v2928_v52 = vmul.f32 %v2672_v35, %v2672_v35  ;;  %v1349_v54 = vld [vmem:[%s4916_s20 + $0x730] sm:$0x3f] }
 0x23a   : > { %v3411_v4 = vadd.f32 %v3410_v41, %v3409_v49  ;;  %v3406_v40 = vadd.f32 %v3405_v3, %v2891_v43  ;;  %v3491_v13 = vsel %vm2950_vm0, %v2930_v18, 0.0  ;;  %v1740_v61 = vcombine.high %v5064_v26, %v5064_v26  ;;  %v1347_v43 = vld [vmem:[%s4916_s20 + $0x720] sm:$0xff] }
 0x23b   : > { %v5866_v11 = vpop.xlane.xlu0 %3119  ;;  %v3822_v1 = vsel %vm3659_vm2, %v3821_v42, %v3817_v63  ;;  %v3848_v32 = vrot.slane %v5826_v22, %v4687_v14  ;;  %v3844_v37 = vrot.slane %v5828_v29, %v4674_v7  ;;  %v3486_v25 = vsel %vm2943_vm1, %v2928_v52, 0.0  ;;  %v1350_v22 = vld [vmem:[%s4916_s20 + $0x738] sm:$0x3f] }
 0x23c   : > { %v5864_v15 = vpop.xlane.xlu1 %3124  ;;  %3412 = vadd.xlane.f32.xlu0 %v3411_v4  ;;  %3407 = vadd.xlane.f32.xlu1 %v3406_v40  ;;  %v3857_v26 = vrot.slane %v5853_v23, %v4687_v14  ;;  %v2234_v58 = vrot.slane %v1740_v61, %v4911_v56  ;;  %v2238_v42 = vrot.slane %v1740_v61, %v4921_v60 }
 0x23d   : > { %v3492_v17 = vadd.f32 %v3491_v13, %v3490_v62  ;;  %v3487_v29 = vadd.f32 %v3486_v25, %v2927_v55  ;;  %v2250_v24 = vrot.slane %v5095_v31, %v4911_v56  ;;  %v2254_v63 = vrot.slane %v5095_v31, %v4921_v60  ;;  %v1348_v55 = vld [vmem:[%s4916_s20 + $0x728] sm:$0xff] }
 0x23e   : > { %v2651_v16 = vsub.f32 %v2234_v58, %v1339_v38  ;;  %v2652_v46 = vsub.f32 %v2238_v42, %v1340_v34  ;;  %v2653_v35 = vsub.f32 %v2234_v58, %v1341_v12  ;;  %v2654_v23 = vsub.f32 %v2238_v42, %v1342_v2 }
 0x23f   : > { %v5881_v6 = vpop.xlane.xlu0 %3155  ;;  %v3853_v41 = vrot.slane %v5855_v9, %v4674_v7  ;;  %v2661_v3 = vsub.f32 %v2250_v24, %v1349_v54  ;;  %v2662_v62 = vsub.f32 %v2254_v63, %v1350_v22  ;;  %v2659_v52 = vsub.f32 %v2250_v24, %v1347_v43 }
 0x240   : > { %v5879_v8 = vpop.xlane.xlu1 %3160  ;;  %3493 = vadd.xlane.f32.xlu0 %v3492_v17  ;;  %3488 = vadd.xlane.f32.xlu1 %v3487_v29  ;;  %v2907_v4 = vmul.f32 %v2651_v16, %v2651_v16  ;;  %v2908_v40 = vmul.f32 %v2652_v46, %v2652_v46  ;;  %v2909_v13 = vmul.f32 %v2653_v35, %v2653_v35  ;;  %v1353_v29 = vld [vmem:[%s4916_s20 + $0x750] sm:$0x3f]  ;;  %v1354_v46 = vld [vmem:[%s4916_s20 + $0x758] sm:$0x3f]  ;;  %v1351_v35 = vld [vmem:[%s4916_s20 + $0x740] sm:$0xff] }
 0x241   : > { %v2910_v38 = vmul.f32 %v2654_v23, %v2654_v23  ;;  %v3830_v61 = vrot.slane %v5864_v15, %v4687_v14  ;;  %v2917_v25 = vmul.f32 %v2661_v3, %v2661_v3  ;;  %v2918_v34 = vmul.f32 %v2662_v62, %v2662_v62  ;;  %v1352_v62 = vld [vmem:[%s4916_s20 + $0x748] sm:$0xff] }
 0x242   : > { %v3441_v12 = vsel %vm2943_vm1, %v2908_v40, 0.0  ;;  %v3445_v9 = vsel %vm2948_vm15, %v2909_v13, 0.0  ;;  %v3826_v2 = vrot.slane %v5866_v11, %v4674_v7  ;;  %v2660_v58 = vsub.f32 %v2254_v63, %v1348_v55  ;;  %v1363_v55 = vld [vmem:[%s4916_s20 + $0x7a0] sm:$0xff] }
 0x243   : > { %v5905_v18 = vpop.xlane.xlu0 %3164  ;;  %v4250_v22 = vsel %vm4230_vm4, %v3822_v1, %v4249_v51  ;;  %v3442_v15 = vadd.f32 %v3441_v12, %v2907_v4  ;;  %v3446_v43 = vsel %vm2950_vm0, %v2910_v38, 0.0  ;;  %v2915_v17 = vmul.f32 %v2659_v52, %v2659_v52  ;;  %v1364_v52 = vld [vmem:[%s4916_s20 + $0x7a8] sm:$0xff]  ;;  %v1366_v12 = vld [vmem:[%s4916_s20 + $0x7b8] sm:$0x3f] }
 0x244   : > { %v5903_v49 = vpop.xlane.xlu1 %3169  ;;  %v3447_v24 = vadd.f32 %v3446_v43, %v3445_v9  ;;  %v3463_v16 = vsel %vm2948_vm15, %v2917_v25, 0.0  ;;  %v3464_v11 = vsel %vm2950_vm0, %v2918_v34, 0.0  ;;  %v2916_v63 = vmul.f32 %v2660_v58, %v2660_v58 }
 0x245   : > { %v5928_v23 = vsel %vm3659_vm2, %v3848_v32, %v3844_v37  ;;  %v5931_v51 = vsel %vm3659_vm2, %v3857_v26, %v3853_v41  ;;  %3443 = vadd.xlane.f32.xlu0 %v3442_v15  ;;  %v2258_v1 = vrot.slane %v5492_v10, %v4911_v56  ;;  %v2262_v3 = vrot.slane %v5492_v10, %v4921_v60  ;;  %v1365_v41 = vld [vmem:[%s4916_s20 + $0x7b0] sm:$0x3f] }
 0x246   : > { %3448 = vadd.xlane.f32.xlu1 %v3447_v24  ;;  %v3831_v4 = vsel %vm3659_vm2, %v3830_v61, %v3826_v2  ;;  %v3459_v32 = vsel %vm2943_vm1, %v2916_v63, 0.0  ;;  %v2282_v37 = vrot.slane %v5098_v36, %v4911_v56  ;;  %v2286_v26 = vrot.slane %v5098_v36, %v4921_v60 }
 0x247   : > { %v5918_v54 = vpop.xlane.xlu0 %3200  ;;  %v3465_v10 = vadd.f32 %v3464_v11, %v3463_v16  ;;  %v2665_v38 = vsub.f32 %v2258_v1, %v1353_v29  ;;  %v2666_v25 = vsub.f32 %v2262_v3, %v1354_v46  ;;  %v2663_v34 = vsub.f32 %v2258_v1, %v1351_v35 }
 0x248   : > { %v5916_v42 = vpop.xlane.xlu1 %3205  ;;  %v3460_v9 = vadd.f32 %v3459_v32, %v2915_v17  ;;  %v2664_v61 = vsub.f32 %v2262_v3, %v1352_v62  ;;  %v2675_v2 = vsub.f32 %v2282_v37, %v1363_v55  ;;  %v2676_v58 = vsub.f32 %v2286_v26, %v1364_v52 }
 0x249   : > { %3466 = vadd.xlane.f32.xlu0 %v3465_v10  ;;  %v2921_v15 = vmul.f32 %v2665_v38, %v2665_v38  ;;  %v2922_v43 = vmul.f32 %v2666_v25, %v2666_v25  ;;  %v2919_v24 = vmul.f32 %v2663_v34, %v2663_v34  ;;  %v2677_v63 = vsub.f32 %v2282_v37, %v1365_v41  ;;  %v1367_v10 = vld [vmem:[%s4916_s20 + $0x7c0] sm:$0xff] }
 0x24a   : > { %3461 = vadd.xlane.f32.xlu1 %v3460_v9  ;;  %v2920_v47 = vmul.f32 %v2664_v61, %v2664_v61  ;;  %v3875_v28 = vrot.slane %v5903_v49, %v4687_v14  ;;  %v2932_v5 = vmul.f32 %v2676_v58, %v2676_v58  ;;  %v2678_v16 = vsub.f32 %v2286_v26, %v1366_v12  ;;  %v1369_v9 = vld [vmem:[%s4916_s20 + $0x7d0] sm:$0x3f]  ;;  %v1370_v61 = vld [vmem:[%s4916_s20 + $0x7d8] sm:$0x3f] }
 0x24b   : > { %v5949_v13 = vpop.xlane.xlu0 %3173  ;;  %v3472_v17 = vsel %vm2948_vm15, %v2921_v15, 0.0  ;;  %v3473_v46 = vsel %vm2950_vm0, %v2922_v43, 0.0  ;;  %v3871_v35 = vrot.slane %v5905_v18, %v4674_v7  ;;  %v2933_v1 = vmul.f32 %v2677_v63, %v2677_v63  ;;  %v1355_v63 = vld [vmem:[%s4916_s20 + $0x760] sm:$0xff] }
 0x24c   : > { %v5947_v40 = vpop.xlane.xlu1 %3178  ;;  %v3474_v3 = vadd.f32 %v3473_v46, %v3472_v17  ;;  %v3468_v62 = vsel %vm2943_vm1, %v2920_v47, 0.0  ;;  %v2931_v49 = vmul.f32 %v2675_v2, %v2675_v2  ;;  %v2934_v55 = vmul.f32 %v2678_v16, %v2678_v16  ;;  %v1357_v2 = vld [vmem:[%s4916_s20 + $0x770] sm:$0x3f] }
 0x24d   : > { %v5964_v52 = vsel %vm4232_vm5, %v3831_v4, %v4250_v22  ;;  %v3866_v32 = vrot.slane %v5879_v8, %v4687_v14  ;;  %v3469_v37 = vadd.f32 %v3468_v62, %v2919_v24  ;;  %v3495_v26 = vsel %vm2943_vm1, %v2932_v5, 0.0  ;;  %v1368_v22 = vld [vmem:[%s4916_s20 + $0x7c8] sm:$0xff]  ;;  %v1358_v24 = vld [vmem:[%s4916_s20 + $0x778] sm:$0x3f] }
 0x24e   : > { %v3862_v18 = vrot.slane %v5881_v6, %v4674_v7  ;;  %3475 = vadd.xlane.f32.xlu0 %v3474_v3  ;;  %v3499_v47 = vsel %vm2948_vm15, %v2933_v1, 0.0  ;;  %v3500_v41 = vsel %vm2950_vm0, %v2934_v55, 0.0  ;;  %v1788_v4 = vcombine.high %v5092_v19, %v5092_v19 }
 0x24f   : > { %v5956_v11 = vpop.xlane.xlu0 %3182  ;;  %3470 = vadd.xlane.f32.xlu1 %v3469_v37  ;;  %v5982_v25 = vsel %vm3659_vm2, %v3875_v28, %v3871_v35  ;;  %v3911_v34 = vrot.slane %v5916_v42, %v4687_v14  ;;  %v3907_v12 = vrot.slane %v5918_v54, %v4674_v7  ;;  %v1789_v19 = vcombine.high %v5095_v31, %v5095_v31  ;;  %v1356_v42 = vld [vmem:[%s4916_s20 + $0x768] sm:$0xff] }
 0x250   : > { %v5954_v29 = vpop.xlane.xlu1 %3187  ;;  %v3496_v58 = vadd.f32 %v3495_v26, %v2931_v49  ;;  %v2290_v15 = vrot.slane %v1788_v4, %v4911_v56  ;;  %v2294_v43 = vrot.slane %v1788_v4, %v4921_v60  ;;  %v3884_v28 = vrot.slane %v5947_v40, %v4687_v14 }
 0x251   : > { %v3501_v16 = vadd.f32 %v3500_v41, %v3499_v47  ;;  %v2266_v54 = vrot.slane %v1789_v19, %v4911_v56  ;;  %v2270_v17 = vrot.slane %v1789_v19, %v4921_v60  ;;  %v1790_v31 = vcombine.high %v5098_v36, %v5098_v36 }
 0x252   : > { %3497 = vadd.xlane.f32.xlu0 %v3496_v58  ;;  %v2679_v46 = vsub.f32 %v2290_v15, %v1367_v10  ;;  %v2680_v35 = vsub.f32 %v2294_v43, %v1368_v22  ;;  %v2681_v1 = vsub.f32 %v2290_v15, %v1369_v9  ;;  %v2682_v3 = vsub.f32 %v2294_v43, %v1370_v61  ;;  %v1371_v43 = vld [vmem:[%s4916_s20 + $0x7e0] sm:$0xff] }
 0x253   : > { %v5979_v5 = vpop.xlane.xlu0 %3209  ;;  %3502 = vadd.xlane.f32.xlu1 %v3501_v16  ;;  %v2669_v49 = vsub.f32 %v2266_v54, %v1357_v2  ;;  %v2670_v55 = vsub.f32 %v2270_v17, %v1358_v24  ;;  %v2667_v37 = vsub.f32 %v2266_v54, %v1355_v63  ;;  %v2668_v26 = vsub.f32 %v2270_v17, %v1356_v42  ;;  %v1372_v17 = vld [vmem:[%s4916_s20 + $0x7e8] sm:$0xff] }
 0x254   : > { %v5977_v38 = vpop.xlane.xlu1 %3214  ;;  %v2935_v47 = vmul.f32 %v2679_v46, %v2679_v46  ;;  %v2936_v41 = vmul.f32 %v2680_v35, %v2680_v35  ;;  %v2937_v4 = vmul.f32 %v2681_v1, %v2681_v1  ;;  %v2938_v36 = vmul.f32 %v2682_v3, %v2682_v3  ;;  %v1373_v46 = vld [vmem:[%s4916_s20 + $0x7f0] sm:$0x3f] }
 0x255   : > { %v3880_v10 = vrot.slane %v5949_v13, %v4674_v7  ;;  %v2925_v22 = vmul.f32 %v2669_v49, %v2669_v49  ;;  %v2926_v9 = vmul.f32 %v2670_v55, %v2670_v55  ;;  %v2924_v61 = vmul.f32 %v2668_v26, %v2668_v26 }
 0x256   : > { %v6011_v19 = vsel %vm3659_vm2, %v3911_v34, %v3907_v12  ;;  %v3504_v2 = vsel %vm2943_vm1, %v2936_v41, 0.0  ;;  %v3508_v58 = vsel %vm2948_vm15, %v2937_v4, 0.0  ;;  %v3509_v15 = vsel %vm2950_vm0, %v2938_v36, 0.0  ;;  %v1374_v34 = vld [vmem:[%s4916_s20 + $0x7f8] sm:$0x3f] }
 0x257   : > { %v6006_v40 = vpop.xlane.xlu0 %3218  ;;  %v3505_v13 = vadd.f32 %v3504_v2, %v2935_v47  ;;  %v3510_v42 = vadd.f32 %v3509_v15, %v3508_v58  ;;  %v3481_v16 = vsel %vm2948_vm15, %v2925_v22, 0.0  ;;  %v2923_v54 = vmul.f32 %v2667_v37, %v2667_v37 }
 0x258   : > { %v6004_v62 = vpop.xlane.xlu1 %3223  ;;  %v3482_v12 = vsel %vm2950_vm0, %v2926_v9, 0.0  ;;  %v3477_v35 = vsel %vm2943_vm1, %v2924_v61, 0.0  ;;  %v2298_v1 = vrot.slane %v1790_v31, %v4911_v56  ;;  %v2302_v3 = vrot.slane %v1790_v31, %v4921_v60 }
 0x259   : > { %3506 = vadd.xlane.f32.xlu0 %v3505_v13  ;;  %3511 = vadd.xlane.f32.xlu1 %v3510_v42  ;;  %v3885_v49 = vsel %vm3659_vm2, %v3884_v28, %v3880_v10  ;;  %v3893_v55 = vrot.slane %v5954_v29, %v4687_v14  ;;  %v3889_v37 = vrot.slane %v5956_v11, %v4674_v7 }
 0x25a   : > { %v2683_v26 = vsub.f32 %v2298_v1, %v1371_v43  ;;  %v2684_v47 = vsub.f32 %v2302_v3, %v1372_v17  ;;  %v2685_v41 = vsub.f32 %v2298_v1, %v1373_v46  ;;  %v2686_v4 = vsub.f32 %v2302_v3, %v1374_v34 }
 0x25b   : > { %v6019_v63 = vpop.xlane.xlu0 %3191  ;;  %v3483_v60 = vadd.f32 %v3482_v12, %v3481_v16  ;;  %v3478_v31 = vadd.f32 %v3477_v35, %v2923_v54  ;;  %v6296_v29 = vrot.slane %v5593_v33, %v4687_v14  ;;  %v4235_v11 = vsel %vm4234_vm6, %v5566_v50, %v5632_v53 }
 0x25c   : > { %v6017_v24 = vpop.xlane.xlu1 %3196  ;;  %v2939_v10 = vmul.f32 %v2683_v26, %v2683_v26  ;;  %v2940_v22 = vmul.f32 %v2684_v47, %v2684_v47  ;;  %v2941_v9 = vmul.f32 %v2685_v41, %v2685_v41  ;;  %v2942_v61 = vmul.f32 %v2686_v4, %v2686_v4 }
 0x25d   : > { %v3723_v28 = vsel %vm3659_vm2, %v6296_v29, %v3718_v45  ;;  %3484 = vadd.xlane.f32.xlu0 %v3483_v60  ;;  %3479 = vadd.xlane.f32.xlu1 %v3478_v31  ;;  %v4237_v2 = vsel %vm4236_vm7, %v5575_v0, %v4235_v11  ;;  %v6297_v44 = vrot.slane %v5732_v20, %v4674_v7 }
 0x25e   : > { %v6298_v33 = vrot.slane %v5730_v21, %v4687_v14  ;;  %v4245_v50 = vsel %vm4234_vm6, %v5698_v59, %v5790_v30  ;;  %v3513_v53 = vsel %vm2943_vm1, %v2940_v22, 0.0  ;;  %v3517_v58 = vsel %vm2948_vm15, %v2941_v9, 0.0 }
 0x25f   : > { %v6034_v36 = vpop.xlane.xlu0 %3241  ;;  %v3518_v15 = vsel %vm2950_vm0, %v2942_v61, 0.0  ;;  %v4239_v0 = vsel %vm4238_vm8, %v5609_v39, %v4237_v2  ;;  %v4256_v21 = vsel %vm4228_vm3, %v3885_v49, %v5982_v25  ;;  %v3514_v13 = vadd.f32 %v3513_v53, %v2939_v10 }
 0x260   : > { %v6036_v56 = vpop.xlane.xlu1 %3236  ;;  %v3795_v45 = vsel %vm3659_vm2, %v6298_v33, %v6297_v44  ;;  %v3519_v42 = vadd.f32 %v3518_v15, %v3517_v58  ;;  %v4246_v59 = vsel %vm4236_vm7, %v5754_v48, %v4245_v50  ;;  %v3894_v30 = vsel %vm3659_vm2, %v3893_v55, %v3889_v37 }
 0x261   : > { %v3920_v16 = vrot.slane %v5977_v38, %v4687_v14  ;;  %v4241_v54 = vsel %vm4240_vm9, %v3723_v28, %v4239_v0  ;;  %v4247_v39 = vsel %vm4238_vm8, %v5757_v57, %v4246_v59  ;;  %3515 = vadd.xlane.f32.xlu0 %v3514_v13  ;;  %v4252_v17 = vsel %vm4234_vm6, %v5845_v27, %v5964_v52 }
 0x262   : > { %3520 = vadd.xlane.f32.xlu1 %v3519_v42  ;;  %v4248_v25 = vsel %vm4240_vm9, %v3795_v45, %v4247_v39  ;;  %v3902_v48 = vrot.slane %v6017_v24, %v4687_v14  ;;  %v3916_v38 = vrot.slane %v5979_v5, %v4674_v7  ;;  %v3867_v57 = vsel %vm3659_vm2, %v3866_v32, %v3862_v18 }
 0x263   : > { %v6065_v43 = vpop.xlane.xlu0 %3277  ;;  %v4253_v46 = vsel %vm4236_vm7, %v5928_v23, %v4252_v17  ;;  %v3898_v27 = vrot.slane %v6019_v63, %v4674_v7  ;;  %v4257_v24 = vsel %vm4230_vm4, %v3894_v30, %v4256_v21  ;;  %v3929_v5 = vrot.slane %v6004_v62, %v4687_v14 }
 0x264   : > { %v6067_v20 = vpop.xlane.xlu1 %3272  ;;  %v3925_v6 = vrot.slane %v6006_v40, %v4674_v7  ;;  %v4254_v8 = vsel %vm4238_vm8, %v5931_v51, %v4253_v46  ;;  %v4300_v32 = vsel %vm4299_vm10, %v4241_v54, 0.0  ;;  %v4303_v23 = vsel %vm4299_vm10, %v4248_v25, 0.0 }
 0x265   : > { %v3903_v18 = vsel %vm3659_vm2, %v3902_v48, %v3898_v27  ;;  %4301 = vadd.xlane.f32.xlu0 %v4300_v32  ;;  %v4255_v12 = vsel %vm4240_vm9, %v3867_v57, %v4254_v8  ;;  %v3921_v40 = vsel %vm3659_vm2, %v3920_v16, %v3916_v38  ;;  %v3947_v33 = vrot.slane %v6034_v36, %v4687_v14 }
 0x266   : > { %4304 = vadd.xlane.f32.xlu1 %v4303_v23  ;;  %v4258_v62 = vsel %vm4232_vm5, %v3903_v18, %v4257_v24  ;;  %v3930_v49 = vsel %vm3659_vm2, %v3929_v5, %v3925_v6  ;;  %v4306_v26 = vsel %vm4299_vm10, %v4255_v12, 0.0  ;;  %v3943_v45 = vrot.slane %v6036_v56, %v4674_v7 }
 0x267   : > { %v3228_v52 = vpop.xlane.xlu0 %3227  ;;  %v4259_v3 = vsel %vm4234_vm6, %v6011_v19, %v4258_v62  ;;  %v3983_v13 = vrot.slane %v6065_v43, %v4687_v14  ;;  %v3979_v42 = vrot.slane %v6067_v20, %v4674_v7 }
 0x268   : > { %v3233_v34 = vpop.xlane.xlu1 %3232  ;;  %v3934_v63 = vrot.slane %v3228_v52, %v4674_v7  ;;  %v4260_v37 = vsel %vm4236_vm7, %v3921_v40, %v4259_v3  ;;  %v3948_v21 = vsel %vm3659_vm2, %v3947_v33, %v3943_v45 }
 0x269   : > { %v3938_v35 = vrot.slane %v3233_v34, %v4687_v14  ;;  %v4261_v47 = vsel %vm4238_vm8, %v3930_v49, %v4260_v37  ;;  %4307 = vadd.xlane.f32.xlu0 %v4306_v26  ;;  %v3984_v43 = vsel %vm3659_vm2, %v3983_v13, %v3979_v42 }
 0x26b   : > { %v3251_v1 = vpop.xlane.xlu0 %3250  ;;  %v3939_v55 = vsel %vm3659_vm2, %v3938_v35, %v3934_v63 }
 0x26c   : > { %v3246_v51 = vpop.xlane.xlu1 %3245  ;;  %v4262_v41 = vsel %vm4240_vm9, %v3939_v55, %v4261_v47  ;;  %v3956_v9 = vrot.slane %v3251_v1, %v4687_v14 }
 0x26d   : > { %v4309_v4 = vsel %vm4299_vm10, %v4262_v41, 0.0  ;;  %v3952_v61 = vrot.slane %v3246_v51, %v4674_v7 }
 0x26e   : > { %4310 = vadd.xlane.f32.xlu1 %v4309_v4 }
 0x26f   : > { %v3260_v60 = vpop.xlane.xlu0 %3259  ;;  %v3957_v50 = vsel %vm3659_vm2, %v3956_v9, %v3952_v61 }
 0x270   : > { %v3255_v31 = vpop.xlane.xlu1 %3254  ;;  %v3965_v2 = vrot.slane %v3260_v60, %v4687_v14  ;;  %v4263_v56 = vsel %vm4228_vm3, %v3957_v50, %v3948_v21 }
 0x271   : > { %v3961_v44 = vrot.slane %v3255_v31, %v4674_v7 }
 0x273   : > { %v3282_v29 = vpop.xlane.xlu0 %3281  ;;  %v3966_v58 = vsel %vm3659_vm2, %v3965_v2, %v3961_v44 }
 0x274   : > { %v3287_v19 = vpop.xlane.xlu1 %3286  ;;  %v4264_v59 = vsel %vm4230_vm4, %v3966_v58, %v4263_v56  ;;  %v3988_v54 = vrot.slane %v3282_v29, %v4674_v7 }
 0x275   : > { %v3992_v39 = vrot.slane %v3287_v19, %v4687_v14 }
 0x277   : > { %v3291_v28 = vpop.xlane.xlu0 %3290  ;;  %v3993_v57 = vsel %vm3659_vm2, %v3992_v39, %v3988_v54 }
 0x278   : > { %v3296_v11 = vpop.xlane.xlu1 %3295  ;;  %v3997_v48 = vrot.slane %v3291_v28, %v4674_v7 }
 0x279   : > { %v4001_v38 = vrot.slane %v3296_v11, %v4687_v14 }
 0x27b   : > { %v6122_v10 = vpop.xlane.xlu0 %3313  ;;  %v4002_v5 = vsel %vm3659_vm2, %v4001_v38, %v3997_v48 }
 0x27c   : > { %v6124_v22 = vpop.xlane.xlu1 %3308  ;;  %v4019_v41 = vrot.slane %v6122_v10, %v4687_v14 }
 0x27d   : > { %v4015_v4 = vrot.slane %v6124_v22, %v4674_v7 }
 0x27f   : > { %v3269_v53 = vpop.xlane.xlu0 %3268  ;;  %v4020_v11 = vsel %vm3659_vm2, %v4019_v41, %v4015_v4 }
 0x280   : > { %v3974_v15 = vrot.slane %v3269_v53, %v4687_v14  ;;  %v3264_v0 = vpop.xlane.xlu1 %3263 }
 0x281   : > { %v3970_v36 = vrot.slane %v3264_v0, %v4674_v7 }
 0x283   : > { %v3975_v30 = vsel %vm3659_vm2, %v3974_v15, %v3970_v36  ;;  %v3350_v16 = vpop.xlane.xlu0 %3349 }
 0x284   : > { %v4265_v25 = vsel %vm4232_vm5, %v3975_v30, %v4264_v59  ;;  %v3345_v17 = vpop.xlane.xlu1 %3344  ;;  %v4055_v9 = vrot.slane %v3350_v16, %v4687_v14 }
 0x285   : > { %v4266_v20 = vsel %vm4234_vm6, %v3984_v43, %v4265_v25  ;;  %v4051_v61 = vrot.slane %v3345_v17, %v4674_v7 }
 0x286   : > { %v4267_v34 = vsel %vm4236_vm7, %v3993_v57, %v4266_v20 }
 0x287   : > { %v3300_v46 = vpop.xlane.xlu0 %3299  ;;  %v4268_v8 = vsel %vm4238_vm8, %v4002_v5, %v4267_v34  ;;  %v4056_v15 = vsel %vm3659_vm2, %v4055_v9, %v4051_v61 }
 0x288   : > { %v4006_v27 = vrot.slane %v3300_v46, %v4674_v7  ;;  %v3305_v52 = vpop.xlane.xlu1 %3304 }
 0x289   : > { %v4010_v24 = vrot.slane %v3305_v52, %v4687_v14 }
 0x28b   : > { %v4011_v6 = vsel %vm3659_vm2, %v4010_v24, %v4006_v27  ;;  %v3323_v23 = vpop.xlane.xlu0 %3322 }
 0x28c   : > { %v4269_v32 = vsel %vm4240_vm9, %v4011_v6, %v4268_v8  ;;  %v3318_v18 = vpop.xlane.xlu1 %3317  ;;  %v4028_v55 = vrot.slane %v3323_v23, %v4687_v14 }
 0x28d   : > { %v4312_v63 = vsel %vm4299_vm10, %v4269_v32, 0.0  ;;  %v4024_v37 = vrot.slane %v3318_v18, %v4674_v7 }
 0x28e   : > { %4313 = vadd.xlane.f32.xlu0 %v4312_v63 }
 0x28f   : > { %v4029_v60 = vsel %vm3659_vm2, %v4028_v55, %v4024_v37 }
 0x290   : > { %v4270_v10 = vsel %vm4228_vm3, %v4029_v60, %v4020_v11 }
 0x291   : > { %v3332_v12 = vpop.xlane.xlu0 %3331 }
 0x292   : > { %v3327_v62 = vpop.xlane.xlu1 %3326  ;;  %v4037_v26 = vrot.slane %v3332_v12, %v4687_v14 }
 0x293   : > { %v4033_v47 = vrot.slane %v3327_v62, %v4674_v7 }
 0x295   : > { %v3354_v35 = vpop.xlane.xlu0 %3353  ;;  %v4038_v29 = vsel %vm3659_vm2, %v4037_v26, %v4033_v47 }
 0x296   : > { %v3359_v40 = vpop.xlane.xlu1 %3358  ;;  %v4271_v22 = vsel %vm4230_vm4, %v4038_v29, %v4270_v10  ;;  %v4060_v45 = vrot.slane %v3354_v35, %v4674_v7 }
 0x297   : > { %v4064_v50 = vrot.slane %v3359_v40, %v4687_v14 }
 0x299   : > { %v3363_v1 = vpop.xlane.xlu0 %3362  ;;  %v4065_v42 = vsel %vm3659_vm2, %v4064_v50, %v4060_v45 }
 0x29a   : > { %v3368_v51 = vpop.xlane.xlu1 %3367  ;;  %v4069_v21 = vrot.slane %v3363_v1, %v4674_v7 }
 0x29b   : > { %v4073_v13 = vrot.slane %v3368_v51, %v4687_v14 }
 0x29d   : > { %v6162_v3 = vpop.xlane.xlu0 %3385  ;;  %v4074_v54 = vsel %vm3659_vm2, %v4073_v13, %v4069_v21 }
 0x29e   : > { %v3381_v49 = vpop.xlane.xlu1 %3380  ;;  %v4091_v18 = vrot.slane %v6162_v3, %v4687_v14 }
 0x29f   : > { %v4087_v63 = vrot.slane %v3381_v49, %v4674_v7 }
 0x2a1   : > { %v4092_v1 = vsel %vm3659_vm2, %v4091_v18, %v4087_v63 }
 0x2a3   : > { %v3341_v31 = vpop.xlane.xlu0 %3340 }
 0x2a4   : > { %v4046_v19 = vrot.slane %v3341_v31, %v4687_v14  ;;  %v3336_v28 = vpop.xlane.xlu1 %3335 }
 0x2a5   : > { %v4042_v2 = vrot.slane %v3336_v28, %v4674_v7 }
 0x2a7   : > { %v4047_v44 = vsel %vm3659_vm2, %v4046_v19, %v4042_v2  ;;  %v3422_v33 = vpop.xlane.xlu0 %3421 }
 0x2a8   : > { %v4272_v53 = vsel %vm4232_vm5, %v4047_v44, %v4271_v22  ;;  %v3417_v58 = vpop.xlane.xlu1 %3416  ;;  %v4127_v37 = vrot.slane %v3422_v33, %v4687_v14 }
 0x2a9   : > { %v4273_v0 = vsel %vm4234_vm6, %v4056_v15, %v4272_v53  ;;  %v4123_v26 = vrot.slane %v3417_v58, %v4674_v7 }
 0x2aa   : > { %v4274_v30 = vsel %vm4236_vm7, %v4065_v42, %v4273_v0 }
 0x2ab   : > { %v4275_v17 = vsel %vm4238_vm8, %v4074_v54, %v4274_v30  ;;  %v4128_v19 = vsel %vm3659_vm2, %v4127_v37, %v4123_v26 }
 0x2ac   : > { %v3372_v36 = vpop.xlane.xlu0 %3371 }
 0x2ad   : > { %v4078_v56 = vrot.slane %v3372_v36, %v4674_v7  ;;  %v3377_v59 = vpop.xlane.xlu1 %3376 }
 0x2ae   : > { %v4082_v16 = vrot.slane %v3377_v59, %v4687_v14 }
 0x2b0   : > { %v3395_v39 = vpop.xlane.xlu0 %3394  ;;  %v4083_v25 = vsel %vm3659_vm2, %v4082_v16, %v4078_v56 }
 0x2b1   : > { %v3390_v43 = vpop.xlane.xlu1 %3389  ;;  %v4276_v20 = vsel %vm4240_vm9, %v4083_v25, %v4275_v17  ;;  %v4100_v6 = vrot.slane %v3395_v39, %v4687_v14 }
 0x2b2   : > { %v4315_v48 = vsel %vm4299_vm10, %v4276_v20, 0.0  ;;  %v4096_v8 = vrot.slane %v3390_v43, %v4674_v7 }
 0x2b3   : > { %4316 = vadd.xlane.f32.xlu1 %v4315_v48 }
 0x2b4   : > { %v4101_v12 = vsel %vm3659_vm2, %v4100_v6, %v4096_v8 }
 0x2b5   : > { %v4277_v3 = vsel %vm4228_vm3, %v4101_v12, %v4092_v1 }
 0x2b6   : > { %v3404_v38 = vpop.xlane.xlu0 %3403 }
 0x2b7   : > { %v3399_v57 = vpop.xlane.xlu1 %3398  ;;  %v4109_v32 = vrot.slane %v3404_v38, %v4687_v14 }
 0x2b8   : > { %v4105_v23 = vrot.slane %v3399_v57, %v4674_v7 }
 0x2ba   : > { %v3426_v46 = vpop.xlane.xlu0 %3425  ;;  %v4110_v62 = vsel %vm3659_vm2, %v4109_v32, %v4105_v23 }
 0x2bb   : > { %v3431_v27 = vpop.xlane.xlu1 %3430  ;;  %v4278_v49 = vsel %vm4230_vm4, %v4110_v62, %v4277_v3  ;;  %v4132_v31 = vrot.slane %v3426_v46, %v4674_v7 }
 0x2bc   : > { %v4136_v29 = vrot.slane %v3431_v27, %v4687_v14 }
 0x2be   : > { %v4137_v61 = vsel %vm3659_vm2, %v4136_v29, %v4132_v31 }
 0x2bf   : > { %v3435_v52 = vpop.xlane.xlu0 %3434  ;;  %v3440_v34 = vpop.xlane.xlu1 %3439 }
 0x2c0   : > { %v4141_v11 = vrot.slane %v3435_v52, %v4674_v7  ;;  %v4145_v9 = vrot.slane %v3440_v34, %v4687_v14 }
 0x2c2   : > { %v4146_v45 = vsel %vm3659_vm2, %v4145_v9, %v4141_v11 }
 0x2c3   : > { %v3458_v24 = vpop.xlane.xlu0 %3457  ;;  %v3453_v5 = vpop.xlane.xlu1 %3452 }
 0x2c4   : > { %v4163_v16 = vrot.slane %v3458_v24, %v4687_v14  ;;  %v4159_v54 = vrot.slane %v3453_v5, %v4674_v7 }
 0x2c6   : > { %v4164_v48 = vsel %vm3659_vm2, %v4163_v16, %v4159_v54 }
 0x2c9   : > { %v3413_v35 = vpop.xlane.xlu0 %3412  ;;  %v3408_v40 = vpop.xlane.xlu1 %3407 }
 0x2ca   : > { %v4118_v51 = vrot.slane %v3413_v35, %v4687_v14  ;;  %v4114_v55 = vrot.slane %v3408_v40, %v4674_v7 }
 0x2cc   : > { %v4119_v47 = vsel %vm3659_vm2, %v4118_v51, %v4114_v55 }
 0x2cd   : > { %v4279_v41 = vsel %vm4232_vm5, %v4119_v47, %v4278_v49  ;;  %v3494_v4 = vpop.xlane.xlu0 %3493  ;;  %v3489_v60 = vpop.xlane.xlu1 %3488 }
 0x2ce   : > { %v4280_v28 = vsel %vm4234_vm6, %v4128_v19, %v4279_v41  ;;  %v4199_v38 = vrot.slane %v3494_v4, %v4687_v14  ;;  %v4195_v57 = vrot.slane %v3489_v60, %v4674_v7 }
 0x2cf   : > { %v4281_v44 = vsel %vm4236_vm7, %v4137_v61, %v4280_v28 }
 0x2d0   : > { %v4282_v58 = vsel %vm4238_vm8, %v4146_v45, %v4281_v44  ;;  %v4200_v12 = vsel %vm3659_vm2, %v4199_v38, %v4195_v57 }
 0x2d2   : > { %v3444_v2 = vpop.xlane.xlu0 %3443 }
 0x2d3   : > { %v4150_v10 = vrot.slane %v3444_v2, %v4674_v7  ;;  %v3449_v22 = vpop.xlane.xlu1 %3448 }
 0x2d4   : > { %v4154_v33 = vrot.slane %v3449_v22, %v4687_v14 }
 0x2d6   : > { %v3467_v50 = vpop.xlane.xlu0 %3466  ;;  %v4155_v53 = vsel %vm3659_vm2, %v4154_v33, %v4150_v10 }
 0x2d7   : > { %v3462_v15 = vpop.xlane.xlu1 %3461  ;;  %v4283_v0 = vsel %vm4240_vm9, %v4155_v53, %v4282_v58  ;;  %v4172_v59 = vrot.slane %v3467_v50, %v4687_v14 }
 0x2d8   : > { %v4318_v21 = vsel %vm4299_vm10, %v4283_v0, 0.0  ;;  %v4168_v30 = vrot.slane %v3462_v15, %v4674_v7 }
 0x2d9   : > { %4319 = vadd.xlane.f32.xlu0 %v4318_v21 }
 0x2da   : > { %v4173_v20 = vsel %vm3659_vm2, %v4172_v59, %v4168_v30 }
 0x2db   : > { %v3476_v13 = vpop.xlane.xlu0 %3475  ;;  %v4284_v8 = vsel %vm4228_vm3, %v4173_v20, %v4164_v48 }
 0x2dc   : > { %v3471_v42 = vpop.xlane.xlu1 %3470  ;;  %v4181_v39 = vrot.slane %v3476_v13, %v4687_v14 }
 0x2dd   : > { %v4177_v25 = vrot.slane %v3471_v42, %v4674_v7 }
 0x2df   : > { %v3498_v36 = vpop.xlane.xlu0 %3497  ;;  %v4182_v46 = vsel %vm3659_vm2, %v4181_v39, %v4177_v25 }
 0x2e0   : > { %v3503_v56 = vpop.xlane.xlu1 %3502  ;;  %v4204_v34 = vrot.slane %v3498_v36, %v4674_v7  ;;  %v4285_v18 = vsel %vm4230_vm4, %v4182_v46, %v4284_v8 }
 0x2e1   : > { %v4208_v24 = vrot.slane %v3503_v56, %v4687_v14 }
 0x2e3   : > { %v4209_v1 = vsel %vm3659_vm2, %v4208_v24, %v4204_v34 }
 0x2e6   : > { %v3507_v17 = vpop.xlane.xlu0 %3506  ;;  %v3512_v43 = vpop.xlane.xlu1 %3511 }
 0x2e7   : > { %v4213_v32 = vrot.slane %v3507_v17, %v4674_v7  ;;  %v4217_v23 = vrot.slane %v3512_v43, %v4687_v14 }
 0x2e9   : > { %v4218_v26 = vsel %vm3659_vm2, %v4217_v23, %v4213_v32 }
 0x2ea   : > { %v3485_v27 = vpop.xlane.xlu0 %3484  ;;  %v3480_v52 = vpop.xlane.xlu1 %3479 }
 0x2eb   : > { %v4190_v5 = vrot.slane %v3485_v27, %v4687_v14  ;;  %v4186_v6 = vrot.slane %v3480_v52, %v4674_v7 }
 0x2ed   : > { %v4191_v63 = vsel %vm3659_vm2, %v4190_v5, %v4186_v6 }
 0x2ee   : > { %v4286_v62 = vsel %vm4232_vm5, %v4191_v63, %v4285_v18  ;;  %v3516_v35 = vpop.xlane.xlu0 %3515 }
 0x2ef   : > { %v3521_v40 = vpop.xlane.xlu1 %3520  ;;  %v4222_v51 = vrot.slane %v3516_v35, %v4674_v7  ;;  %v4287_v37 = vsel %vm4234_vm6, %v4200_v12, %v4286_v62 }
 0x2f0   : > { %v4226_v55 = vrot.slane %v3521_v40, %v4687_v14  ;;  %v4288_v3 = vsel %vm4236_vm7, %v4209_v1, %v4287_v37 }
 0x2f1   : > { %v4289_v47 = vsel %vm4238_vm8, %v4218_v26, %v4288_v3 }
 0x2f2   : > { %v4227_v49 = vsel %vm3659_vm2, %v4226_v55, %v4222_v51  ;;  %v4302_v41 = vpop.xlane.xlu0 %4301 }
 0x2f3   : > { %v4305_v7 = vpop.xlane.xlu1 %4304  ;;  %v4290_v14 = vsel %vm4240_vm9, %v4227_v49, %v4289_v47  ;;  %4325 = vst.msk [vmem:[%s220_s23] sm:$0xff] %vm4324_vm11, %v4302_v41 }
 0x2f4   : > { %4326 = vst.msk [vmem:[%s220_s23 + $0x8] sm:$0xff] %vm4324_vm11, %v4305_v7  ;;  %v4321_v4 = vsel %vm4299_vm10, %v4290_v14, 0.0 }
 0x2f5   : > { %4322 = vadd.xlane.f32.xlu1 %v4321_v4 }
 0x2f6   : > { %v4308_v60 = vpop.xlane.xlu0 %4307 }
 0x2f7   : > { %4327 = vst.msk [vmem:[%s220_s23 + $0x10] sm:$0xff] %vm4324_vm11, %v4308_v60 }
 0x2fb   : > { %v4311_v31 = vpop.xlane.xlu1 %4310 }
 0x2fc   : > { %4328 = vst.msk [vmem:[%s220_s23 + $0x18] sm:$0xff] %vm4324_vm11, %v4311_v31 }
 0x31b   : > { %v4314_v29 = vpop.xlane.xlu0 %4313 }
 0x31c   : > { %4329 = vst.msk [vmem:[%s220_s23 + $0x20] sm:$0xff] %vm4324_vm11, %v4314_v29 }
 0x340   : > { %v4317_v19 = vpop.xlane.xlu1 %4316 }
 0x341   : > { %4330 = vst.msk [vmem:[%s220_s23 + $0x28] sm:$0xff] %vm4324_vm11, %v4317_v19 }
 0x366   : > { %v4320_v28 = vpop.xlane.xlu0 %4319 }
 0x367   : > { %4331 = vst.msk [vmem:[%s220_s23 + $0x30] sm:$0xff] %vm4324_vm11, %v4320_v28 }
 0x382   : > { %v4323_v11 = vpop.xlane.xlu1 %4322 }
 0x383   : > { %4332 = vst.msk [vmem:[%s220_s23 + $0x38] sm:$0xff] %vm4324_vm11, %v4323_v11 }
 0x384 PF: > { %s12_s11 = sadd.s32 1, %s4626_s11   ;;  %s6299_s9 = smov %s4622_s10 }
 0x385   : > { %p9_p5 = scmp.ge.s32.totalorder %s12_s11, 4   ;;  %s6300_s10 = smov %s6302_s12 }
 0x387   :  { %11 = sbr.rel (!%p9_p5) target bundleno = 2 (0x2), region = 61 }

</bundles_post_ra>
